<compile_context>
chip_gen: v7x
topology: tpu7x:2x2x1
jax: 0.10.0
libtpu: 0.0.40
codegen_flags: <defaults>
</compile_context>

<pallas_src>
import numpy as np

import jax
import jax.numpy as jnp
from jax import lax
from jax.experimental import pallas as pl
from jax.experimental.pallas import tpu as pltpu


def _pos_attn_kernel(xq_ref, xk_ref, wb_ref, wc_ref, wd_ref,
                     bb_ref, bc_ref, bd_ref, o_ref,
                     q_scr, m_scr, l_scr, acc_scr):
    """One (batch, q-tile, k-tile) grid step of positional self-attention.

    xq_ref / xk_ref : (C, TQ) / (C, TK) tiles of x (channels on sublanes,
                      positions on lanes).
    o_ref           : (C, TQ) output tile (y + residual).
    Scratch (persist across the k-tile axis):
      q_scr  (C, TQ)  projected queries for the current q tile
      m_scr  (1, TQ)  running max of logits
      l_scr  (1, TQ)  running softmax denominator
      acc_scr(C, TQ)  running numerator (attn @ V, un-normalized)
    """
    ki = pl.program_id(2)
    nk = pl.num_programs(2)

    @pl.when(ki == 0)
    def _init():
        xq = xq_ref[...].astype(jnp.float32)                            # (C, TQ)
        q_scr[...] = (
            jnp.dot(wb_ref[...].astype(jnp.float32), xq,
                    preferred_element_type=jnp.float32)
            + bb_ref[...].astype(jnp.float32))
        m_scr[...] = jnp.full_like(m_scr, -jnp.inf)
        l_scr[...] = jnp.zeros_like(l_scr)
        acc_scr[...] = jnp.zeros_like(acc_scr)

    # Key / value projections for this key tile (1x1x1 convs == W @ x).
    xk = xk_ref[...].astype(jnp.float32)                                # (C, TK)
    k = (jnp.dot(wc_ref[...].astype(jnp.float32), xk,
                 preferred_element_type=jnp.float32)
         + bc_ref[...].astype(jnp.float32))                             # (C, TK)
    v = (jnp.dot(wd_ref[...].astype(jnp.float32), xk,
                 preferred_element_type=jnp.float32)
         + bd_ref[...].astype(jnp.float32))                             # (C, TK)

    q = q_scr[...]                                                      # (C, TQ)
    # s[kp, qp] = sum_c k[c, kp] * q[c, qp]  (attention logits, transposed)
    s = lax.dot_general(k, q, (((0,), (0,)), ((), ())),
                        preferred_element_type=jnp.float32)             # (TK, TQ)

    # Online softmax over the key-tile (sublane) axis.
    m_prev = m_scr[...]                                                 # (1, TQ)
    m_new = jnp.maximum(m_prev, jnp.max(s, axis=0, keepdims=True))      # (1, TQ)
    alpha = jnp.exp(m_prev - m_new)                                     # (1, TQ)
    p = jnp.exp(s - m_new)                                              # (TK, TQ)
    l_scr[...] = alpha * l_scr[...] + jnp.sum(p, axis=0, keepdims=True)
    acc_scr[...] = alpha * acc_scr[...] + jnp.dot(
        v, p, preferred_element_type=jnp.float32)                       # (C, TQ)
    m_scr[...] = m_new

    @pl.when(ki == nk - 1)
    def _finalize():
        y = acc_scr[...] / l_scr[...]                                   # (C, TQ)
        o_ref[...] = (y + xq_ref[...].astype(jnp.float32)).astype(o_ref.dtype)


def _pick_tile(S):
    """Largest lane-dense (multiple of 128) tile that divides S."""
    for t in (512, 256, 128):
        if S % t == 0:
            return t
    # TODO(synk): ragged S (not a multiple of 128) falls back to one full-S
    # tile; very large ragged volumes would need a masked tiled path.
    return S


def positional_attention(x, wb, bb, wc, bc, wd, bd):
    """x: (N, C, D, H, W); w*: (C, C) 1x1x1 conv weights; b*: (C,) biases."""
    N, C, D, H, W = x.shape
    S = D * H * W
    x_flat = x.reshape(N, C, S)

    TQ = _pick_tile(S)
    TK = _pick_tile(S)
    n_q = S // TQ
    n_k = S // TK

    bb2 = bb.reshape(C, 1)
    bc2 = bc.reshape(C, 1)
    bd2 = bd.reshape(C, 1)

    itemsize = jnp.dtype(x.dtype).itemsize
    cost = pl.CostEstimate(
        flops=int(4 * N * C * S * S + 6 * N * C * C * S),
        transcendentals=int(N * S * S),
        bytes_accessed=int((2 + n_q) * N * C * S * itemsize),
    )

    out_flat = pl.pallas_call(
        _pos_attn_kernel,
        out_shape=jax.ShapeDtypeStruct((N, C, S), x.dtype),
        grid_spec=pltpu.PrefetchScalarGridSpec(
            num_scalar_prefetch=0,
            grid=(N, n_q, n_k),
            in_specs=[
                # query-side x tile (also the residual input)
                pl.BlockSpec((None, C, TQ), lambda n, qi, ki: (n, 0, qi)),
                # key/value-side x tile
                pl.BlockSpec((None, C, TK), lambda n, qi, ki: (n, 0, ki)),
                # 1x1x1 conv weights / biases (tiny, fully resident)
                pl.BlockSpec((C, C), lambda n, qi, ki: (0, 0)),
                pl.BlockSpec((C, C), lambda n, qi, ki: (0, 0)),
                pl.BlockSpec((C, C), lambda n, qi, ki: (0, 0)),
                pl.BlockSpec((C, 1), lambda n, qi, ki: (0, 0)),
                pl.BlockSpec((C, 1), lambda n, qi, ki: (0, 0)),
                pl.BlockSpec((C, 1), lambda n, qi, ki: (0, 0)),
            ],
            out_specs=pl.BlockSpec((None, C, TQ), lambda n, qi, ki: (n, 0, qi)),
            scratch_shapes=[
                pltpu.VMEM((C, TQ), jnp.float32),   # projected queries
                pltpu.VMEM((1, TQ), jnp.float32),   # running max
                pltpu.VMEM((1, TQ), jnp.float32),   # running denominator
                pltpu.VMEM((C, TQ), jnp.float32),   # output accumulator
            ],
        ),
        compiler_params=pltpu.CompilerParams(
            dimension_semantics=("parallel", "parallel", "arbitrary")),
        cost_estimate=cost,
    )(x_flat, x_flat, wb, wc, wd, bb2, bc2, bd2)

    return out_flat.reshape(N, C, D, H, W)


def _reference_np(x, wb, bb, wc, bc, wd, bd):
    """Pure-numpy (float64) mirror of the PyTorch forward, for verification."""
    x64 = x.astype(np.float64)
    wb, wc, wd = (w.astype(np.float64) for w in (wb, wc, wd))
    bb, bc, bd = (b.astype(np.float64) for b in (bb, bc, bd))
    n, c, d, h, w = x64.shape
    S = d * h * w
    xf = x64.reshape(n, c, S)
    B = np.einsum('oi,nis->nos', wb, xf) + bb[None, :, None]    # (n, c, S)
    Cm = np.einsum('oi,nis->nos', wc, xf) + bc[None, :, None]
    Dm = np.einsum('oi,nis->nos', wd, xf) + bd[None, :, None]
    Bt = np.swapaxes(B, 1, 2)                                   # (n, S, c)
    Dt = np.swapaxes(Dm, 1, 2)
    logits = Bt @ Cm                                            # (n, S, S)
    logits -= logits.max(axis=-1, keepdims=True)
    p = np.exp(logits)
    attn = p / p.sum(axis=-1, keepdims=True)
    y = np.swapaxes(attn @ Dt, 1, 2).reshape(n, c, d, h, w)
    return y + x64


if __name__ == "__main__":
    key = jax.random.PRNGKey(0)
    kx, kwb, kbb, kwc, kbc, kwd, kbd = jax.random.split(key, 7)

    # Small shapes consistent with the module: batch=2, dim=8, spatial 8^3.
    N, C, D, H, W = 2, 8, 8, 8, 8            # S = 512 spatial positions
    scale = 1.0 / float(np.sqrt(C))
    x = jax.random.normal(kx, (N, C, D, H, W), dtype=jnp.float32)
    wb = jax.random.normal(kwb, (C, C), dtype=jnp.float32) * scale
    wc = jax.random.normal(kwc, (C, C), dtype=jnp.float32) * scale
    wd = jax.random.normal(kwd, (C, C), dtype=jnp.float32) * scale
    bb = jax.random.normal(kbb, (C,), dtype=jnp.float32) * 0.1
    bc = jax.random.normal(kbc, (C,), dtype=jnp.float32) * 0.1
    bd = jax.random.normal(kbd, (C,), dtype=jnp.float32) * 0.1

    out = positional_attention(x, wb, bb, wc, bc, wd, bd)
    out = jax.block_until_ready(out)

    ref = _reference_np(np.asarray(x), np.asarray(wb), np.asarray(bb),
                        np.asarray(wc), np.asarray(bc),
                        np.asarray(wd), np.asarray(bd))

    assert out.shape == x.shape and out.dtype == x.dtype
    assert np.allclose(np.asarray(out, dtype=np.float64), ref,
                       atol=2e-3, rtol=2e-3), "mismatch vs reference"

    print("KERNEL_OK")
</pallas_src>

<mosaic_0001>
module attributes {stable_mosaic.version = 11 : i64} {
  func.func @_pos_attn_kernel(%arg0: i32, %arg1: i32, %arg2: i32, %arg3: memref<1x8x512xf32, #tpu.memory_space<vmem>>, %arg4: memref<1x8x512xf32, #tpu.memory_space<vmem>>, %arg5: memref<8x8xf32, #tpu.memory_space<vmem>>, %arg6: memref<8x8xf32, #tpu.memory_space<vmem>>, %arg7: memref<8x8xf32, #tpu.memory_space<vmem>>, %arg8: memref<8x1xf32, #tpu.memory_space<vmem>>, %arg9: memref<8x1xf32, #tpu.memory_space<vmem>>, %arg10: memref<8x1xf32, #tpu.memory_space<vmem>>, %arg11: memref<1x8x512xf32, #tpu.memory_space<vmem>>, %arg12: memref<8x512xf32, #tpu.memory_space<vmem>>, %arg13: memref<1x512xf32, #tpu.memory_space<vmem>>, %arg14: memref<1x512xf32, #tpu.memory_space<vmem>>, %arg15: memref<8x512xf32, #tpu.memory_space<vmem>>) attributes {dimension_semantics = [#tpu.dimension_semantics<parallel>, #tpu.dimension_semantics<parallel>, #tpu.dimension_semantics<arbitrary>], iteration_bounds = array<i64: 2, 1, 1>, scalar_prefetch = 0 : i64, scratch_operands = 4 : i64, tpu.core_type = #tpu.core_type<tc>, window_params = [{transform_indices = @transform_0, window_bounds = array<i64: 1, 8, 512>}, {transform_indices = @transform_1, window_bounds = array<i64: 1, 8, 512>}, {pipeline_mode = #tpu.pipeline_mode<synchronous>, transform_indices = @transform_2, window_bounds = array<i64: 8, 8>}, {pipeline_mode = #tpu.pipeline_mode<synchronous>, transform_indices = @transform_3, window_bounds = array<i64: 8, 8>}, {pipeline_mode = #tpu.pipeline_mode<synchronous>, transform_indices = @transform_4, window_bounds = array<i64: 8, 8>}, {pipeline_mode = #tpu.pipeline_mode<synchronous>, transform_indices = @transform_5, window_bounds = array<i64: 8, 1>}, {pipeline_mode = #tpu.pipeline_mode<synchronous>, transform_indices = @transform_6, window_bounds = array<i64: 8, 1>}, {pipeline_mode = #tpu.pipeline_mode<synchronous>, transform_indices = @transform_7, window_bounds = array<i64: 8, 1>}, {transform_indices = @transform_8, window_bounds = array<i64: 1, 8, 512>}]} {
    %c0_i32 = arith.constant 0 : i32
    %0 = arith.cmpi eq, %arg2, %c0_i32 : i32
    %1 = arith.extui %0 : i1 to i32
    %c0_i32_0 = arith.constant 0 : i32
    %2 = arith.cmpi ne, %1, %c0_i32_0 : i32
    scf.if %2 {
      %c0_32 = arith.constant 0 : index
      %c0_33 = arith.constant 0 : index
      %c0_34 = arith.constant 0 : index
      %42 = vector.load %arg3[%c0_32, %c0_33, %c0_34] : memref<1x8x512xf32, #tpu.memory_space<vmem>>, vector<1x8x512xf32>
      %43 = vector.shape_cast %42 : vector<1x8x512xf32> to vector<8x512xf32>
      %c0_35 = arith.constant 0 : index
      %c0_36 = arith.constant 0 : index
      %44 = vector.load %arg5[%c0_35, %c0_36] : memref<8x8xf32, #tpu.memory_space<vmem>>, vector<8x8xf32>
      %cst_37 = arith.constant dense<0.000000e+00> : vector<8x512xf32>
      %45 = tpu.matmul %44, %43, %cst_37 {dimension_numbers = #tpu.dot_dimension_numbers<[1], [0], [0], [1], [0, 0, 1, 1], [], []>} : vector<8x8xf32>, vector<8x512xf32>, vector<8x512xf32> -> vector<8x512xf32>
      %c0_38 = arith.constant 0 : index
      %c0_39 = arith.constant 0 : index
      %46 = vector.load %arg8[%c0_38, %c0_39] : memref<8x1xf32, #tpu.memory_space<vmem>>, vector<8x1xf32>
      %47 = vector.broadcast %46 : vector<8x1xf32> to vector<8x512xf32>
      %48 = arith.addf %45, %47 : vector<8x512xf32>
      %c0_40 = arith.constant 0 : index
      %c0_41 = arith.constant 0 : index
      %49 = vector.load %arg12[%c0_40, %c0_41] : memref<8x512xf32, #tpu.memory_space<vmem>>, vector<8x512xf32>
      tpu.vector_store %arg12[%c0_40, %c0_41], %48 {strides = array<i32>} : memref<8x512xf32, #tpu.memory_space<vmem>>, vector<8x512xf32>,
      %cst_42 = arith.constant 0xFF800000 : f32
      %50 = vector.broadcast %cst_42 : f32 to vector<1x512xf32>
      %c0_43 = arith.constant 0 : index
      %c0_44 = arith.constant 0 : index
      %51 = vector.load %arg13[%c0_43, %c0_44] : memref<1x512xf32, #tpu.memory_space<vmem>>, vector<1x512xf32>
      tpu.vector_store %arg13[%c0_43, %c0_44], %50 {strides = array<i32>} : memref<1x512xf32, #tpu.memory_space<vmem>>, vector<1x512xf32>,
      %cst_45 = arith.constant 0.000000e+00 : f32
      %52 = vector.broadcast %cst_45 : f32 to vector<1x512xf32>
      %c0_46 = arith.constant 0 : index
      %c0_47 = arith.constant 0 : index
      %53 = vector.load %arg14[%c0_46, %c0_47] : memref<1x512xf32, #tpu.memory_space<vmem>>, vector<1x512xf32>
      tpu.vector_store %arg14[%c0_46, %c0_47], %52 {strides = array<i32>} : memref<1x512xf32, #tpu.memory_space<vmem>>, vector<1x512xf32>,
      %cst_48 = arith.constant 0.000000e+00 : f32
      %54 = vector.broadcast %cst_48 : f32 to vector<8x512xf32>
      %c0_49 = arith.constant 0 : index
      %c0_50 = arith.constant 0 : index
      %55 = vector.load %arg15[%c0_49, %c0_50] : memref<8x512xf32, #tpu.memory_space<vmem>>, vector<8x512xf32>
      tpu.vector_store %arg15[%c0_49, %c0_50], %54 {strides = array<i32>} : memref<8x512xf32, #tpu.memory_space<vmem>>, vector<8x512xf32>,
    } else {
    }
    %c0 = arith.constant 0 : index
    %c0_1 = arith.constant 0 : index
    %c0_2 = arith.constant 0 : index
    %3 = vector.load %arg4[%c0, %c0_1, %c0_2] : memref<1x8x512xf32, #tpu.memory_space<vmem>>, vector<1x8x512xf32>
    %4 = vector.shape_cast %3 : vector<1x8x512xf32> to vector<8x512xf32>
    %c0_3 = arith.constant 0 : index
    %c0_4 = arith.constant 0 : index
    %5 = vector.load %arg6[%c0_3, %c0_4] : memref<8x8xf32, #tpu.memory_space<vmem>>, vector<8x8xf32>
    %cst = arith.constant dense<0.000000e+00> : vector<8x512xf32>
    %6 = tpu.matmul %5, %4, %cst {dimension_numbers = #tpu.dot_dimension_numbers<[1], [0], [0], [1], [0, 0, 1, 1], [], []>} : vector<8x8xf32>, vector<8x512xf32>, vector<8x512xf32> -> vector<8x512xf32>
    %c0_5 = arith.constant 0 : index
    %c0_6 = arith.constant 0 : index
    %7 = vector.load %arg9[%c0_5, %c0_6] : memref<8x1xf32, #tpu.memory_space<vmem>>, vector<8x1xf32>
    %8 = vector.broadcast %7 : vector<8x1xf32> to vector<8x512xf32>
    %9 = arith.addf %6, %8 : vector<8x512xf32>
    %c0_7 = arith.constant 0 : index
    %c0_8 = arith.constant 0 : index
    %10 = vector.load %arg7[%c0_7, %c0_8] : memref<8x8xf32, #tpu.memory_space<vmem>>, vector<8x8xf32>
    %cst_9 = arith.constant dense<0.000000e+00> : vector<8x512xf32>
    %11 = tpu.matmul %10, %4, %cst_9 {dimension_numbers = #tpu.dot_dimension_numbers<[1], [0], [0], [1], [0, 0, 1, 1], [], []>} : vector<8x8xf32>, vector<8x512xf32>, vector<8x512xf32> -> vector<8x512xf32>
    %c0_10 = arith.constant 0 : index
    %c0_11 = arith.constant 0 : index
    %12 = vector.load %arg10[%c0_10, %c0_11] : memref<8x1xf32, #tpu.memory_space<vmem>>, vector<8x1xf32>
    %13 = vector.broadcast %12 : vector<8x1xf32> to vector<8x512xf32>
    %14 = arith.addf %11, %13 : vector<8x512xf32>
    %c0_12 = arith.constant 0 : index
    %c0_13 = arith.constant 0 : index
    %15 = vector.load %arg12[%c0_12, %c0_13] : memref<8x512xf32, #tpu.memory_space<vmem>>, vector<8x512xf32>
    %cst_14 = arith.constant dense<0.000000e+00> : vector<512x512xf32>
    %16 = tpu.matmul %9, %15, %cst_14 {dimension_numbers = #tpu.dot_dimension_numbers<[0], [0], [1], [1], [0, 1, 1, 1], [], []>} : vector<8x512xf32>, vector<8x512xf32>, vector<512x512xf32> -> vector<512x512xf32>
    %c0_15 = arith.constant 0 : index
    %c0_16 = arith.constant 0 : index
    %17 = vector.load %arg13[%c0_15, %c0_16] : memref<1x512xf32, #tpu.memory_space<vmem>>, vector<1x512xf32>
    %cst_17 = arith.constant dense<0xFF800000> : vector<512xf32>
    %18 = vector.multi_reduction <maximumf>, %16, %cst_17 [0] : vector<512x512xf32> to vector<512xf32>
    %19 = vector.shape_cast %18 : vector<512xf32> to vector<1x512xf32>
    %20 = arith.maximumf %17, %19 : vector<1x512xf32>
    %21 = arith.subf %17, %20 : vector<1x512xf32>
    %22 = math.exp %21 : vector<1x512xf32>
    %23 = vector.broadcast %20 : vector<1x512xf32> to vector<512x512xf32>
    %24 = arith.subf %16, %23 : vector<512x512xf32>
    %25 = math.exp %24 : vector<512x512xf32>
    %c0_18 = arith.constant 0 : index
    %c0_19 = arith.constant 0 : index
    %26 = vector.load %arg14[%c0_18, %c0_19] : memref<1x512xf32, #tpu.memory_space<vmem>>, vector<1x512xf32>
    %27 = arith.mulf %22, %26 : vector<1x512xf32>
    %cst_20 = arith.constant dense<0.000000e+00> : vector<512xf32>
    %28 = vector.multi_reduction <add>, %25, %cst_20 [0] : vector<512x512xf32> to vector<512xf32>
    %29 = vector.shape_cast %28 : vector<512xf32> to vector<1x512xf32>
    %30 = arith.addf %27, %29 : vector<1x512xf32>
    %c0_21 = arith.constant 0 : index
    %c0_22 = arith.constant 0 : index
    %31 = vector.load %arg14[%c0_21, %c0_22] : memref<1x512xf32, #tpu.memory_space<vmem>>, vector<1x512xf32>
    tpu.vector_store %arg14[%c0_21, %c0_22], %30 {strides = array<i32>} : memref<1x512xf32, #tpu.memory_space<vmem>>, vector<1x512xf32>,
    %c0_23 = arith.constant 0 : index
    %c0_24 = arith.constant 0 : index
    %32 = vector.load %arg15[%c0_23, %c0_24] : memref<8x512xf32, #tpu.memory_space<vmem>>, vector<8x512xf32>
    %33 = vector.broadcast %22 : vector<1x512xf32> to vector<8x512xf32>
    %34 = arith.mulf %33, %32 : vector<8x512xf32>
    %cst_25 = arith.constant dense<0.000000e+00> : vector<8x512xf32>
    %35 = tpu.matmul %14, %25, %cst_25 {dimension_numbers = #tpu.dot_dimension_numbers<[1], [0], [0], [1], [0, 0, 1, 1], [], []>} : vector<8x512xf32>, vector<512x512xf32>, vector<8x512xf32> -> vector<8x512xf32>
    %36 = arith.addf %34, %35 : vector<8x512xf32>
    %c0_26 = arith.constant 0 : index
    %c0_27 = arith.constant 0 : index
    %37 = vector.load %arg15[%c0_26, %c0_27] : memref<8x512xf32, #tpu.memory_space<vmem>>, vector<8x512xf32>
    tpu.vector_store %arg15[%c0_26, %c0_27], %36 {strides = array<i32>} : memref<8x512xf32, #tpu.memory_space<vmem>>, vector<8x512xf32>,
    %c0_28 = arith.constant 0 : index
    %c0_29 = arith.constant 0 : index
    %38 = vector.load %arg13[%c0_28, %c0_29] : memref<1x512xf32, #tpu.memory_space<vmem>>, vector<1x512xf32>
    tpu.vector_store %arg13[%c0_28, %c0_29], %20 {strides = array<i32>} : memref<1x512xf32, #tpu.memory_space<vmem>>, vector<1x512xf32>,
    %c0_i32_30 = arith.constant 0 : i32
    %39 = arith.cmpi eq, %arg2, %c0_i32_30 : i32
    %40 = arith.extui %39 : i1 to i32
    %c0_i32_31 = arith.constant 0 : i32
    %41 = arith.cmpi ne, %40, %c0_i32_31 : i32
    scf.if %41 {
      %c0_32 = arith.constant 0 : index
      %c0_33 = arith.constant 0 : index
      %42 = vector.load %arg15[%c0_32, %c0_33] : memref<8x512xf32, #tpu.memory_space<vmem>>, vector<8x512xf32>
      %c0_34 = arith.constant 0 : index
      %c0_35 = arith.constant 0 : index
      %43 = vector.load %arg14[%c0_34, %c0_35] : memref<1x512xf32, #tpu.memory_space<vmem>>, vector<1x512xf32>
      %44 = vector.broadcast %43 : vector<1x512xf32> to vector<8x512xf32>
      %45 = arith.divf %42, %44 : vector<8x512xf32>
      %c0_36 = arith.constant 0 : index
      %c0_37 = arith.constant 0 : index
      %c0_38 = arith.constant 0 : index
      %46 = vector.load %arg3[%c0_36, %c0_37, %c0_38] : memref<1x8x512xf32, #tpu.memory_space<vmem>>, vector<1x8x512xf32>
      %47 = vector.shape_cast %46 : vector<1x8x512xf32> to vector<8x512xf32>
      %48 = arith.addf %45, %47 : vector<8x512xf32>
      %c0_39 = arith.constant 0 : index
      %c0_40 = arith.constant 0 : index
      %c0_41 = arith.constant 0 : index
      %49 = vector.load %arg11[%c0_39, %c0_40, %c0_41] : memref<1x8x512xf32, #tpu.memory_space<vmem>>, vector<1x8x512xf32>
      %50 = vector.shape_cast %49 : vector<1x8x512xf32> to vector<8x512xf32>
      %51 = vector.shape_cast %48 : vector<8x512xf32> to vector<1x8x512xf32>
      tpu.vector_store %arg11[%c0_39, %c0_40, %c0_41], %51 {strides = array<i32>} : memref<1x8x512xf32, #tpu.memory_space<vmem>>, vector<1x8x512xf32>,
    } else {
    }
    return
  }
  func.func @transform_0(%arg0: i32, %arg1: i32, %arg2: i32) -> (i32, i32, i32) {
    %c0_i32 = arith.constant 0 : i32
    %c0_i32_0 = arith.constant 0 : i32
    return %arg0, %c0_i32, %arg1 : i32, i32, i32
  }
  func.func @transform_1(%arg0: i32, %arg1: i32, %arg2: i32) -> (i32, i32, i32) {
    %c0_i32 = arith.constant 0 : i32
    %c0_i32_0 = arith.constant 0 : i32
    return %arg0, %c0_i32, %arg2 : i32, i32, i32
  }
  func.func @transform_2(%arg0: i32, %arg1: i32, %arg2: i32) -> (i32, i32) {
    %c0_i32 = arith.constant 0 : i32
    %c0_i32_0 = arith.constant 0 : i32
    %c0_i32_1 = arith.constant 0 : i32
    return %c0_i32, %c0_i32_0 : i32, i32
  }
  func.func @transform_3(%arg0: i32, %arg1: i32, %arg2: i32) -> (i32, i32) {
    %c0_i32 = arith.constant 0 : i32
    %c0_i32_0 = arith.constant 0 : i32
    %c0_i32_1 = arith.constant 0 : i32
    return %c0_i32, %c0_i32_0 : i32, i32
  }
  func.func @transform_4(%arg0: i32, %arg1: i32, %arg2: i32) -> (i32, i32) {
    %c0_i32 = arith.constant 0 : i32
    %c0_i32_0 = arith.constant 0 : i32
    %c0_i32_1 = arith.constant 0 : i32
    return %c0_i32, %c0_i32_0 : i32, i32
  }
  func.func @transform_5(%arg0: i32, %arg1: i32, %arg2: i32) -> (i32, i32) {
    %c0_i32 = arith.constant 0 : i32
    %c0_i32_0 = arith.constant 0 : i32
    %c0_i32_1 = arith.constant 0 : i32
    return %c0_i32, %c0_i32_0 : i32, i32
  }
  func.func @transform_6(%arg0: i32, %arg1: i32, %arg2: i32) -> (i32, i32) {
    %c0_i32 = arith.constant 0 : i32
    %c0_i32_0 = arith.constant 0 : i32
    %c0_i32_1 = arith.constant 0 : i32
    return %c0_i32, %c0_i32_0 : i32, i32
  }
  func.func @transform_7(%arg0: i32, %arg1: i32, %arg2: i32) -> (i32, i32) {
    %c0_i32 = arith.constant 0 : i32
    %c0_i32_0 = arith.constant 0 : i32
    %c0_i32_1 = arith.constant 0 : i32
    return %c0_i32, %c0_i32_0 : i32, i32
  }
  func.func @transform_8(%arg0: i32, %arg1: i32, %arg2: i32) -> (i32, i32, i32) {
    %c0_i32 = arith.constant 0 : i32
    %c0_i32_0 = arith.constant 0 : i32
    return %arg0, %c0_i32, %arg1 : i32, i32, i32
  }
}

</mosaic_0001>

<bundles_post_ra>
// kernel: tpu_custom_call.1
= control target key start
LH: loop header
LB: loop body
LE: loop exit
PB: predicated region body
PF: predicated region fallthrough
CT: control target
= control target key end

     0   :  { %s9377_s0 = inlined_call_operand.hbm [shape: f32[2,8,512], index: 0, kind: input, shape index: {}]   ;;  %s9378_s1 = inlined_call_operand.hbm [shape: f32[2,8,512], index: 1, kind: input, shape index: {}]   ;;  %s9379_s2 = inlined_call_operand.vmem [shape: f32[8,8], index: 2, kind: input, shape index: {}]   ;;  %s9380_s3 = inlined_call_operand.vmem [shape: f32[8,8], index: 3, kind: input, shape index: {}]   ;;  %s9381_s4 = inlined_call_operand.vmem [shape: f32[8,8], index: 4, kind: input, shape index: {}]   ;;  %s9382_s5 = inlined_call_operand.vmem [shape: f32[8,1], index: 5, kind: input, shape index: {}]   ;;  %s9383_s6 = inlined_call_operand.vmem [shape: f32[8,1], index: 6, kind: input, shape index: {}]   ;;  %s9384_s7 = inlined_call_operand.vmem [shape: f32[8,1], index: 7, kind: input, shape index: {}]   ;;  %s9385_s8 = inlined_call_operand.hbm [shape: f32[2,8,512], index: 8, kind: output, shape index: {}]  }
   0x1   :  { %9986 = sst [smem:[#allocation263_spill]] %s9377_s0 }
   0x2   :  { %13 = vsyncpa [#allocation7], 0 }
   0x3   :  { %15 = vsyncpa [#allocation7 + $0x1], 0 }
   0x4   :  { %16 = vsyncpa [#allocation10], 0 }
   0x5   :  { %18 = vsyncpa [#allocation10 + $0x1], 0 }
   0x6   :  { %19 = vsyncpa [#allocation8], 0 }
   0x7   :  { %21 = vsyncpa [#allocation8 + $0x1], 0  ;;  %s5222_s27 = smov 0   ;;  %s5224_s28 = smov 0  }
   0x8   :  { %s5226_s29 = smov 0   ;;  %s5228_s30 = smov 0  }
   0x9   :  { %s5230_s9 = smov 0   ;;  %s5232_s10 = smov 0  }
   0xa LB: > { %9987 = sst [smem:[#allocation15_spill]] %s5164_s9  ;;  %s4011_s11 = sadd.s32 4294967295, %s5168_s10   ;;  %s5168_s10 = sphi %s5232_s10, %s27_s10   ;;  %s5164_s9 = sphi %s5230_s9, %s11413_s9   ;;  %s5160_s30 = sphi %s5228_s30, %s11412_s30   ;;  %s5156_s29 = sphi %s5226_s29, %s11416_s29   ;;  %s5152_s28 = sphi %s5224_s28, %s11415_s28   ;;  %s5148_s27 = sphi %s5222_s27, %s11414_s27  }
   0xb   : > { %s4012_s12 = sadd.s32 4294967294, %s5168_s10   ;;  %s46_s13 = sadd.s32 1, %s5164_s9 }
   0xc   : > { %s55_s14 = sadd.s32 1, %s5156_s29  ;;  %p48_p0 = scmp.ge.s32.totalorder %s46_s13, 2 }
   0xd   : > { %p62_p1 = scmp.ne.s32.totalorder %s5156_s29, %s5152_s28  ;;  %p63_p2 = scmp.eq.s32.totalorder %s5168_s10, 0 }
   0xe   : > { %p68_p3 = scmp.ne.s32.totalorder %s5152_s28, %s5148_s27  ;;  %s11418_s13 = smov (%p48_p0, %s46_s13), 0 }
   0xf   : > { %9988 = sst [smem:[#allocation16_spill]] %s11418_s13  ;;  %p5263_p4 = por %p63_p2, %p62_p1 }
  0x10   : > { %p69_p5 = scmp.eq.s32.totalorder %s4011_s11, 0  ;;  %s50_s16 = ssub.s32 %s5164_s9, %s11418_s13 }
  0x11   : > { %p248_p6 = scmp.eq.s32.totalorder %s4011_s11, 1  ;;  %p53_p7 = scmp.eq.s32.totalorder %s50_s16, 0 }
  0x12   : > { %p5269_p8 = por %p69_p5, %p68_p3  ;;  %p254_p10 = scmp.eq.s32.totalorder %s4012_s12, 1 }
  0x13   : > { %p5273_p9 = por %p248_p6, %p62_p1  ;;  %p4444_p13 = scmp.lt.s32.totalorder %s5168_s10, 2 }
  0x14   : > { %s9990_s17 = scalar_select %p5269_p8, 1, 0 }
  0x15   : > { %s9991_s18 = scalar_select %p5273_p9, 1, 0 }
  0x16   : > { %s5278_s19 = scalar_select %p53_p7, %s5156_s29, %s55_s14  }
  0x17   : > { %p5280_p11 = por %p254_p10, %p68_p3  ;;  %s5287_s21 = sand.u32 1, %s5156_s29  }
  0x18   : > { %s9386_s22 = sshll.u32 %s5287_s21, 5  ;;  %s9387_s23 = sshll.u32 %s5164_s9, 9 }
  0x19   : > { %s9992_s20 = scalar_select %p5280_p11, 1, 0 }
  0x1a   : > { %s9993_s0 = sld [smem:[#allocation263_spill]]  ;;  %s296_s11 = scalar_lea.vmem [#allocation6], %s9386_s22 }
  0x1b   : > { %s306_s12 = sshll.u32 %s296_s11, 4  ;;  %p5304_p0 = pnand %p4444_p13, %p5263_p4  ;;  %s5300_s12 = int_to_ptr.vmem [resolvable:$true] %s306_s12 }
  0x1c   : > { %s293_s16 = scalar_lea.sflag [#allocation7], %s5287_s21 }
  0x1d   : > { %p5024_p5 = pneg %p5304_p0 }
  0x20   : > { %s5296_s26 = scalar_lea.hbm %s9993_s0, %s9387_s23  ;;  %s5027_s15 = scalar_lea.hbm %s9993_s0, 1024 }
  0x21   : > { %s5022_s24 = scalar_lea.hbm %s5296_s26, 512  ;;  %p5028_p4 = scmp.lt.u32.totalorder %s5296_s26, %s9993_s0 }
  0x22   : > { %p5023_p3 = scmp.ne.s32.totalorder %s5296_s26, %s5022_s24  ;;  %p5029_p10 = scmp.lt.u32.totalorder %s5027_s15, %s5022_s24 }
  0x23   : > { %p5031_p12 = scmp.lt.u32.totalorder %s5022_s24, %s5296_s26 }
  0x24   : > { %p5025_p6 = pnand %p5024_p5, %p5023_p3  ;;  %p5030_p13 = por %p5029_p10, %p5028_p4 }
  0x26   : > { %p5026_p7 = pneg %p5025_p6  ;;  %p5032_p1 = por %p5031_p12, %p5030_p13 }
  0x28   : > { %p5033_p2 = pnand %p5032_p1, %p5026_p7 }
  0x2a   : > { %5036 = shalt.err (!%p5033_p2)
}
  0x2b   : > { %s5037_s13 = scalar_lea.vmem %s5300_s12, 512  ;;  %s5170_s25 = smov [#allocation6]  }
  0x2c   : > { %p5038_p3 = scmp.ne.s32.totalorder %s5300_s12, %s5037_s13  ;;  %s5042_s11 = sshll.u32 %s5170_s25, 4  ;;  %s5043_s11 = int_to_ptr.vmem [resolvable:$false] %s5042_s11 }
  0x2d   : > { %s5044_s22 = scalar_lea.vmem %s5043_s11, 1024  ;;  %p5045_p9 = scmp.lt.s32.totalorder %s5300_s12, %s5043_s11 }
  0x2e   : > { %p5040_p6 = pnand %p5038_p3, %p5024_p5  ;;  %p5046_p4 = scmp.lt.s32.totalorder %s5044_s22, %s5037_s13 }
  0x30   : > { %p5041_p11 = pneg %p5040_p6  ;;  %p5047_p10 = por %p5046_p4, %p5045_p9 }
  0x32   : > { %p5048_p12 = pnand %p5047_p10, %p5041_p11 }
  0x34   : > { %5051 = shalt.err (!%p5048_p12)
}
  0x35   : > { %4436 = dma.hbm_to_vmem [thread:$0]  (!%p5304_p0), %s5296_s26, 512, %s5300_s12, %s293_s16  }
  0x36   : > { %p9995_p1 = scmp.lt.s32.totalorder %s5168_s10, 3  ;;  %p9996_p2 = scmp.ge.s32.totalorder %s5168_s10, 1 }
  0x37   : > { %s9998_s13 = sshll.u32 %s5164_s9, 9  ;;  %s9999_s11 = sshll.u32 %s5287_s21, 5 }
  0x38   : > { %p5340_p7 = pnand %p9996_p2, %p9995_p1  ;;  %s5349_s25 = scalar_lea.hbm %s9378_s1, %s9998_s13 }
  0x39   : > { %s317_s22 = scalar_lea.vmem [#allocation9], %s9999_s11  ;;  %s314_s26 = scalar_lea.sflag [#allocation10], %s5287_s21 }
  0x3a   : > { %s9997_s23 = scalar_select %p5340_p7, 1, 0 }
  0x3b   : > { %s327_s0 = sshll.u32 %s317_s22, 4  ;;  %s5052_s12 = scalar_lea.hbm %s5349_s25, 512  ;;  %s328_s0 = int_to_ptr.vmem [resolvable:$true] %s327_s0 }
  0x3c   : > { %p5053_p9 = scmp.ne.s32.totalorder %s5349_s25, %s5052_s12  ;;  %s5057_s13 = scalar_lea.hbm %s9378_s1, 1024 }
  0x3d   : > { %p5058_p3 = scmp.lt.u32.totalorder %s5349_s25, %s9378_s1  ;;  %p5059_p6 = scmp.lt.u32.totalorder %s5057_s13, %s5052_s12 }
  0x3e   : > { %p5055_p11 = pnand %p5053_p9, %p5024_p5  ;;  %p5061_p10 = scmp.lt.u32.totalorder %s5052_s12, %s5349_s25 }
  0x3f   : > { %p5060_p4 = por %p5059_p6, %p5058_p3 }
  0x40   : > { %p5056_p13 = pneg %p5055_p11 }
  0x41   : > { %p5062_p12 = por %p5061_p10, %p5060_p4 }
  0x43   : > { %p5063_p1 = pnand %p5062_p12, %p5056_p13 }
  0x45   : > { %5066 = shalt.err (!%p5063_p1)
}
  0x46   : > { %s5067_s21 = scalar_lea.vmem %s328_s0, 512  ;;  %s5171_s11 = smov [#allocation9]  }
  0x47   : > { %p5068_p2 = scmp.ne.s32.totalorder %s328_s0, %s5067_s21  ;;  %s5072_s9 = sshll.u32 %s5171_s11, 4  ;;  %s5073_s9 = int_to_ptr.vmem [resolvable:$false] %s5072_s9 }
  0x48   : > { %s5074_s22 = scalar_lea.vmem %s5073_s9, 1024  ;;  %p5075_p8 = scmp.lt.s32.totalorder %s328_s0, %s5073_s9 }
  0x49   : > { %p5070_p9 = pnand %p5068_p2, %p5024_p5  ;;  %p5076_p7 = scmp.lt.s32.totalorder %s5074_s22, %s5067_s21 }
  0x4b   : > { %p5071_p11 = pneg %p5070_p9  ;;  %p5077_p3 = por %p5076_p7, %p5075_p8 }
  0x4d   : > { %p5078_p6 = pnand %p5077_p3, %p5071_p11 }
  0x4f   : > { %5081 = shalt.err (!%p5078_p6)
}
  0x50   : > { %4439 = dma.hbm_to_vmem [thread:$0]  (!%p5304_p0), %s5349_s25, 512, %s328_s0, %s314_s26  }
  0x51   : > { %p10000_p13 = scmp.ne.s32.totalorder %s9997_s23, 0 }
  0x53   : > { %336 = sbr.rel (%p10000_p13) target bundleno = 1528 (0x5f8), region = 52 }
  0x5a   : > { %s5376_s12 = sand.u32 1, %s5152_s28   ;;  %p10001_p8 = scmp.ne.s32.totalorder %s9990_s17, 0 }
  0x5b   : > { %s5379_s16 = sshll.u32 %s5376_s12, 5  ;;  %s339_s13 = scalar_lea.sflag [#allocation7], %s5376_s12 }
  0x5c   : > { %s5383_s24 = scalar_lea.vmem [#allocation6], %s5379_s16 }
  0x5d   : > { %5135 = dma.done.wait (%p10001_p8), %s339_s13, 512  }
  0x5e   : > { %5137 = vsyncadd (%p10001_p8), %s339_s13, 4294966784  ;;  %s348_s0 = scalar_lea.sflag [#allocation10], %s5376_s12  ;;  %s351_s14 = scalar_lea.vmem [#allocation9], %s5379_s16 }
  0x5f   : > { %5139 = dma.done.wait (%p10001_p8), %s348_s0, 512  }
  0x60   : > { %5141 = vsyncadd (%p10001_p8), %s348_s0, 4294966784  ;;  %v9392_v0 = vmov 0.0   ;;  %v5173_v1 = vmov 0   ;;  %v397_v2 = vld [vmem:[%s5383_s24 + $0x8] sm:$0xff]  ;;  %v399_v3 = vld [vmem:[%s5383_s24 + $0x18] sm:$0xff]  ;;  %vm407_vm0 = vcmask 64512  }
  0x61   : > { %475 = vmatprep.mubr.f32.mxu0 %v9392_v0  ;;  %546 = vmatprep.mubr.f32.mxu1 %v9392_v0  ;;  %v396_v4 = vld [vmem:[%s5383_s24] sm:$0xff]  ;;  %v398_v5 = vld [vmem:[%s5383_s24 + $0x10] sm:$0xff]  ;;  %v400_v6 = vld [vmem:[%s9379_s2] sm:$0xff]  ;;  %s4166_s17 = sshll.u32 %s5160_s30, 9  ;;  %s388_s23 = scalar_lea.vmem [#allocation11], %s5379_s16 }
  0x62   : > { %4498 = vset.pattern.permute.xlu0 %v5173_v1  ;;  %411 = vmatprep.subr.mxu0 %v397_v2  ;;  %v568_v7 = vld [vmem:[%s351_s14 + $0x8] sm:$0xff]  ;;  %v570_v8 = vld [vmem:[%s351_s14 + $0x18] sm:$0xff]  ;;  %v567_v9 = vld [vmem:[%s351_s14] sm:$0xff]  ;;  %s3898_s25 = sshll.u32 %s388_s23, 4  ;;  %s9328_s21 = scalar_lea.hbm %s9385_s8, %s4166_s17  ;;  %s9330_s25 = int_to_ptr.vmem [resolvable:$true] %s3898_s25 }
  0x63   : > { %482 = vmatprep.subr.mxu1 %v399_v3  ;;  %412 = vmatpush1.msra.mxu0 %v396_v4  ;;  %v569_v10 = vld [vmem:[%s351_s14 + $0x10] sm:$0xff]  ;;  %v571_v11 = vld [vmem:[%s9380_s3] sm:$0xff]  ;;  %s3882_s30 = scalar_lea.sflag [#allocation8], %s5376_s12  ;;  %s5082_s16 = scalar_lea.vmem %s9330_s25, 512 }
  0x64   : > { %483 = vmatpush1.msra.mxu1 %v398_v5  ;;  %4025 = vmatmul.mubr.msk.f32.vlgmr.msra.gmra.mrb[0].mxu0 %vm407_vm0, %v400_v6  ;;  %v572_v12 = vld [vmem:[%s9383_s6] sm:$0xff]  ;;  %p5083_p0 = scmp.ne.s32.totalorder %s9330_s25, %s5082_s16  ;;  %p11409_p5 = scmp.ne.s32.totalorder %s9991_s18, 0 }
  0x65   : > { %4026 = vmatmul.mubr.msk.f32.vlgmr.msra.gmra.mrb[0].mxu1 %vm407_vm0, %v400_v6  ;;  %582 = vmatprep.subr.mxu0 %v568_v7  ;;  %v401_v13 = vld [vmem:[%s9382_s5] sm:$0xff] }
  0x66   : > { %653 = vmatprep.subr.mxu1 %v570_v8  ;;  %583 = vmatpush1.msra.mxu0 %v567_v9  ;;  %v724_v14 = vld [vmem:[%s9381_s4] sm:$0xff]  ;;  %p5084_p7 = pnand %p5083_p0, %p11409_p5 }
  0x67   : > { %646 = vmatprep.mubr.f32.mxu0 %v9392_v0  ;;  %654 = vmatpush1.msra.mxu1 %v569_v10  ;;  %v725_v39 = vld [vmem:[%s9384_s7] sm:$0xff] }
  0x68   : > { %717 = vmatprep.mubr.f32.mxu1 %v9392_v0  ;;  %4027 = vmatmul.mubr.msk.f32.vlgmr.msra.gmra.mrb[2].mxu0 %vm407_vm0, %v571_v11  ;;  %p5085_p4 = pneg %p5084_p7 }
  0x69   : > { %4028 = vmatmul.mubr.msk.f32.vlgmr.msra.gmra.mrb[2].mxu1 %vm407_vm0, %v571_v11  ;;  %575 = vperm.xlu0 %4498, %v572_v12  }
  0x6a   : > { %734 = vmatprep.subr.mxu0 %v568_v7  ;;  %798 = vmatprep.mubr.f32.mxu0 %v9392_v0 }
  0x6b   : > { %735 = vmatpush1.msra.mxu0 %v567_v9  ;;  %805 = vmatprep.subr.mxu1 %v570_v8 }
  0x6c   : > { %869 = vmatprep.mubr.f32.mxu1 %v9392_v0  ;;  %806 = vmatpush1.msra.mxu1 %v569_v10 }
  0x6d   : > { %404 = vperm.xlu0 %4498, %v401_v13   ;;  %4029 = vmatmul.mubr.msk.f32.vlgmr.msra.gmra.mrb[4].mxu0 %vm407_vm0, %v724_v14 }
  0x6e   : > { %4030 = vmatmul.mubr.msk.f32.vlgmr.msra.gmra.mrb[4].mxu1 %vm407_vm0, %v724_v14  ;;  %1264 = vmatprep.mubr.f32.mxu0 %v9392_v0 }
  0x6f   : > { %1713 = vmatprep.mubr.f32.mxu1 %v9392_v0 }
  0xe8   : > { %v576_v15 = vpop.permute.xlu0 %575 }
  0xec   : > { %v405_v16 = vpop.permute.xlu0 %404 }
 0x137   : > { %v477_v17 = vpop.f32.mrb[0].mxu0 }
 0x138   : > { %v548_v18 = vpop.f32.mrb[0].mxu1  ;;  %v479_v19 = vpop.f32.mrb[1].mxu0  ;;  %v478_v24 = vadd.f32 %v477_v17, %v405_v16 }
 0x139   : > { %v549_v20 = vadd.f32 %v548_v18, %v405_v16  ;;  %v550_v21 = vpop.f32.mrb[1].mxu1  ;;  %v480_v22 = vadd.f32 %v479_v19, %v405_v16 }
 0x13a   : > { %v551_v23 = vadd.f32 %v550_v21, %v405_v16 }
 0x13b   : > { %v648_v25 = vpop.f32.mrb[2].mxu0  ;;  %1200 = vmatprep.subr.mxu0 %v480_v22 }
 0x13c   : > { %v719_v26 = vpop.f32.mrb[2].mxu1  ;;  %1649 = vmatprep.subr.mxu1 %v551_v23  ;;  %v650_v28 = vpop.f32.mrb[3].mxu0  ;;  %1201 = vmatpush1.msra.mxu0 %v478_v24  ;;  %v649_v30 = vadd.f32 %v648_v25, %v576_v15 }
 0x13d   : > { %v720_v27 = vadd.f32 %v719_v26, %v576_v15  ;;  %v721_v29 = vpop.f32.mrb[3].mxu1  ;;  %1650 = vmatpush1.msra.mxu1 %v549_v20  ;;  %v651_v31 = vadd.f32 %v650_v28, %v576_v15 }
 0x13e   : > { %880 = vxpose.xlu1.b32.start.end [1/1] (short) %v649_v30, 128  ;;  %v722_v32 = vadd.f32 %v721_v29, %v576_v15 }
 0x13f   : > { %944 = vxpose.xlu0.b32.start.end [1/1] (short) %v720_v27, 128 }
 0x140   : > { %v5519_v58 = vpop.f32.mrb[4].mxu0 }
 0x141   : > { %v5521_v59 = vpop.f32.mrb[4].mxu1  ;;  %v5527_v61 = vpop.f32.mrb[5].mxu0 }
 0x142   : > { %v5525_v60 = vpop.f32.mrb[5].mxu1 }
 0x17b   : > { %912 = vxpose.xlu1.b32.start.end [1/1] (short) %v651_v31, 128 }
 0x17c   : > { %976 = vxpose.xlu0.b32.start.end [1/1] (short) %v722_v32, 128 }
 0x199   : > { %4499 = vset.pattern.permute.xlu1 %v5173_v1 }
 0x1be   : > { %v896_v33 = vpop.trf.xlu1 }
 0x1bf   : > { %4031 = vmatmul.mubr.msk.f32.vlgmr.msra.gmra.mrb[6].mxu0 %vm407_vm0, %v896_v33  ;;  %4095 = vmatmul.mubr.msk.f32.vlgmr.msra.gmra.mrb[6].mxu1 %vm407_vm0, %v896_v33  ;;  %v5489_v48 = vpop.trf.xlu0 }
 0x1c0   : > { %1719 = vmatprep.mubr.f32.mxu1 %v9392_v0  ;;  %1270 = vmatprep.mubr.f32.mxu0 %v9392_v0 }
 0x1c2   : > { %v897_v34 = vpop.trf.xlu1 }
 0x1c3   : > { %4032 = vmatmul.mubr.msk.f32.gmra.mrb[8].mxu0 %vm407_vm0, %v897_v34  ;;  %4096 = vmatmul.mubr.msk.f32.gmra.mrb[8].mxu1 %vm407_vm0, %v897_v34  ;;  %v5497_v51 = vpop.trf.xlu0 }
 0x1c4   : > { %1725 = vmatprep.mubr.f32.mxu1 %v9392_v0  ;;  %1276 = vmatprep.mubr.f32.mxu0 %v9392_v0 }
 0x1c6   : > { %v898_v35 = vpop.trf.xlu1 }
 0x1c7   : > { %4033 = vmatmul.mubr.msk.f32.gmra.mrb[10].mxu0 %vm407_vm0, %v898_v35  ;;  %4097 = vmatmul.mubr.msk.f32.gmra.mrb[10].mxu1 %vm407_vm0, %v898_v35  ;;  %v5505_v53 = vpop.trf.xlu0 }
 0x1c8   : > { %1731 = vmatprep.mubr.f32.mxu1 %v9392_v0  ;;  %1282 = vmatprep.mubr.f32.mxu0 %v9392_v0 }
 0x1ca   : > { %v899_v36 = vpop.trf.xlu1 }
 0x1cb   : > { %4034 = vmatmul.mubr.msk.f32.gmra.mrb[12].mxu0 %vm407_vm0, %v899_v36  ;;  %4098 = vmatmul.mubr.msk.f32.gmra.mrb[12].mxu1 %vm407_vm0, %v899_v36  ;;  %v5513_v56 = vpop.trf.xlu0 }
 0x1cc   : > { %1737 = vmatprep.mubr.f32.mxu1 %v9392_v0  ;;  %1288 = vmatprep.mubr.f32.mxu0 %v9392_v0 }
 0x1ce   : > { %v900_v37 = vpop.trf.xlu1 }
 0x1cf   : > { %4035 = vmatmul.mubr.msk.f32.gmra.mrb[14].mxu0 %vm407_vm0, %v900_v37  ;;  %4099 = vmatmul.mubr.msk.f32.gmra.mrb[14].mxu1 %vm407_vm0, %v900_v37  ;;  %v5529_v62 = vpop.trf.xlu0 }
 0x1d0   : > { %1743 = vmatprep.mubr.f32.mxu1 %v9392_v0  ;;  %1294 = vmatprep.mubr.f32.mxu0 %v9392_v0 }
 0x1d2   : > { %v901_v38 = vpop.trf.xlu1 }
 0x1d3   : > { %4036 = vmatmul.mubr.msk.f32.gmra.mrb[16].mxu0 %vm407_vm0, %v901_v38  ;;  %4100 = vmatmul.mubr.msk.f32.gmra.mrb[16].mxu1 %vm407_vm0, %v901_v38  ;;  %v5537_v2 = vpop.trf.xlu0 }
 0x1d4   : > { %1749 = vmatprep.mubr.f32.mxu1 %v9392_v0  ;;  %1300 = vmatprep.mubr.f32.mxu0 %v9392_v0 }
 0x1d5   : > { %728 = vperm.xlu1 %4499, %v725_v39  }
 0x1d6   : > { %v902_v40 = vpop.trf.xlu1 }
 0x1d7   : > { %4037 = vmatmul.mubr.msk.f32.gmra.mrb[18].mxu0 %vm407_vm0, %v902_v40  ;;  %4101 = vmatmul.mubr.msk.f32.gmra.mrb[18].mxu1 %vm407_vm0, %v902_v40  ;;  %v5545_v4 = vpop.trf.xlu0 }
 0x1d8   : > { %1755 = vmatprep.mubr.f32.mxu1 %v9392_v0  ;;  %1306 = vmatprep.mubr.f32.mxu0 %v9392_v0 }
 0x1da   : > { %v903_v41 = vpop.trf.xlu1 }
 0x1db   : > { %4038 = vmatmul.mubr.msk.f32.gmra.mrb[20].mxu0 %vm407_vm0, %v903_v41  ;;  %4102 = vmatmul.mubr.msk.f32.gmra.mrb[20].mxu1 %vm407_vm0, %v903_v41  ;;  %v5553_v7 = vpop.trf.xlu0 }
 0x1dc   : > { %1761 = vmatprep.mubr.f32.mxu1 %v9392_v0  ;;  %1312 = vmatprep.mubr.f32.mxu0 %v9392_v0 }
 0x1de   : > { %v904_v42 = vpop.trf.xlu1 }
 0x1df   : > { %4039 = vmatmul.mubr.msk.f32.gmra.mrb[22].mxu0 %vm407_vm0, %v904_v42  ;;  %4103 = vmatmul.mubr.msk.f32.gmra.mrb[22].mxu1 %vm407_vm0, %v904_v42  ;;  %v5561_v9 = vpop.trf.xlu0 }
 0x1e0   : > { %1767 = vmatprep.mubr.f32.mxu1 %v9392_v0  ;;  %1318 = vmatprep.mubr.f32.mxu0 %v9392_v0 }
 0x1e2   : > { %v905_v43 = vpop.trf.xlu1 }
 0x1e3   : > { %4040 = vmatmul.mubr.msk.f32.gmra.mrb[24].mxu0 %vm407_vm0, %v905_v43  ;;  %4104 = vmatmul.mubr.msk.f32.gmra.mrb[24].mxu1 %vm407_vm0, %v905_v43  ;;  %v5569_v12 = vpop.trf.xlu0 }
 0x1e4   : > { %1773 = vmatprep.mubr.f32.mxu1 %v9392_v0  ;;  %1324 = vmatprep.mubr.f32.mxu0 %v9392_v0 }
 0x1e6   : > { %v906_v44 = vpop.trf.xlu1 }
 0x1e7   : > { %4041 = vmatmul.mubr.msk.f32.gmra.mrb[26].mxu0 %vm407_vm0, %v906_v44  ;;  %4105 = vmatmul.mubr.msk.f32.gmra.mrb[26].mxu1 %vm407_vm0, %v906_v44  ;;  %v5577_v14 = vpop.trf.xlu0 }
 0x1e8   : > { %1779 = vmatprep.mubr.f32.mxu1 %v9392_v0  ;;  %1330 = vmatprep.mubr.f32.mxu0 %v9392_v0 }
 0x1ea   : > { %v907_v45 = vpop.trf.xlu1 }
 0x1eb   : > { %4042 = vmatmul.mubr.msk.f32.gmra.mrb[28].mxu0 %vm407_vm0, %v907_v45  ;;  %4106 = vmatmul.mubr.msk.f32.gmra.mrb[28].mxu1 %vm407_vm0, %v907_v45  ;;  %v5585_v17 = vpop.trf.xlu0 }
 0x1ec   : > { %1785 = vmatprep.mubr.f32.mxu1 %v9392_v0  ;;  %1336 = vmatprep.mubr.f32.mxu0 %v9392_v0 }
 0x1ee   : > { %v908_v46 = vpop.trf.xlu1 }
 0x1ef   : > { %4043 = vmatmul.mubr.msk.f32.gmra.mrb[30].mxu0 %vm407_vm0, %v908_v46  ;;  %4107 = vmatmul.mubr.msk.f32.gmra.mrb[30].mxu1 %vm407_vm0, %v908_v46  ;;  %v972_v19 = vpop.trf.xlu0 }
 0x1f0   : > { %1791 = vmatprep.mubr.f32.mxu1 %v9392_v0  ;;  %1342 = vmatprep.mubr.f32.mxu0 %v9392_v0 }
 0x1f2   : > { %v909_v47 = vpop.trf.xlu1 }
 0x1f3   : > { %4044 = vmatmul.mubr.msk.f32.gmra.mrb[32].mxu0 %vm407_vm0, %v909_v47  ;;  %4108 = vmatmul.mubr.msk.f32.gmra.mrb[32].mxu1 %vm407_vm0, %v909_v47  ;;  %v973_v20 = vpop.trf.xlu0 }
 0x1f4   : > { %1797 = vmatprep.mubr.f32.mxu1 %v9392_v0  ;;  %1348 = vmatprep.mubr.f32.mxu0 %v9392_v0 }
 0x1f6   : > { %v910_v49 = vpop.trf.xlu1 }
 0x1f7   : > { %4045 = vmatmul.mubr.msk.f32.gmra.mrb[34].mxu0 %vm407_vm0, %v910_v49  ;;  %4109 = vmatmul.mubr.msk.f32.gmra.mrb[34].mxu1 %vm407_vm0, %v910_v49  ;;  %v974_v21 = vpop.trf.xlu0 }
 0x1f8   : > { %1803 = vmatprep.mubr.f32.mxu1 %v9392_v0  ;;  %1354 = vmatprep.mubr.f32.mxu0 %v9392_v0 }
 0x1fa   : > { %v911_v50 = vpop.trf.xlu1 }
 0x1fb   : > { %4046 = vmatmul.mubr.msk.f32.gmra.mrb[36].mxu0 %vm407_vm0, %v911_v50  ;;  %4110 = vmatmul.mubr.msk.f32.gmra.mrb[36].mxu1 %vm407_vm0, %v911_v50  ;;  %v975_v22 = vpop.trf.xlu0 }
 0x1fc   : > { %1809 = vmatprep.mubr.f32.mxu1 %v9392_v0  ;;  %1360 = vmatprep.mubr.f32.mxu0 %v9392_v0 }
 0x1fe   : > { %v928_v52 = vpop.trf.xlu1 }
 0x1ff   : > { %4047 = vmatmul.mubr.msk.f32.gmra.mrb[38].mxu0 %vm407_vm0, %v928_v52  ;;  %4111 = vmatmul.mubr.msk.f32.gmra.mrb[38].mxu1 %vm407_vm0, %v928_v52  ;;  %v992_v24 = vpop.trf.xlu0 }
 0x200   : > { %1815 = vmatprep.mubr.f32.mxu1 %v9392_v0  ;;  %1366 = vmatprep.mubr.f32.mxu0 %v9392_v0 }
 0x202   : > { %v929_v54 = vpop.trf.xlu1 }
 0x203   : > { %4048 = vmatmul.mubr.msk.f32.gmra.mrb[40].mxu0 %vm407_vm0, %v929_v54  ;;  %4112 = vmatmul.mubr.msk.f32.gmra.mrb[40].mxu1 %vm407_vm0, %v929_v54  ;;  %v993_v28 = vpop.trf.xlu0 }
 0x204   : > { %1821 = vmatprep.mubr.f32.mxu1 %v9392_v0  ;;  %1372 = vmatprep.mubr.f32.mxu0 %v9392_v0 }
 0x206   : > { %v930_v55 = vpop.trf.xlu1 }
 0x207   : > { %4049 = vmatmul.mubr.msk.f32.gmra.mrb[42].mxu0 %vm407_vm0, %v930_v55  ;;  %4113 = vmatmul.mubr.msk.f32.gmra.mrb[42].mxu1 %vm407_vm0, %v930_v55  ;;  %v994_v29 = vpop.trf.xlu0 }
 0x208   : > { %1827 = vmatprep.mubr.f32.mxu1 %v9392_v0  ;;  %1378 = vmatprep.mubr.f32.mxu0 %v9392_v0 }
 0x20a   : > { %v931_v57 = vpop.trf.xlu1 }
 0x20b   : > { %4050 = vmatmul.mubr.msk.f32.gmra.mrb[44].mxu0 %vm407_vm0, %v931_v57  ;;  %4114 = vmatmul.mubr.msk.f32.gmra.mrb[44].mxu1 %vm407_vm0, %v931_v57  ;;  %v995_v30 = vpop.trf.xlu0 }
 0x20c   : > { %1833 = vmatprep.mubr.f32.mxu1 %v9392_v0  ;;  %1384 = vmatprep.mubr.f32.mxu0 %v9392_v0 }
 0x20e   : > { %v932_v63 = vpop.trf.xlu1 }
 0x20f   : > { %4051 = vmatmul.mubr.msk.f32.gmra.mrb[46].mxu0 %vm407_vm0, %v932_v63  ;;  %4115 = vmatmul.mubr.msk.f32.gmra.mrb[46].mxu1 %vm407_vm0, %v932_v63  ;;  %v996_v31 = vpop.trf.xlu0 }
 0x210   : > { %1839 = vmatprep.mubr.f32.mxu1 %v9392_v0  ;;  %1390 = vmatprep.mubr.f32.mxu0 %v9392_v0 }
 0x212   : > { %v933_v1 = vpop.trf.xlu1 }
 0x213   : > { %4052 = vmatmul.mubr.msk.f32.gmra.mrb[48].mxu0 %vm407_vm0, %v933_v1  ;;  %4116 = vmatmul.mubr.msk.f32.gmra.mrb[48].mxu1 %vm407_vm0, %v933_v1  ;;  %v997_v32 = vpop.trf.xlu0 }
 0x214   : > { %1845 = vmatprep.mubr.f32.mxu1 %v9392_v0  ;;  %1396 = vmatprep.mubr.f32.mxu0 %v9392_v0 }
 0x216   : > { %v934_v3 = vpop.trf.xlu1 }
 0x217   : > { %4053 = vmatmul.mubr.msk.f32.gmra.mrb[50].mxu0 %vm407_vm0, %v934_v3  ;;  %4117 = vmatmul.mubr.msk.f32.gmra.mrb[50].mxu1 %vm407_vm0, %v934_v3  ;;  %v998_v33 = vpop.trf.xlu0 }
 0x218   : > { %1851 = vmatprep.mubr.f32.mxu1 %v9392_v0  ;;  %1402 = vmatprep.mubr.f32.mxu0 %v9392_v0 }
 0x21a   : > { %v935_v5 = vpop.trf.xlu1 }
 0x21b   : > { %4054 = vmatmul.mubr.msk.f32.gmra.mrb[52].mxu0 %vm407_vm0, %v935_v5  ;;  %4118 = vmatmul.mubr.msk.f32.gmra.mrb[52].mxu1 %vm407_vm0, %v935_v5  ;;  %v999_v34 = vpop.trf.xlu0 }
 0x21c   : > { %1857 = vmatprep.mubr.f32.mxu1 %v9392_v0  ;;  %1408 = vmatprep.mubr.f32.mxu0 %v9392_v0 }
 0x21e   : > { %v936_v6 = vpop.trf.xlu1 }
 0x21f   : > { %4055 = vmatmul.mubr.msk.f32.gmra.mrb[54].mxu0 %vm407_vm0, %v936_v6  ;;  %4119 = vmatmul.mubr.msk.f32.gmra.mrb[54].mxu1 %vm407_vm0, %v936_v6  ;;  %v1000_v35 = vpop.trf.xlu0 }
 0x220   : > { %1863 = vmatprep.mubr.f32.mxu1 %v9392_v0  ;;  %1414 = vmatprep.mubr.f32.mxu0 %v9392_v0 }
 0x222   : > { %v937_v8 = vpop.trf.xlu1 }
 0x223   : > { %4056 = vmatmul.mubr.msk.f32.gmra.mrb[56].mxu0 %vm407_vm0, %v937_v8  ;;  %4120 = vmatmul.mubr.msk.f32.gmra.mrb[56].mxu1 %vm407_vm0, %v937_v8  ;;  %v1001_v36 = vpop.trf.xlu0 }
 0x224   : > { %1869 = vmatprep.mubr.f32.mxu1 %v9392_v0  ;;  %1420 = vmatprep.mubr.f32.mxu0 %v9392_v0 }
 0x226   : > { %v938_v10 = vpop.trf.xlu1 }
 0x227   : > { %4057 = vmatmul.mubr.msk.f32.gmra.mrb[58].mxu0 %vm407_vm0, %v938_v10  ;;  %4121 = vmatmul.mubr.msk.f32.gmra.mrb[58].mxu1 %vm407_vm0, %v938_v10  ;;  %v5715_v37 = vpop.trf.xlu0 }
 0x228   : > { %1875 = vmatprep.mubr.f32.mxu1 %v9392_v0  ;;  %1426 = vmatprep.mubr.f32.mxu0 %v9392_v0 }
 0x22a   : > { %v939_v11 = vpop.trf.xlu1 }
 0x22b   : > { %4058 = vmatmul.mubr.msk.f32.gmra.mrb[60].mxu0 %vm407_vm0, %v939_v11  ;;  %4122 = vmatmul.mubr.msk.f32.gmra.mrb[60].mxu1 %vm407_vm0, %v939_v11  ;;  %v1003_v50 = vpop.trf.xlu0 }
 0x22c   : > { %1881 = vmatprep.mubr.f32.mxu1 %v9392_v0  ;;  %1432 = vmatprep.mubr.f32.mxu0 %v9392_v0 }
 0x22e   : > { %v940_v13 = vpop.trf.xlu1 }
 0x22f   : > { %4059 = vmatmul.mubr.msk.f32.gmra.mrb[62].mxu0 %vm407_vm0, %v940_v13  ;;  %4123 = vmatmul.mubr.msk.f32.gmra.mrb[62].mxu1 %vm407_vm0, %v940_v13  ;;  %v1004_v5 = vpop.trf.xlu0 }
 0x230   : > { %1887 = vmatprep.mubr.f32.mxu1 %v9392_v0  ;;  %1438 = vmatprep.mubr.f32.mxu0 %v9392_v0 }
 0x232   : > { %v941_v15 = vpop.trf.xlu1 }
 0x233   : > { %4060 = vmatmul.mubr.msk.f32.gmra.mrb[64].mxu0 %vm407_vm0, %v941_v15  ;;  %4124 = vmatmul.mubr.msk.f32.gmra.mrb[64].mxu1 %vm407_vm0, %v941_v15 }
 0x234   : > { %1893 = vmatprep.mubr.f32.mxu1 %v9392_v0  ;;  %1444 = vmatprep.mubr.f32.mxu0 %v9392_v0 }
 0x236   : > { %v942_v16 = vpop.trf.xlu1 }
 0x237   : > { %4061 = vmatmul.mubr.msk.f32.gmra.mrb[66].mxu0 %vm407_vm0, %v942_v16  ;;  %4125 = vmatmul.mubr.msk.f32.gmra.mrb[66].mxu1 %vm407_vm0, %v942_v16 }
 0x238   : > { %1899 = vmatprep.mubr.f32.mxu1 %v9392_v0  ;;  %1450 = vmatprep.mubr.f32.mxu0 %v9392_v0 }
 0x23a   : > { %v943_v18 = vpop.trf.xlu1 }
 0x23b   : > { %4062 = vmatmul.mubr.msk.f32.gmra.mrb[68].mxu0 %vm407_vm0, %v943_v18  ;;  %4126 = vmatmul.mubr.msk.f32.gmra.mrb[68].mxu1 %vm407_vm0, %v943_v18 }
 0x23c   : > { %1456 = vmatprep.mubr.f32.mxu0 %v9392_v0  ;;  %1905 = vmatprep.mubr.f32.mxu1 %v9392_v0 }
 0x23f   : > { %4063 = vmatmul.mubr.msk.f32.gmra.mrb[70].mxu0 %vm407_vm0, %v5489_v48  ;;  %4127 = vmatmul.mubr.msk.f32.gmra.mrb[70].mxu1 %vm407_vm0, %v5489_v48 }
 0x240   : > { %1462 = vmatprep.mubr.f32.mxu0 %v9392_v0  ;;  %1911 = vmatprep.mubr.f32.mxu1 %v9392_v0 }
 0x243   : > { %4064 = vmatmul.mubr.msk.f32.gmra.mrb[72].mxu0 %vm407_vm0, %v5497_v51  ;;  %4128 = vmatmul.mubr.msk.f32.gmra.mrb[72].mxu1 %vm407_vm0, %v5497_v51 }
 0x244   : > { %1468 = vmatprep.mubr.f32.mxu0 %v9392_v0  ;;  %1917 = vmatprep.mubr.f32.mxu1 %v9392_v0 }
 0x247   : > { %4065 = vmatmul.mubr.msk.f32.gmra.mrb[74].mxu0 %vm407_vm0, %v5505_v53  ;;  %4129 = vmatmul.mubr.msk.f32.gmra.mrb[74].mxu1 %vm407_vm0, %v5505_v53 }
 0x248   : > { %1474 = vmatprep.mubr.f32.mxu0 %v9392_v0  ;;  %1923 = vmatprep.mubr.f32.mxu1 %v9392_v0 }
 0x24b   : > { %4066 = vmatmul.mubr.msk.f32.gmra.mrb[76].mxu0 %vm407_vm0, %v5513_v56  ;;  %4130 = vmatmul.mubr.msk.f32.gmra.mrb[76].mxu1 %vm407_vm0, %v5513_v56 }
 0x24c   : > { %1480 = vmatprep.mubr.f32.mxu0 %v9392_v0  ;;  %1929 = vmatprep.mubr.f32.mxu1 %v9392_v0 }
 0x24f   : > { %4067 = vmatmul.mubr.msk.f32.gmra.mrb[78].mxu0 %vm407_vm0, %v5529_v62  ;;  %4131 = vmatmul.mubr.msk.f32.gmra.mrb[78].mxu1 %vm407_vm0, %v5529_v62 }
 0x250   : > { %1486 = vmatprep.mubr.f32.mxu0 %v9392_v0  ;;  %1935 = vmatprep.mubr.f32.mxu1 %v9392_v0 }
 0x253   : > { %4068 = vmatmul.mubr.msk.f32.gmra.mrb[80].mxu0 %vm407_vm0, %v5537_v2  ;;  %4132 = vmatmul.mubr.msk.f32.gmra.mrb[80].mxu1 %vm407_vm0, %v5537_v2 }
 0x254   : > { %1492 = vmatprep.mubr.f32.mxu0 %v9392_v0  ;;  %1941 = vmatprep.mubr.f32.mxu1 %v9392_v0  ;;  %v5629_v23 = vpop.permute.xlu1 %728 }
 0x255   : > { %v5633_v25 = vadd.f32 %v5519_v58, %v5629_v23  ;;  %v5637_v26 = vadd.f32 %v5521_v59, %v5629_v23  ;;  %v5641_v27 = vadd.f32 %v5525_v60, %v5629_v23 }
 0x257   : > { %10002 = vst [vmem:[#allocation17_spill] sm:$0xff] %v5633_v25  ;;  %10003 = vst [vmem:[#allocation18_spill] sm:$0xff] %v5637_v26  ;;  %4069 = vmatmul.mubr.msk.f32.gmra.mrb[82].mxu0 %vm407_vm0, %v5545_v4  ;;  %4133 = vmatmul.mubr.msk.f32.gmra.mrb[82].mxu1 %vm407_vm0, %v5545_v4 }
 0x258   : > { %10004 = vst [vmem:[#allocation19_spill] sm:$0xff] %v5641_v27  ;;  %1498 = vmatprep.mubr.f32.mxu0 %v9392_v0  ;;  %1947 = vmatprep.mubr.f32.mxu1 %v9392_v0 }
 0x25b   : > { %4070 = vmatmul.mubr.msk.f32.gmra.mrb[84].mxu0 %vm407_vm0, %v5553_v7  ;;  %4134 = vmatmul.mubr.msk.f32.gmra.mrb[84].mxu1 %vm407_vm0, %v5553_v7 }
 0x25c   : > { %1504 = vmatprep.mubr.f32.mxu0 %v9392_v0  ;;  %1953 = vmatprep.mubr.f32.mxu1 %v9392_v0 }
 0x25f   : > { %4071 = vmatmul.mubr.msk.f32.gmra.mrb[86].mxu0 %vm407_vm0, %v5561_v9  ;;  %4135 = vmatmul.mubr.msk.f32.gmra.mrb[86].mxu1 %vm407_vm0, %v5561_v9 }
 0x260   : > { %1510 = vmatprep.mubr.f32.mxu0 %v9392_v0  ;;  %1959 = vmatprep.mubr.f32.mxu1 %v9392_v0 }
 0x263   : > { %4072 = vmatmul.mubr.msk.f32.gmra.mrb[88].mxu0 %vm407_vm0, %v5569_v12  ;;  %4136 = vmatmul.mubr.msk.f32.gmra.mrb[88].mxu1 %vm407_vm0, %v5569_v12 }
 0x264   : > { %1516 = vmatprep.mubr.f32.mxu0 %v9392_v0  ;;  %1965 = vmatprep.mubr.f32.mxu1 %v9392_v0 }
 0x267   : > { %4073 = vmatmul.mubr.msk.f32.gmra.mrb[90].mxu0 %vm407_vm0, %v5577_v14  ;;  %4137 = vmatmul.mubr.msk.f32.gmra.mrb[90].mxu1 %vm407_vm0, %v5577_v14 }
 0x268   : > { %1522 = vmatprep.mubr.f32.mxu0 %v9392_v0  ;;  %1971 = vmatprep.mubr.f32.mxu1 %v9392_v0 }
 0x26b   : > { %4074 = vmatmul.mubr.msk.f32.gmra.mrb[92].mxu0 %vm407_vm0, %v5585_v17  ;;  %4138 = vmatmul.mubr.msk.f32.gmra.mrb[92].mxu1 %vm407_vm0, %v5585_v17 }
 0x26c   : > { %1528 = vmatprep.mubr.f32.mxu0 %v9392_v0  ;;  %1977 = vmatprep.mubr.f32.mxu1 %v9392_v0 }
 0x26f   : > { %4075 = vmatmul.mubr.msk.f32.gmra.mrb[94].mxu0 %vm407_vm0, %v972_v19  ;;  %4139 = vmatmul.mubr.msk.f32.gmra.mrb[94].mxu1 %vm407_vm0, %v972_v19 }
 0x270   : > { %1534 = vmatprep.mubr.f32.mxu0 %v9392_v0  ;;  %1983 = vmatprep.mubr.f32.mxu1 %v9392_v0 }
 0x273   : > { %4076 = vmatmul.mubr.msk.f32.gmra.mrb[96].mxu0 %vm407_vm0, %v973_v20  ;;  %4140 = vmatmul.mubr.msk.f32.gmra.mrb[96].mxu1 %vm407_vm0, %v973_v20 }
 0x274   : > { %1540 = vmatprep.mubr.f32.mxu0 %v9392_v0  ;;  %1989 = vmatprep.mubr.f32.mxu1 %v9392_v0 }
 0x277   : > { %4077 = vmatmul.mubr.msk.f32.gmra.mrb[98].mxu0 %vm407_vm0, %v974_v21  ;;  %4141 = vmatmul.mubr.msk.f32.gmra.mrb[98].mxu1 %vm407_vm0, %v974_v21 }
 0x278   : > { %1546 = vmatprep.mubr.f32.mxu0 %v9392_v0  ;;  %1995 = vmatprep.mubr.f32.mxu1 %v9392_v0 }
 0x27b   : > { %4078 = vmatmul.mubr.msk.f32.gmra.mrb[100].mxu0 %vm407_vm0, %v975_v22  ;;  %4142 = vmatmul.mubr.msk.f32.gmra.mrb[100].mxu1 %vm407_vm0, %v975_v22  ;;  %v1005_v22 = vpop.trf.xlu0 }
 0x27c   : > { %1552 = vmatprep.mubr.f32.mxu0 %v9392_v0  ;;  %2001 = vmatprep.mubr.f32.mxu1 %v9392_v0 }
 0x27f   : > { %4079 = vmatmul.mubr.msk.f32.gmra.mrb[102].mxu0 %vm407_vm0, %v992_v24  ;;  %4143 = vmatmul.mubr.msk.f32.gmra.mrb[102].mxu1 %vm407_vm0, %v992_v24 }
 0x280   : > { %1558 = vmatprep.mubr.f32.mxu0 %v9392_v0  ;;  %2007 = vmatprep.mubr.f32.mxu1 %v9392_v0 }
 0x283   : > { %4080 = vmatmul.mubr.msk.f32.gmra.mrb[104].mxu0 %vm407_vm0, %v993_v28  ;;  %4144 = vmatmul.mubr.msk.f32.gmra.mrb[104].mxu1 %vm407_vm0, %v993_v28 }
 0x284   : > { %1564 = vmatprep.mubr.f32.mxu0 %v9392_v0  ;;  %2013 = vmatprep.mubr.f32.mxu1 %v9392_v0 }
 0x287   : > { %4081 = vmatmul.mubr.msk.f32.gmra.mrb[106].mxu0 %vm407_vm0, %v994_v29  ;;  %4145 = vmatmul.mubr.msk.f32.gmra.mrb[106].mxu1 %vm407_vm0, %v994_v29 }
 0x288   : > { %1570 = vmatprep.mubr.f32.mxu0 %v9392_v0  ;;  %2019 = vmatprep.mubr.f32.mxu1 %v9392_v0 }
 0x28b   : > { %4082 = vmatmul.mubr.msk.f32.gmra.mrb[108].mxu0 %vm407_vm0, %v995_v30  ;;  %4146 = vmatmul.mubr.msk.f32.gmra.mrb[108].mxu1 %vm407_vm0, %v995_v30 }
 0x28c   : > { %2025 = vmatprep.mubr.f32.mxu1 %v9392_v0  ;;  %1576 = vmatprep.mubr.f32.mxu0 %v9392_v0 }
 0x28f   : > { %4083 = vmatmul.mubr.msk.f32.gmra.mrb[110].mxu0 %vm407_vm0, %v996_v31  ;;  %4147 = vmatmul.mubr.msk.f32.gmra.mrb[110].mxu1 %vm407_vm0, %v996_v31 }
 0x290   : > { %1582 = vmatprep.mubr.f32.mxu0 %v9392_v0  ;;  %2031 = vmatprep.mubr.f32.mxu1 %v9392_v0 }
 0x292   : > { %v5717_v38 = vpop.f32.mrb[6].mxu0  ;;  %v5719_v39 = vpop.f32.mrb[6].mxu1 }
 0x293   : > { %v5721_v40 = vpop.f32.mrb[7].mxu0  ;;  %4084 = vmatmul.mubr.msk.f32.gmra.mrb[112].mxu0 %vm407_vm0, %v997_v32  ;;  %v5724_v41 = vpop.f32.mrb[7].mxu1  ;;  %4148 = vmatmul.mubr.msk.f32.gmra.mrb[112].mxu1 %vm407_vm0, %v997_v32 }
 0x294   : > { %1588 = vmatprep.mubr.f32.mxu0 %v9392_v0  ;;  %2037 = vmatprep.mubr.f32.mxu1 %v9392_v0 }
 0x296   : > { %v5729_v42 = vpop.f32.mrb[8].mxu0  ;;  %v5731_v43 = vpop.f32.mrb[8].mxu1 }
 0x297   : > { %v2099_v44 = vmax.f32 %v5717_v38, %v5729_v42  ;;  %v2237_v45 = vmax.f32 %v5719_v39, %v5731_v43  ;;  %v5737_v46 = vpop.f32.mrb[9].mxu0  ;;  %4085 = vmatmul.mubr.msk.f32.gmra.mrb[114].mxu0 %vm407_vm0, %v998_v33  ;;  %v5740_v47 = vpop.f32.mrb[9].mxu1  ;;  %4149 = vmatmul.mubr.msk.f32.gmra.mrb[114].mxu1 %vm407_vm0, %v998_v33 }
 0x298   : > { %v2168_v48 = vmax.f32 %v5721_v40, %v5737_v46  ;;  %v2306_v49 = vmax.f32 %v5724_v41, %v5740_v47  ;;  %1594 = vmatprep.mubr.f32.mxu0 %v9392_v0  ;;  %2043 = vmatprep.mubr.f32.mxu1 %v9392_v0 }
 0x29a   : > { %v5749_v51 = vpop.f32.mrb[10].mxu0  ;;  %v5751_v52 = vpop.f32.mrb[10].mxu1 }
 0x29b   : > { %v2100_v53 = vmax.f32 %v2099_v44, %v5749_v51  ;;  %v2238_v54 = vmax.f32 %v2237_v45, %v5751_v52  ;;  %v5755_v55 = vpop.f32.mrb[11].mxu0  ;;  %4086 = vmatmul.mubr.msk.f32.gmra.mrb[116].mxu0 %vm407_vm0, %v999_v34  ;;  %v5758_v56 = vpop.f32.mrb[11].mxu1  ;;  %4150 = vmatmul.mubr.msk.f32.gmra.mrb[116].mxu1 %vm407_vm0, %v999_v34 }
 0x29c   : > { %v2169_v57 = vmax.f32 %v2168_v48, %v5755_v55  ;;  %v2307_v58 = vmax.f32 %v2306_v49, %v5758_v56  ;;  %1600 = vmatprep.mubr.f32.mxu0 %v9392_v0  ;;  %2049 = vmatprep.mubr.f32.mxu1 %v9392_v0 }
 0x29e   : > { %v5765_v59 = vpop.f32.mrb[12].mxu0  ;;  %v5767_v60 = vpop.f32.mrb[12].mxu1 }
 0x29f   : > { %v2101_v62 = vmax.f32 %v2100_v53, %v5765_v59  ;;  %v2239_v63 = vmax.f32 %v2238_v54, %v5767_v60  ;;  %v5771_v1 = vpop.f32.mrb[13].mxu0  ;;  %4087 = vmatmul.mubr.msk.f32.gmra.mrb[118].mxu0 %vm407_vm0, %v1000_v35  ;;  %v5774_v2 = vpop.f32.mrb[13].mxu1  ;;  %4151 = vmatmul.mubr.msk.f32.gmra.mrb[118].mxu1 %vm407_vm0, %v1000_v35 }
 0x2a0   : > { %v2170_v3 = vmax.f32 %v2169_v57, %v5771_v1  ;;  %v2308_v4 = vmax.f32 %v2307_v58, %v5774_v2  ;;  %1606 = vmatprep.mubr.f32.mxu0 %v9392_v0  ;;  %2055 = vmatprep.mubr.f32.mxu1 %v9392_v0  ;;  %v1006_v53 = vpop.trf.xlu0 }
 0x2a2   : > { %v5781_v6 = vpop.f32.mrb[14].mxu0  ;;  %v5783_v7 = vpop.f32.mrb[14].mxu1 }
 0x2a3   : > { %v2102_v8 = vmax.f32 %v2101_v62, %v5781_v6  ;;  %v2240_v9 = vmax.f32 %v2239_v63, %v5783_v7  ;;  %v5787_v10 = vpop.f32.mrb[15].mxu0  ;;  %4088 = vmatmul.mubr.msk.f32.gmra.mrb[120].mxu0 %vm407_vm0, %v1001_v36  ;;  %v5790_v11 = vpop.f32.mrb[15].mxu1  ;;  %4152 = vmatmul.mubr.msk.f32.gmra.mrb[120].mxu1 %vm407_vm0, %v1001_v36 }
 0x2a4   : > { %v2171_v12 = vmax.f32 %v2170_v3, %v5787_v10  ;;  %v2309_v13 = vmax.f32 %v2308_v4, %v5790_v11  ;;  %1612 = vmatprep.mubr.f32.mxu0 %v9392_v0  ;;  %2061 = vmatprep.mubr.f32.mxu1 %v9392_v0 }
 0x2a6   : > { %v5797_v14 = vpop.f32.mrb[16].mxu0  ;;  %v5799_v15 = vpop.f32.mrb[16].mxu1 }
 0x2a7   : > { %v2103_v16 = vmax.f32 %v2102_v8, %v5797_v14  ;;  %v2241_v17 = vmax.f32 %v2240_v9, %v5799_v15  ;;  %v5803_v18 = vpop.f32.mrb[17].mxu0  ;;  %4089 = vmatmul.mubr.msk.f32.gmra.mrb[122].mxu0 %vm407_vm0, %v5715_v37  ;;  %v5807_v19 = vpop.f32.mrb[17].mxu1  ;;  %4153 = vmatmul.mubr.msk.f32.gmra.mrb[122].mxu1 %vm407_vm0, %v5715_v37 }
 0x2a8   : > { %v2172_v20 = vmax.f32 %v2171_v12, %v5803_v18  ;;  %v2310_v21 = vmax.f32 %v2309_v13, %v5807_v19  ;;  %1618 = vmatprep.mubr.f32.mxu0 %v9392_v0  ;;  %2067 = vmatprep.mubr.f32.mxu1 %v9392_v0 }
 0x2aa   : > { %v5815_v24 = vpop.f32.mrb[18].mxu0  ;;  %v5817_v28 = vpop.f32.mrb[18].mxu1 }
 0x2ab   : > { %v2104_v29 = vmax.f32 %v2103_v16, %v5815_v24  ;;  %v2242_v30 = vmax.f32 %v2241_v17, %v5817_v28  ;;  %v5821_v31 = vpop.f32.mrb[19].mxu0  ;;  %4090 = vmatmul.mubr.msk.f32.gmra.mrb[124].mxu0 %vm407_vm0, %v1003_v50  ;;  %v5824_v32 = vpop.f32.mrb[19].mxu1  ;;  %4154 = vmatmul.mubr.msk.f32.gmra.mrb[124].mxu1 %vm407_vm0, %v1003_v50 }
 0x2ac   : > { %v2173_v33 = vmax.f32 %v2172_v20, %v5821_v31  ;;  %v2311_v34 = vmax.f32 %v2310_v21, %v5824_v32  ;;  %1624 = vmatprep.mubr.f32.mxu0 %v9392_v0  ;;  %2073 = vmatprep.mubr.f32.mxu1 %v9392_v0 }
 0x2ae   : > { %v5831_v35 = vpop.f32.mrb[20].mxu0  ;;  %v5833_v36 = vpop.f32.mrb[20].mxu1 }
 0x2af   : > { %v2105_v37 = vmax.f32 %v2104_v29, %v5831_v35  ;;  %v2243_v44 = vmax.f32 %v2242_v30, %v5833_v36  ;;  %v5837_v45 = vpop.f32.mrb[21].mxu0  ;;  %4091 = vmatmul.mubr.msk.f32.gmra.mrb[126].mxu0 %vm407_vm0, %v1004_v5  ;;  %v5840_v48 = vpop.f32.mrb[21].mxu1  ;;  %4155 = vmatmul.mubr.msk.f32.gmra.mrb[126].mxu1 %vm407_vm0, %v1004_v5  ;;  %v803_v29 = vadd.f32 %v5527_v61, %v5629_v23 }
 0x2b0   : > { %v2174_v49 = vmax.f32 %v2173_v33, %v5837_v45  ;;  %v2312_v50 = vmax.f32 %v2311_v34, %v5840_v48  ;;  %1630 = vmatprep.mubr.f32.mxu0 %v9392_v0  ;;  %2079 = vmatprep.mubr.f32.mxu1 %v9392_v0 }
 0x2b2   : > { %v5847_v54 = vpop.f32.mrb[22].mxu0  ;;  %v5849_v57 = vpop.f32.mrb[22].mxu1 }
 0x2b3   : > { %v2106_v58 = vmax.f32 %v2105_v37, %v5847_v54  ;;  %v2244_v62 = vmax.f32 %v2243_v44, %v5849_v57  ;;  %v5853_v63 = vpop.f32.mrb[23].mxu0  ;;  %4092 = vmatmul.mubr.msk.f32.gmra.mrb[128].mxu0 %vm407_vm0, %v1005_v22  ;;  %v5856_v3 = vpop.f32.mrb[23].mxu1  ;;  %4156 = vmatmul.mubr.msk.f32.gmra.mrb[128].mxu1 %vm407_vm0, %v1005_v22 }
 0x2b4   : > { %10005 = vst [vmem:[#allocation20_spill] sm:$0xff] %v5856_v3  ;;  %v2175_v4 = vmax.f32 %v2174_v49, %v5853_v63  ;;  %v2313_v5 = vmax.f32 %v2312_v50, %v5856_v3  ;;  %1636 = vmatprep.mubr.f32.mxu0 %v9392_v0  ;;  %2085 = vmatprep.mubr.f32.mxu1 %v9392_v0  ;;  %v1007_v22 = vpop.trf.xlu0 }
 0x2b6   : > { %v5863_v8 = vpop.f32.mrb[24].mxu0  ;;  %v5865_v9 = vpop.f32.mrb[24].mxu1 }
 0x2b7   : > { %10006 = vst [vmem:[#allocation21_spill] sm:$0xff] %v5863_v8  ;;  %10007 = vst [vmem:[#allocation22_spill] sm:$0xff] %v5865_v9  ;;  %v2107_v12 = vmax.f32 %v2106_v58, %v5863_v8  ;;  %v2245_v13 = vmax.f32 %v2244_v62, %v5865_v9  ;;  %v5869_v16 = vpop.f32.mrb[25].mxu0  ;;  %4093 = vmatmul.mubr.msk.f32.gmra.mrb[130].mxu0 %vm407_vm0, %v1006_v53  ;;  %v5872_v17 = vpop.f32.mrb[25].mxu1  ;;  %4157 = vmatmul.mubr.msk.f32.gmra.mrb[130].mxu1 %vm407_vm0, %v1006_v53 }
 0x2b8   : > { %10008 = vst [vmem:[#allocation23_spill] sm:$0xff] %v5869_v16  ;;  %10009 = vst [vmem:[#allocation24_spill] sm:$0xff] %v5872_v17  ;;  %v2176_v20 = vmax.f32 %v2175_v4, %v5869_v16  ;;  %v2314_v21 = vmax.f32 %v2313_v5, %v5872_v17  ;;  %1642 = vmatprep.mubr.f32.mxu0 %v9392_v0  ;;  %2091 = vmatprep.mubr.f32.mxu1 %v9392_v0 }
 0x2ba   : > { %v5881_v30 = vpop.f32.mrb[26].mxu0  ;;  %v5883_v33 = vpop.f32.mrb[26].mxu1 }
 0x2bb   : > { %10010 = vst [vmem:[#allocation25_spill] sm:$0xff] %v5881_v30  ;;  %10011 = vst [vmem:[#allocation26_spill] sm:$0xff] %v5883_v33  ;;  %v2108_v34 = vmax.f32 %v2107_v12, %v5881_v30  ;;  %v2246_v37 = vmax.f32 %v2245_v13, %v5883_v33  ;;  %v5887_v44 = vpop.f32.mrb[27].mxu0  ;;  %4094 = vmatmul.mubr.msk.f32.gmra.mrb[132].mxu0 %vm407_vm0, %v1007_v22  ;;  %v5890_v49 = vpop.f32.mrb[27].mxu1  ;;  %4158 = vmatmul.mubr.msk.f32.gmra.mrb[132].mxu1 %vm407_vm0, %v1007_v22 }
 0x2bc   : > { %10012 = vst [vmem:[#allocation27_spill] sm:$0xff] %v5887_v44  ;;  %10013 = vst [vmem:[#allocation28_spill] sm:$0xff] %v5890_v49  ;;  %v2177_v50 = vmax.f32 %v2176_v20, %v5887_v44  ;;  %v2315_v61 = vmax.f32 %v2314_v21, %v5890_v49  ;;  %3603 = vmatprep.mubr.f32.mxu0 %v803_v29  ;;  %3745 = vmatprep.mubr.f32.mxu1 %v803_v29  ;;  %v5175_v49 = vmov 1966171168  }
 0x2bd   : > { %v2382_v33 = vunpack.c.l.s4 %v5175_v49 }
 0x2be   : > { %v5895_v23 = vpop.f32.mrb[28].mxu0  ;;  %v5897_v53 = vpop.f32.mrb[28].mxu1 }
 0x2bf   : > { %10014 = vst [vmem:[#allocation29_spill] sm:$0xff] %v5895_v23  ;;  %10015 = vst [vmem:[#allocation30_spill] sm:$0xff] %v5897_v53  ;;  %v2109_v58 = vmax.f32 %v2108_v34, %v5895_v23  ;;  %v2247_v62 = vmax.f32 %v2246_v37, %v5897_v53  ;;  %v5901_v4 = vpop.f32.mrb[29].mxu0  ;;  %v5903_v5 = vpop.f32.mrb[29].mxu1 }
 0x2c0   : > { %10016 = vst [vmem:[#allocation31_spill] sm:$0xff] %v5901_v4  ;;  %10017 = vst [vmem:[#allocation32_spill] sm:$0xff] %v5903_v5  ;;  %v2178_v12 = vmax.f32 %v2177_v50, %v5901_v4  ;;  %v2316_v13 = vmax.f32 %v2315_v61, %v5903_v5 }
 0x2c2   : > { %v5907_v20 = vpop.f32.mrb[30].mxu0  ;;  %v5909_v21 = vpop.f32.mrb[30].mxu1 }
 0x2c3   : > { %10018 = vst [vmem:[#allocation33_spill] sm:$0xff] %v5907_v20  ;;  %10019 = vst [vmem:[#allocation34_spill] sm:$0xff] %v5909_v21  ;;  %v2110_v22 = vmax.f32 %v2109_v58, %v5907_v20  ;;  %v2248_v29 = vmax.f32 %v2247_v62, %v5909_v21  ;;  %v5913_v0 = vpop.f32.mrb[31].mxu0  ;;  %v5915_v34 = vpop.f32.mrb[31].mxu1 }
 0x2c4   : > { %10020 = vst [vmem:[#allocation35_spill] sm:$0xff] %v5913_v0  ;;  %10021 = vst [vmem:[#allocation36_spill] sm:$0xff] %v5915_v34  ;;  %v2179_v37 = vmax.f32 %v2178_v12, %v5913_v0  ;;  %v2317_v26 = vmax.f32 %v2316_v13, %v5915_v34 }
 0x2c6   : > { %v5919_v27 = vpop.f32.mrb[32].mxu0  ;;  %v5921_v50 = vpop.f32.mrb[32].mxu1 }
 0x2c7   : > { %10022 = vst [vmem:[#allocation37_spill] sm:$0xff] %v5919_v27  ;;  %10023 = vst [vmem:[#allocation38_spill] sm:$0xff] %v5921_v50  ;;  %v2111_v61 = vmax.f32 %v2110_v22, %v5919_v27  ;;  %v2249_v25 = vmax.f32 %v2248_v29, %v5921_v50  ;;  %v5925_v5 = vpop.f32.mrb[33].mxu0  ;;  %v5927_v58 = vpop.f32.mrb[33].mxu1 }
 0x2c8   : > { %10024 = vst [vmem:[#allocation39_spill] sm:$0xff] %v5925_v5  ;;  %10025 = vst [vmem:[#allocation40_spill] sm:$0xff] %v5927_v58  ;;  %v2180_v62 = vmax.f32 %v2179_v37, %v5925_v5  ;;  %v2318_v21 = vmax.f32 %v2317_v26, %v5927_v58 }
 0x2ca   : > { %v5931_v20 = vpop.f32.mrb[34].mxu0  ;;  %v5933_v12 = vpop.f32.mrb[34].mxu1 }
 0x2cb   : > { %10026 = vst [vmem:[#allocation41_spill] sm:$0xff] %v5931_v20  ;;  %10027 = vst [vmem:[#allocation42_spill] sm:$0xff] %v5933_v12  ;;  %v2112_v13 = vmax.f32 %v2111_v61, %v5931_v20  ;;  %v2250_v34 = vmax.f32 %v2249_v25, %v5933_v12  ;;  %v5937_v0 = vpop.f32.mrb[35].mxu0  ;;  %v5939_v22 = vpop.f32.mrb[35].mxu1 }
 0x2cc   : > { %10028 = vst [vmem:[#allocation43_spill] sm:$0xff] %v5937_v0  ;;  %10029 = vst [vmem:[#allocation44_spill] sm:$0xff] %v5939_v22  ;;  %v2181_v29 = vmax.f32 %v2180_v62, %v5937_v0  ;;  %v2319_v50 = vmax.f32 %v2318_v21, %v5939_v22 }
 0x2ce   : > { %v5943_v27 = vpop.f32.mrb[36].mxu0  ;;  %v5945_v37 = vpop.f32.mrb[36].mxu1 }
 0x2cf   : > { %10030 = vst [vmem:[#allocation45_spill] sm:$0xff] %v5943_v27  ;;  %10031 = vst [vmem:[#allocation46_spill] sm:$0xff] %v5945_v37  ;;  %v2113_v26 = vmax.f32 %v2112_v13, %v5943_v27  ;;  %v2251_v58 = vmax.f32 %v2250_v34, %v5945_v37  ;;  %v5949_v5 = vpop.f32.mrb[37].mxu0  ;;  %v5951_v61 = vpop.f32.mrb[37].mxu1 }
 0x2d0   : > { %10032 = vst [vmem:[#allocation47_spill] sm:$0xff] %v5949_v5  ;;  %10033 = vst [vmem:[#allocation48_spill] sm:$0xff] %v5951_v61  ;;  %v2182_v25 = vmax.f32 %v2181_v29, %v5949_v5  ;;  %v2320_v12 = vmax.f32 %v2319_v50, %v5951_v61 }
 0x2d2   : > { %v5955_v20 = vpop.f32.mrb[38].mxu0  ;;  %v5957_v62 = vpop.f32.mrb[38].mxu1 }
 0x2d3   : > { %10034 = vst [vmem:[#allocation49_spill] sm:$0xff] %v5955_v20  ;;  %10035 = vst [vmem:[#allocation50_spill] sm:$0xff] %v5957_v62  ;;  %v2114_v21 = vmax.f32 %v2113_v26, %v5955_v20  ;;  %v2252_v22 = vmax.f32 %v2251_v58, %v5957_v62  ;;  %v5961_v0 = vpop.f32.mrb[39].mxu0  ;;  %v5963_v13 = vpop.f32.mrb[39].mxu1 }
 0x2d4   : > { %10036 = vst [vmem:[#allocation51_spill] sm:$0xff] %v5961_v0  ;;  %10037 = vst [vmem:[#allocation52_spill] sm:$0xff] %v5963_v13  ;;  %v2183_v34 = vmax.f32 %v2182_v25, %v5961_v0  ;;  %v2321_v37 = vmax.f32 %v2320_v12, %v5963_v13 }
 0x2d6   : > { %v5967_v27 = vpop.f32.mrb[40].mxu0  ;;  %v5969_v29 = vpop.f32.mrb[40].mxu1 }
 0x2d7   : > { %10038 = vst [vmem:[#allocation53_spill] sm:$0xff] %v5967_v27  ;;  %10039 = vst [vmem:[#allocation54_spill] sm:$0xff] %v5969_v29  ;;  %v2115_v50 = vmax.f32 %v2114_v21, %v5967_v27  ;;  %v2253_v61 = vmax.f32 %v2252_v22, %v5969_v29  ;;  %v5973_v5 = vpop.f32.mrb[41].mxu0  ;;  %v5975_v26 = vpop.f32.mrb[41].mxu1 }
 0x2d8   : > { %10040 = vst [vmem:[#allocation55_spill] sm:$0xff] %v5973_v5  ;;  %10041 = vst [vmem:[#allocation56_spill] sm:$0xff] %v5975_v26  ;;  %v2184_v58 = vmax.f32 %v2183_v34, %v5973_v5  ;;  %v2322_v62 = vmax.f32 %v2321_v37, %v5975_v26 }
 0x2da   : > { %v5979_v20 = vpop.f32.mrb[42].mxu0  ;;  %v5981_v25 = vpop.f32.mrb[42].mxu1 }
 0x2db   : > { %10042 = vst [vmem:[#allocation57_spill] sm:$0xff] %v5979_v20  ;;  %10043 = vst [vmem:[#allocation58_spill] sm:$0xff] %v5981_v25  ;;  %v2116_v12 = vmax.f32 %v2115_v50, %v5979_v20  ;;  %v2254_v13 = vmax.f32 %v2253_v61, %v5981_v25  ;;  %v5985_v0 = vpop.f32.mrb[43].mxu0  ;;  %v5987_v21 = vpop.f32.mrb[43].mxu1 }
 0x2dc   : > { %10044 = vst [vmem:[#allocation59_spill] sm:$0xff] %v5985_v0  ;;  %10045 = vst [vmem:[#allocation60_spill] sm:$0xff] %v5987_v21  ;;  %v2185_v22 = vmax.f32 %v2184_v58, %v5985_v0  ;;  %v2323_v29 = vmax.f32 %v2322_v62, %v5987_v21 }
 0x2de   : > { %v5991_v27 = vpop.f32.mrb[44].mxu0  ;;  %v5993_v34 = vpop.f32.mrb[44].mxu1 }
 0x2df   : > { %10046 = vst [vmem:[#allocation61_spill] sm:$0xff] %v5991_v27  ;;  %10047 = vst [vmem:[#allocation62_spill] sm:$0xff] %v5993_v34  ;;  %v2117_v37 = vmax.f32 %v2116_v12, %v5991_v27  ;;  %v2255_v26 = vmax.f32 %v2254_v13, %v5993_v34  ;;  %v5997_v5 = vpop.f32.mrb[45].mxu0  ;;  %v5999_v50 = vpop.f32.mrb[45].mxu1 }
 0x2e0   : > { %10048 = vst [vmem:[#allocation63_spill] sm:$0xff] %v5997_v5  ;;  %10049 = vst [vmem:[#allocation64_spill] sm:$0xff] %v5999_v50  ;;  %v2186_v61 = vmax.f32 %v2185_v22, %v5997_v5  ;;  %v2324_v25 = vmax.f32 %v2323_v29, %v5999_v50 }
 0x2e2   : > { %v6003_v20 = vpop.f32.mrb[46].mxu0  ;;  %v6005_v58 = vpop.f32.mrb[46].mxu1 }
 0x2e3   : > { %10050 = vst [vmem:[#allocation65_spill] sm:$0xff] %v6003_v20  ;;  %10051 = vst [vmem:[#allocation66_spill] sm:$0xff] %v6005_v58  ;;  %v2118_v62 = vmax.f32 %v2117_v37, %v6003_v20  ;;  %v2256_v21 = vmax.f32 %v2255_v26, %v6005_v58  ;;  %v6009_v0 = vpop.f32.mrb[47].mxu0  ;;  %v6011_v12 = vpop.f32.mrb[47].mxu1 }
 0x2e4   : > { %10052 = vst [vmem:[#allocation67_spill] sm:$0xff] %v6009_v0  ;;  %10053 = vst [vmem:[#allocation68_spill] sm:$0xff] %v6011_v12  ;;  %v2187_v13 = vmax.f32 %v2186_v61, %v6009_v0  ;;  %v2325_v34 = vmax.f32 %v2324_v25, %v6011_v12 }
 0x2e6   : > { %v6015_v27 = vpop.f32.mrb[48].mxu0  ;;  %v6017_v22 = vpop.f32.mrb[48].mxu1 }
 0x2e7   : > { %10054 = vst [vmem:[#allocation69_spill] sm:$0xff] %v6015_v27  ;;  %10055 = vst [vmem:[#allocation70_spill] sm:$0xff] %v6017_v22  ;;  %v2119_v29 = vmax.f32 %v2118_v62, %v6015_v27  ;;  %v2257_v50 = vmax.f32 %v2256_v21, %v6017_v22  ;;  %v6021_v5 = vpop.f32.mrb[49].mxu0  ;;  %v6023_v37 = vpop.f32.mrb[49].mxu1 }
 0x2e8   : > { %10056 = vst [vmem:[#allocation71_spill] sm:$0xff] %v6021_v5  ;;  %10057 = vst [vmem:[#allocation72_spill] sm:$0xff] %v6023_v37  ;;  %v2188_v26 = vmax.f32 %v2187_v13, %v6021_v5  ;;  %v2326_v58 = vmax.f32 %v2325_v34, %v6023_v37 }
 0x2ea   : > { %v6027_v20 = vpop.f32.mrb[50].mxu0  ;;  %v6029_v61 = vpop.f32.mrb[50].mxu1 }
 0x2eb   : > { %10058 = vst [vmem:[#allocation73_spill] sm:$0xff] %v6027_v20  ;;  %10059 = vst [vmem:[#allocation74_spill] sm:$0xff] %v6029_v61  ;;  %v2120_v25 = vmax.f32 %v2119_v29, %v6027_v20  ;;  %v2258_v12 = vmax.f32 %v2257_v50, %v6029_v61  ;;  %v6033_v0 = vpop.f32.mrb[51].mxu0  ;;  %v6035_v62 = vpop.f32.mrb[51].mxu1 }
 0x2ec   : > { %10060 = vst [vmem:[#allocation75_spill] sm:$0xff] %v6033_v0  ;;  %10061 = vst [vmem:[#allocation76_spill] sm:$0xff] %v6035_v62  ;;  %v2189_v21 = vmax.f32 %v2188_v26, %v6033_v0  ;;  %v2327_v22 = vmax.f32 %v2326_v58, %v6035_v62 }
 0x2ee   : > { %v6039_v27 = vpop.f32.mrb[52].mxu0  ;;  %v6041_v13 = vpop.f32.mrb[52].mxu1 }
 0x2ef   : > { %10062 = vst [vmem:[#allocation77_spill] sm:$0xff] %v6039_v27  ;;  %10063 = vst [vmem:[#allocation78_spill] sm:$0xff] %v6041_v13  ;;  %v2121_v34 = vmax.f32 %v2120_v25, %v6039_v27  ;;  %v2259_v37 = vmax.f32 %v2258_v12, %v6041_v13  ;;  %v6045_v5 = vpop.f32.mrb[53].mxu0  ;;  %v6047_v29 = vpop.f32.mrb[53].mxu1 }
 0x2f0   : > { %10064 = vst [vmem:[#allocation79_spill] sm:$0xff] %v6045_v5  ;;  %10065 = vst [vmem:[#allocation80_spill] sm:$0xff] %v6047_v29  ;;  %v2190_v50 = vmax.f32 %v2189_v21, %v6045_v5  ;;  %v2328_v61 = vmax.f32 %v2327_v22, %v6047_v29 }
 0x2f2   : > { %v6051_v20 = vpop.f32.mrb[54].mxu0  ;;  %v6053_v26 = vpop.f32.mrb[54].mxu1 }
 0x2f3   : > { %10066 = vst [vmem:[#allocation81_spill] sm:$0xff] %v6051_v20  ;;  %10067 = vst [vmem:[#allocation82_spill] sm:$0xff] %v6053_v26  ;;  %v2122_v58 = vmax.f32 %v2121_v34, %v6051_v20  ;;  %v2260_v62 = vmax.f32 %v2259_v37, %v6053_v26  ;;  %v6057_v0 = vpop.f32.mrb[55].mxu0  ;;  %v6059_v25 = vpop.f32.mrb[55].mxu1 }
 0x2f4   : > { %10068 = vst [vmem:[#allocation83_spill] sm:$0xff] %v6057_v0  ;;  %10069 = vst [vmem:[#allocation84_spill] sm:$0xff] %v6059_v25  ;;  %v2191_v12 = vmax.f32 %v2190_v50, %v6057_v0  ;;  %v2329_v13 = vmax.f32 %v2328_v61, %v6059_v25 }
 0x2f6   : > { %v6063_v27 = vpop.f32.mrb[56].mxu0  ;;  %v6065_v21 = vpop.f32.mrb[56].mxu1 }
 0x2f7   : > { %10070 = vst [vmem:[#allocation85_spill] sm:$0xff] %v6063_v27  ;;  %10071 = vst [vmem:[#allocation86_spill] sm:$0xff] %v6065_v21  ;;  %v2123_v22 = vmax.f32 %v2122_v58, %v6063_v27  ;;  %v2261_v29 = vmax.f32 %v2260_v62, %v6065_v21  ;;  %v6069_v5 = vpop.f32.mrb[57].mxu0  ;;  %v6071_v34 = vpop.f32.mrb[57].mxu1 }
 0x2f8   : > { %10072 = vst [vmem:[#allocation87_spill] sm:$0xff] %v6069_v5  ;;  %10073 = vst [vmem:[#allocation88_spill] sm:$0xff] %v6071_v34  ;;  %v2192_v37 = vmax.f32 %v2191_v12, %v6069_v5  ;;  %v2330_v26 = vmax.f32 %v2329_v13, %v6071_v34 }
 0x2fa   : > { %v6075_v20 = vpop.f32.mrb[58].mxu0  ;;  %v6077_v50 = vpop.f32.mrb[58].mxu1 }
 0x2fb   : > { %10074 = vst [vmem:[#allocation89_spill] sm:$0xff] %v6075_v20  ;;  %10075 = vst [vmem:[#allocation90_spill] sm:$0xff] %v6077_v50  ;;  %v2124_v61 = vmax.f32 %v2123_v22, %v6075_v20  ;;  %v2262_v25 = vmax.f32 %v2261_v29, %v6077_v50  ;;  %v6081_v0 = vpop.f32.mrb[59].mxu0  ;;  %v6083_v58 = vpop.f32.mrb[59].mxu1 }
 0x2fc   : > { %10076 = vst [vmem:[#allocation91_spill] sm:$0xff] %v6081_v0  ;;  %10077 = vst [vmem:[#allocation92_spill] sm:$0xff] %v6083_v58  ;;  %v2193_v62 = vmax.f32 %v2192_v37, %v6081_v0  ;;  %v2331_v21 = vmax.f32 %v2330_v26, %v6083_v58 }
 0x2fe   : > { %v6087_v27 = vpop.f32.mrb[60].mxu0  ;;  %v6089_v12 = vpop.f32.mrb[60].mxu1 }
 0x2ff   : > { %10078 = vst [vmem:[#allocation93_spill] sm:$0xff] %v6087_v27  ;;  %10079 = vst [vmem:[#allocation94_spill] sm:$0xff] %v6089_v12  ;;  %v2125_v13 = vmax.f32 %v2124_v61, %v6087_v27  ;;  %v2263_v34 = vmax.f32 %v2262_v25, %v6089_v12  ;;  %v6093_v5 = vpop.f32.mrb[61].mxu0  ;;  %v6095_v22 = vpop.f32.mrb[61].mxu1 }
 0x300   : > { %10080 = vst [vmem:[#allocation95_spill] sm:$0xff] %v6093_v5  ;;  %10081 = vst [vmem:[#allocation96_spill] sm:$0xff] %v6095_v22  ;;  %v2194_v29 = vmax.f32 %v2193_v62, %v6093_v5  ;;  %v2332_v50 = vmax.f32 %v2331_v21, %v6095_v22 }
 0x302   : > { %v6099_v20 = vpop.f32.mrb[62].mxu0  ;;  %v6101_v37 = vpop.f32.mrb[62].mxu1 }
 0x303   : > { %10082 = vst [vmem:[#allocation97_spill] sm:$0xff] %v6099_v20  ;;  %10083 = vst [vmem:[#allocation98_spill] sm:$0xff] %v6101_v37  ;;  %v2126_v26 = vmax.f32 %v2125_v13, %v6099_v20  ;;  %v2264_v58 = vmax.f32 %v2263_v34, %v6101_v37  ;;  %v6105_v0 = vpop.f32.mrb[63].mxu0  ;;  %v6107_v61 = vpop.f32.mrb[63].mxu1 }
 0x304   : > { %10084 = vst [vmem:[#allocation99_spill] sm:$0xff] %v6105_v0  ;;  %10085 = vst [vmem:[#allocation100_spill] sm:$0xff] %v6107_v61  ;;  %v2195_v25 = vmax.f32 %v2194_v29, %v6105_v0  ;;  %v2333_v12 = vmax.f32 %v2332_v50, %v6107_v61 }
 0x306   : > { %v6111_v27 = vpop.f32.mrb[64].mxu0  ;;  %v6113_v62 = vpop.f32.mrb[64].mxu1 }
 0x307   : > { %10086 = vst [vmem:[#allocation101_spill] sm:$0xff] %v6111_v27  ;;  %10087 = vst [vmem:[#allocation102_spill] sm:$0xff] %v6113_v62  ;;  %v2127_v21 = vmax.f32 %v2126_v26, %v6111_v27  ;;  %v2265_v22 = vmax.f32 %v2264_v58, %v6113_v62  ;;  %v6117_v5 = vpop.f32.mrb[65].mxu0  ;;  %v6119_v13 = vpop.f32.mrb[65].mxu1 }
 0x308   : > { %10088 = vst [vmem:[#allocation103_spill] sm:$0xff] %v6117_v5  ;;  %10089 = vst [vmem:[#allocation104_spill] sm:$0xff] %v6119_v13  ;;  %v2196_v34 = vmax.f32 %v2195_v25, %v6117_v5  ;;  %v2334_v37 = vmax.f32 %v2333_v12, %v6119_v13 }
 0x30a   : > { %v6123_v20 = vpop.f32.mrb[66].mxu0  ;;  %v6125_v29 = vpop.f32.mrb[66].mxu1 }
 0x30b   : > { %10090 = vst [vmem:[#allocation105_spill] sm:$0xff] %v6123_v20  ;;  %10091 = vst [vmem:[#allocation106_spill] sm:$0xff] %v6125_v29  ;;  %v2128_v50 = vmax.f32 %v2127_v21, %v6123_v20  ;;  %v2266_v61 = vmax.f32 %v2265_v22, %v6125_v29  ;;  %v6129_v0 = vpop.f32.mrb[67].mxu0  ;;  %v6131_v26 = vpop.f32.mrb[67].mxu1 }
 0x30c   : > { %10092 = vst [vmem:[#allocation107_spill] sm:$0xff] %v6129_v0  ;;  %10093 = vst [vmem:[#allocation108_spill] sm:$0xff] %v6131_v26  ;;  %v2197_v58 = vmax.f32 %v2196_v34, %v6129_v0  ;;  %v2335_v62 = vmax.f32 %v2334_v37, %v6131_v26 }
 0x30e   : > { %v6135_v27 = vpop.f32.mrb[68].mxu0  ;;  %v6137_v25 = vpop.f32.mrb[68].mxu1 }
 0x30f   : > { %10094 = vst [vmem:[#allocation109_spill] sm:$0xff] %v6135_v27  ;;  %10095 = vst [vmem:[#allocation110_spill] sm:$0xff] %v6137_v25  ;;  %v2129_v12 = vmax.f32 %v2128_v50, %v6135_v27  ;;  %v2267_v13 = vmax.f32 %v2266_v61, %v6137_v25  ;;  %v6141_v5 = vpop.f32.mrb[69].mxu0  ;;  %v6143_v21 = vpop.f32.mrb[69].mxu1 }
 0x310   : > { %10096 = vst [vmem:[#allocation111_spill] sm:$0xff] %v6141_v5  ;;  %10097 = vst [vmem:[#allocation112_spill] sm:$0xff] %v6143_v21  ;;  %v2198_v22 = vmax.f32 %v2197_v58, %v6141_v5  ;;  %v2336_v29 = vmax.f32 %v2335_v62, %v6143_v21 }
 0x312   : > { %v6147_v20 = vpop.f32.mrb[70].mxu0  ;;  %v6149_v34 = vpop.f32.mrb[70].mxu1 }
 0x313   : > { %10098 = vst [vmem:[#allocation113_spill] sm:$0xff] %v6147_v20  ;;  %10099 = vst [vmem:[#allocation114_spill] sm:$0xff] %v6149_v34  ;;  %v2130_v37 = vmax.f32 %v2129_v12, %v6147_v20  ;;  %v2268_v26 = vmax.f32 %v2267_v13, %v6149_v34  ;;  %v6153_v0 = vpop.f32.mrb[71].mxu0  ;;  %v6155_v50 = vpop.f32.mrb[71].mxu1 }
 0x314   : > { %10100 = vst [vmem:[#allocation115_spill] sm:$0xff] %v6153_v0  ;;  %10101 = vst [vmem:[#allocation116_spill] sm:$0xff] %v6155_v50  ;;  %v2199_v61 = vmax.f32 %v2198_v22, %v6153_v0  ;;  %v2337_v25 = vmax.f32 %v2336_v29, %v6155_v50  ;;  %v9572_v29 = vlaneseq }
 0x316   : > { %v6159_v27 = vpop.f32.mrb[72].mxu0  ;;  %v6161_v58 = vpop.f32.mrb[72].mxu1  ;;  %vm6184_vm1 = vcmp.lt.s32.totalorder %v9572_v29, 512 }
 0x317   : > { %10102 = vst [vmem:[#allocation117_spill] sm:$0xff] %v6159_v27  ;;  %10103 = vst [vmem:[#allocation118_spill] sm:$0xff] %v6161_v58  ;;  %v2131_v62 = vmax.f32 %v2130_v37, %v6159_v27  ;;  %v2269_v21 = vmax.f32 %v2268_v26, %v6161_v58  ;;  %v6165_v5 = vpop.f32.mrb[73].mxu0  ;;  %v6167_v12 = vpop.f32.mrb[73].mxu1 }
 0x318   : > { %10104 = vst [vmem:[#allocation119_spill] sm:$0xff] %v6165_v5  ;;  %10105 = vst [vmem:[#allocation120_spill] sm:$0xff] %v6167_v12  ;;  %v2200_v13 = vmax.f32 %v2199_v61, %v6165_v5  ;;  %v2338_v34 = vmax.f32 %v2337_v25, %v6167_v12  ;;  %v10110_v25 = vmov 0 }
 0x319   : > { %v10111_v25 = vsel %vm6184_vm1, 4294967295, %v10110_v25 }
 0x31a   : > { %v6171_v20 = vpop.f32.mrb[74].mxu0  ;;  %v6173_v22 = vpop.f32.mrb[74].mxu1  ;;  %10112 = vst [vmem:[#allocation125_spill] sm:$0xff] %v10111_v25 }
 0x31b   : > { %10106 = vst [vmem:[#allocation121_spill] sm:$0xff] %v6171_v20  ;;  %10107 = vst [vmem:[#allocation122_spill] sm:$0xff] %v6173_v22  ;;  %v2132_v50 = vmax.f32 %v2131_v62, %v6171_v20  ;;  %v2270_v0 = vmax.f32 %v2269_v21, %v6173_v22  ;;  %v6177_v37 = vpop.f32.mrb[75].mxu0  ;;  %v6179_v26 = vpop.f32.mrb[75].mxu1  ;;  %v5174_v62 = vmov -inf   ;;  %v10115_v21 = vmov 0.0  }
 0x31c   : > { %10108 = vst [vmem:[#allocation123_spill] sm:$0xff] %v6177_v37  ;;  %10109 = vst [vmem:[#allocation124_spill] sm:$0xff] %v6179_v26  ;;  %v2201_v58 = vmax.f32 %v2200_v13, %v6177_v37  ;;  %v2339_v27 = vmax.f32 %v2338_v34, %v6179_v26 }
 0x31d   : > { %561 = vst.msk [vmem:[#allocation3] sm:$0xf] %vm6184_vm1, %v5174_v62  ;;  %562 = vst.msk [vmem:[#allocation4] sm:$0xf] %vm6184_vm1, %v10115_v21 }
 0x31e   : > { %v6188_v61 = vpop.f32.mrb[76].mxu0  ;;  %v6190_v12 = vpop.f32.mrb[76].mxu1 }
 0x31f   : > { %10113 = vst [vmem:[#allocation126_spill] sm:$0xff] %v6188_v61  ;;  %10114 = vst [vmem:[#allocation127_spill] sm:$0xff] %v6190_v12  ;;  %v2133_v13 = vmax.f32 %v2132_v50, %v6188_v61  ;;  %v2271_v34 = vmax.f32 %v2270_v0, %v6190_v12  ;;  %v6199_v29 = vpop.f32.mrb[77].mxu0  ;;  %v6201_v26 = vpop.f32.mrb[77].mxu1 }
 0x320   : > { %10116 = vst [vmem:[#allocation128_spill] sm:$0xff] %v6199_v29  ;;  %10117 = vst [vmem:[#allocation129_spill] sm:$0xff] %v6201_v26  ;;  %v2202_v22 = vmax.f32 %v2201_v58, %v6199_v29  ;;  %v2340_v37 = vmax.f32 %v2339_v27, %v6201_v26 }
 0x322   : > { %v6205_v20 = vpop.f32.mrb[78].mxu0  ;;  %v6207_v5 = vpop.f32.mrb[78].mxu1 }
 0x323   : > { %10118 = vst [vmem:[#allocation130_spill] sm:$0xff] %v6205_v20  ;;  %10119 = vst [vmem:[#allocation131_spill] sm:$0xff] %v6207_v5  ;;  %v2134_v62 = vmax.f32 %v2133_v13, %v6205_v20  ;;  %v2272_v21 = vmax.f32 %v2271_v34, %v6207_v5  ;;  %v6211_v53 = vpop.f32.mrb[79].mxu0  ;;  %v6213_v50 = vpop.f32.mrb[79].mxu1 }
 0x324   : > { %10120 = vst [vmem:[#allocation132_spill] sm:$0xff] %v6211_v53  ;;  %10121 = vst [vmem:[#allocation133_spill] sm:$0xff] %v6213_v50  ;;  %v2203_v0 = vmax.f32 %v2202_v22, %v6211_v53  ;;  %v2341_v12 = vmax.f32 %v2340_v37, %v6213_v50 }
 0x326   : > { %v6217_v61 = vpop.f32.mrb[80].mxu0  ;;  %v6219_v58 = vpop.f32.mrb[80].mxu1 }
 0x327   : > { %10122 = vst [vmem:[#allocation134_spill] sm:$0xff] %v6217_v61  ;;  %10123 = vst [vmem:[#allocation135_spill] sm:$0xff] %v6219_v58  ;;  %v2135_v27 = vmax.f32 %v2134_v62, %v6217_v61  ;;  %v2273_v26 = vmax.f32 %v2272_v21, %v6219_v58  ;;  %v6223_v29 = vpop.f32.mrb[81].mxu0  ;;  %v6225_v13 = vpop.f32.mrb[81].mxu1 }
 0x328   : > { %10124 = vst [vmem:[#allocation136_spill] sm:$0xff] %v6223_v29  ;;  %10125 = vst [vmem:[#allocation137_spill] sm:$0xff] %v6225_v13  ;;  %v2204_v34 = vmax.f32 %v2203_v0, %v6223_v29  ;;  %v2342_v5 = vmax.f32 %v2341_v12, %v6225_v13 }
 0x32a   : > { %v6229_v20 = vpop.f32.mrb[82].mxu0  ;;  %v6231_v22 = vpop.f32.mrb[82].mxu1 }
 0x32b   : > { %10126 = vst [vmem:[#allocation138_spill] sm:$0xff] %v6229_v20  ;;  %10127 = vst [vmem:[#allocation139_spill] sm:$0xff] %v6231_v22  ;;  %v2136_v37 = vmax.f32 %v2135_v27, %v6229_v20  ;;  %v2274_v50 = vmax.f32 %v2273_v26, %v6231_v22  ;;  %v6235_v53 = vpop.f32.mrb[83].mxu0  ;;  %v6237_v62 = vpop.f32.mrb[83].mxu1 }
 0x32c   : > { %10128 = vst [vmem:[#allocation140_spill] sm:$0xff] %v6235_v53  ;;  %10129 = vst [vmem:[#allocation141_spill] sm:$0xff] %v6237_v62  ;;  %v2205_v21 = vmax.f32 %v2204_v34, %v6235_v53  ;;  %v2343_v58 = vmax.f32 %v2342_v5, %v6237_v62 }
 0x32e   : > { %v6241_v61 = vpop.f32.mrb[84].mxu0  ;;  %v6243_v0 = vpop.f32.mrb[84].mxu1 }
 0x32f   : > { %10130 = vst [vmem:[#allocation142_spill] sm:$0xff] %v6241_v61  ;;  %10131 = vst [vmem:[#allocation143_spill] sm:$0xff] %v6243_v0  ;;  %v2137_v12 = vmax.f32 %v2136_v37, %v6241_v61  ;;  %v2275_v13 = vmax.f32 %v2274_v50, %v6243_v0  ;;  %v6247_v29 = vpop.f32.mrb[85].mxu0  ;;  %v6249_v27 = vpop.f32.mrb[85].mxu1 }
 0x330   : > { %10132 = vst [vmem:[#allocation144_spill] sm:$0xff] %v6247_v29  ;;  %10133 = vst [vmem:[#allocation145_spill] sm:$0xff] %v6249_v27  ;;  %v2206_v26 = vmax.f32 %v2205_v21, %v6247_v29  ;;  %v2344_v22 = vmax.f32 %v2343_v58, %v6249_v27 }
 0x332   : > { %v6253_v20 = vpop.f32.mrb[86].mxu0  ;;  %v6255_v34 = vpop.f32.mrb[86].mxu1 }
 0x333   : > { %10134 = vst [vmem:[#allocation146_spill] sm:$0xff] %v6253_v20  ;;  %10135 = vst [vmem:[#allocation147_spill] sm:$0xff] %v6255_v34  ;;  %v2138_v5 = vmax.f32 %v2137_v12, %v6253_v20  ;;  %v2276_v62 = vmax.f32 %v2275_v13, %v6255_v34  ;;  %v6259_v53 = vpop.f32.mrb[87].mxu0  ;;  %v6261_v37 = vpop.f32.mrb[87].mxu1 }
 0x334   : > { %10136 = vst [vmem:[#allocation148_spill] sm:$0xff] %v6259_v53  ;;  %10137 = vst [vmem:[#allocation149_spill] sm:$0xff] %v6261_v37  ;;  %v2207_v50 = vmax.f32 %v2206_v26, %v6259_v53  ;;  %v2345_v0 = vmax.f32 %v2344_v22, %v6261_v37 }
 0x336   : > { %v6265_v61 = vpop.f32.mrb[88].mxu0  ;;  %v6267_v21 = vpop.f32.mrb[88].mxu1 }
 0x337   : > { %10138 = vst [vmem:[#allocation150_spill] sm:$0xff] %v6265_v61  ;;  %10139 = vst [vmem:[#allocation151_spill] sm:$0xff] %v6267_v21  ;;  %v2139_v58 = vmax.f32 %v2138_v5, %v6265_v61  ;;  %v2277_v27 = vmax.f32 %v2276_v62, %v6267_v21  ;;  %v6271_v29 = vpop.f32.mrb[89].mxu0  ;;  %v6273_v12 = vpop.f32.mrb[89].mxu1 }
 0x338   : > { %10140 = vst [vmem:[#allocation152_spill] sm:$0xff] %v6271_v29  ;;  %10141 = vst [vmem:[#allocation153_spill] sm:$0xff] %v6273_v12  ;;  %v2208_v13 = vmax.f32 %v2207_v50, %v6271_v29  ;;  %v2346_v34 = vmax.f32 %v2345_v0, %v6273_v12 }
 0x33a   : > { %v6277_v20 = vpop.f32.mrb[90].mxu0  ;;  %v6279_v26 = vpop.f32.mrb[90].mxu1 }
 0x33b   : > { %10142 = vst [vmem:[#allocation154_spill] sm:$0xff] %v6277_v20  ;;  %10143 = vst [vmem:[#allocation155_spill] sm:$0xff] %v6279_v26  ;;  %v2140_v22 = vmax.f32 %v2139_v58, %v6277_v20  ;;  %v2278_v37 = vmax.f32 %v2277_v27, %v6279_v26  ;;  %v6283_v53 = vpop.f32.mrb[91].mxu0  ;;  %v6285_v5 = vpop.f32.mrb[91].mxu1 }
 0x33c   : > { %10144 = vst [vmem:[#allocation156_spill] sm:$0xff] %v6283_v53  ;;  %10145 = vst [vmem:[#allocation157_spill] sm:$0xff] %v6285_v5  ;;  %v2209_v62 = vmax.f32 %v2208_v13, %v6283_v53  ;;  %v2347_v21 = vmax.f32 %v2346_v34, %v6285_v5 }
 0x33e   : > { %v6289_v61 = vpop.f32.mrb[92].mxu0  ;;  %v6291_v50 = vpop.f32.mrb[92].mxu1 }
 0x33f   : > { %10146 = vst [vmem:[#allocation158_spill] sm:$0xff] %v6289_v61  ;;  %10147 = vst [vmem:[#allocation159_spill] sm:$0xff] %v6291_v50  ;;  %v2141_v0 = vmax.f32 %v2140_v22, %v6289_v61  ;;  %v2279_v12 = vmax.f32 %v2278_v37, %v6291_v50  ;;  %v6295_v29 = vpop.f32.mrb[93].mxu0  ;;  %v6297_v58 = vpop.f32.mrb[93].mxu1 }
 0x340   : > { %10148 = vst [vmem:[#allocation160_spill] sm:$0xff] %v6295_v29  ;;  %10149 = vst [vmem:[#allocation161_spill] sm:$0xff] %v6297_v58  ;;  %v2210_v27 = vmax.f32 %v2209_v62, %v6295_v29  ;;  %v2348_v26 = vmax.f32 %v2347_v21, %v6297_v58 }
 0x342   : > { %v6301_v20 = vpop.f32.mrb[94].mxu0  ;;  %v6303_v13 = vpop.f32.mrb[94].mxu1 }
 0x343   : > { %10150 = vst [vmem:[#allocation162_spill] sm:$0xff] %v6301_v20  ;;  %10151 = vst [vmem:[#allocation163_spill] sm:$0xff] %v6303_v13  ;;  %v2142_v34 = vmax.f32 %v2141_v0, %v6301_v20  ;;  %v2280_v5 = vmax.f32 %v2279_v12, %v6303_v13  ;;  %v6307_v53 = vpop.f32.mrb[95].mxu0  ;;  %v6309_v22 = vpop.f32.mrb[95].mxu1 }
 0x344   : > { %10152 = vst [vmem:[#allocation164_spill] sm:$0xff] %v6307_v53  ;;  %10153 = vst [vmem:[#allocation165_spill] sm:$0xff] %v6309_v22  ;;  %v2211_v37 = vmax.f32 %v2210_v27, %v6307_v53  ;;  %v2349_v50 = vmax.f32 %v2348_v26, %v6309_v22 }
 0x346   : > { %v6313_v61 = vpop.f32.mrb[96].mxu0  ;;  %v6315_v62 = vpop.f32.mrb[96].mxu1 }
 0x347   : > { %10154 = vst [vmem:[#allocation166_spill] sm:$0xff] %v6313_v61  ;;  %10155 = vst [vmem:[#allocation167_spill] sm:$0xff] %v6315_v62  ;;  %v2143_v21 = vmax.f32 %v2142_v34, %v6313_v61  ;;  %v2281_v58 = vmax.f32 %v2280_v5, %v6315_v62  ;;  %v6319_v29 = vpop.f32.mrb[97].mxu0  ;;  %v6321_v0 = vpop.f32.mrb[97].mxu1 }
 0x348   : > { %10156 = vst [vmem:[#allocation168_spill] sm:$0xff] %v6319_v29  ;;  %10157 = vst [vmem:[#allocation169_spill] sm:$0xff] %v6321_v0  ;;  %v2212_v12 = vmax.f32 %v2211_v37, %v6319_v29  ;;  %v2350_v13 = vmax.f32 %v2349_v50, %v6321_v0 }
 0x34a   : > { %v6325_v20 = vpop.f32.mrb[98].mxu0  ;;  %v6327_v27 = vpop.f32.mrb[98].mxu1 }
 0x34b   : > { %10158 = vst [vmem:[#allocation170_spill] sm:$0xff] %v6325_v20  ;;  %10159 = vst [vmem:[#allocation171_spill] sm:$0xff] %v6327_v27  ;;  %v2144_v26 = vmax.f32 %v2143_v21, %v6325_v20  ;;  %v2282_v22 = vmax.f32 %v2281_v58, %v6327_v27  ;;  %v6331_v53 = vpop.f32.mrb[99].mxu0  ;;  %v6333_v34 = vpop.f32.mrb[99].mxu1 }
 0x34c   : > { %10160 = vst [vmem:[#allocation172_spill] sm:$0xff] %v6331_v53  ;;  %10161 = vst [vmem:[#allocation173_spill] sm:$0xff] %v6333_v34  ;;  %v2213_v5 = vmax.f32 %v2212_v12, %v6331_v53  ;;  %v2351_v62 = vmax.f32 %v2350_v13, %v6333_v34 }
 0x34e   : > { %v6337_v61 = vpop.f32.mrb[100].mxu0  ;;  %v6339_v37 = vpop.f32.mrb[100].mxu1 }
 0x34f   : > { %10162 = vst [vmem:[#allocation174_spill] sm:$0xff] %v6337_v61  ;;  %10163 = vst [vmem:[#allocation175_spill] sm:$0xff] %v6339_v37  ;;  %v2145_v50 = vmax.f32 %v2144_v26, %v6337_v61  ;;  %v2283_v0 = vmax.f32 %v2282_v22, %v6339_v37  ;;  %v6343_v29 = vpop.f32.mrb[101].mxu0  ;;  %v6345_v21 = vpop.f32.mrb[101].mxu1 }
 0x350   : > { %10164 = vst [vmem:[#allocation176_spill] sm:$0xff] %v6343_v29  ;;  %10165 = vst [vmem:[#allocation177_spill] sm:$0xff] %v6345_v21  ;;  %v2214_v58 = vmax.f32 %v2213_v5, %v6343_v29  ;;  %v2352_v27 = vmax.f32 %v2351_v62, %v6345_v21 }
 0x352   : > { %v6349_v20 = vpop.f32.mrb[102].mxu0  ;;  %v6351_v12 = vpop.f32.mrb[102].mxu1 }
 0x353   : > { %10166 = vst [vmem:[#allocation178_spill] sm:$0xff] %v6349_v20  ;;  %10167 = vst [vmem:[#allocation179_spill] sm:$0xff] %v6351_v12  ;;  %v2146_v13 = vmax.f32 %v2145_v50, %v6349_v20  ;;  %v2284_v34 = vmax.f32 %v2283_v0, %v6351_v12  ;;  %v6355_v53 = vpop.f32.mrb[103].mxu0  ;;  %v6357_v26 = vpop.f32.mrb[103].mxu1 }
 0x354   : > { %10168 = vst [vmem:[#allocation180_spill] sm:$0xff] %v6355_v53  ;;  %10169 = vst [vmem:[#allocation181_spill] sm:$0xff] %v6357_v26  ;;  %v2215_v22 = vmax.f32 %v2214_v58, %v6355_v53  ;;  %v2353_v37 = vmax.f32 %v2352_v27, %v6357_v26 }
 0x356   : > { %v6361_v61 = vpop.f32.mrb[104].mxu0  ;;  %v6363_v5 = vpop.f32.mrb[104].mxu1 }
 0x357   : > { %10170 = vst [vmem:[#allocation182_spill] sm:$0xff] %v6361_v61  ;;  %10171 = vst [vmem:[#allocation183_spill] sm:$0xff] %v6363_v5  ;;  %v2147_v62 = vmax.f32 %v2146_v13, %v6361_v61  ;;  %v2285_v21 = vmax.f32 %v2284_v34, %v6363_v5  ;;  %v6367_v29 = vpop.f32.mrb[105].mxu0  ;;  %v6369_v50 = vpop.f32.mrb[105].mxu1 }
 0x358   : > { %10172 = vst [vmem:[#allocation184_spill] sm:$0xff] %v6367_v29  ;;  %10173 = vst [vmem:[#allocation185_spill] sm:$0xff] %v6369_v50  ;;  %v2216_v0 = vmax.f32 %v2215_v22, %v6367_v29  ;;  %v2354_v12 = vmax.f32 %v2353_v37, %v6369_v50 }
 0x35a   : > { %v6373_v20 = vpop.f32.mrb[106].mxu0  ;;  %v6375_v58 = vpop.f32.mrb[106].mxu1 }
 0x35b   : > { %10174 = vst [vmem:[#allocation186_spill] sm:$0xff] %v6373_v20  ;;  %10175 = vst [vmem:[#allocation187_spill] sm:$0xff] %v6375_v58  ;;  %v2148_v27 = vmax.f32 %v2147_v62, %v6373_v20  ;;  %v2286_v26 = vmax.f32 %v2285_v21, %v6375_v58  ;;  %v6379_v53 = vpop.f32.mrb[107].mxu0  ;;  %v6381_v13 = vpop.f32.mrb[107].mxu1 }
 0x35c   : > { %10176 = vst [vmem:[#allocation188_spill] sm:$0xff] %v6379_v53  ;;  %10177 = vst [vmem:[#allocation189_spill] sm:$0xff] %v6381_v13  ;;  %v2217_v34 = vmax.f32 %v2216_v0, %v6379_v53  ;;  %v2355_v5 = vmax.f32 %v2354_v12, %v6381_v13 }
 0x35e   : > { %v6385_v61 = vpop.f32.mrb[108].mxu0  ;;  %v6387_v22 = vpop.f32.mrb[108].mxu1 }
 0x35f   : > { %10178 = vst [vmem:[#allocation190_spill] sm:$0xff] %v6385_v61  ;;  %10179 = vst [vmem:[#allocation191_spill] sm:$0xff] %v6387_v22  ;;  %v2149_v37 = vmax.f32 %v2148_v27, %v6385_v61  ;;  %v2287_v50 = vmax.f32 %v2286_v26, %v6387_v22  ;;  %v6391_v29 = vpop.f32.mrb[109].mxu0  ;;  %v6393_v62 = vpop.f32.mrb[109].mxu1 }
 0x360   : > { %10180 = vst [vmem:[#allocation192_spill] sm:$0xff] %v6391_v29  ;;  %10181 = vst [vmem:[#allocation193_spill] sm:$0xff] %v6393_v62  ;;  %v2218_v21 = vmax.f32 %v2217_v34, %v6391_v29  ;;  %v2356_v58 = vmax.f32 %v2355_v5, %v6393_v62 }
 0x362   : > { %v6397_v20 = vpop.f32.mrb[110].mxu0  ;;  %v6399_v0 = vpop.f32.mrb[110].mxu1 }
 0x363   : > { %10182 = vst [vmem:[#allocation194_spill] sm:$0xff] %v6397_v20  ;;  %10183 = vst [vmem:[#allocation195_spill] sm:$0xff] %v6399_v0  ;;  %v2150_v12 = vmax.f32 %v2149_v37, %v6397_v20  ;;  %v2288_v13 = vmax.f32 %v2287_v50, %v6399_v0  ;;  %v6403_v53 = vpop.f32.mrb[111].mxu0  ;;  %v6405_v27 = vpop.f32.mrb[111].mxu1 }
 0x364   : > { %10184 = vst [vmem:[#allocation196_spill] sm:$0xff] %v6403_v53  ;;  %10185 = vst [vmem:[#allocation197_spill] sm:$0xff] %v6405_v27  ;;  %v2219_v26 = vmax.f32 %v2218_v21, %v6403_v53  ;;  %v2357_v22 = vmax.f32 %v2356_v58, %v6405_v27 }
 0x366   : > { %v6409_v61 = vpop.f32.mrb[112].mxu0  ;;  %v6411_v34 = vpop.f32.mrb[112].mxu1 }
 0x367   : > { %10186 = vst [vmem:[#allocation198_spill] sm:$0xff] %v6409_v61  ;;  %10187 = vst [vmem:[#allocation199_spill] sm:$0xff] %v6411_v34  ;;  %v2151_v5 = vmax.f32 %v2150_v12, %v6409_v61  ;;  %v2289_v62 = vmax.f32 %v2288_v13, %v6411_v34  ;;  %v6415_v29 = vpop.f32.mrb[113].mxu0  ;;  %v6417_v37 = vpop.f32.mrb[113].mxu1 }
 0x368   : > { %10188 = vst [vmem:[#allocation200_spill] sm:$0xff] %v6415_v29  ;;  %10189 = vst [vmem:[#allocation201_spill] sm:$0xff] %v6417_v37  ;;  %v2220_v50 = vmax.f32 %v2219_v26, %v6415_v29  ;;  %v2358_v0 = vmax.f32 %v2357_v22, %v6417_v37 }
 0x36a   : > { %v6421_v20 = vpop.f32.mrb[114].mxu0  ;;  %v6423_v21 = vpop.f32.mrb[114].mxu1 }
 0x36b   : > { %10190 = vst [vmem:[#allocation202_spill] sm:$0xff] %v6421_v20  ;;  %10191 = vst [vmem:[#allocation203_spill] sm:$0xff] %v6423_v21  ;;  %v2152_v58 = vmax.f32 %v2151_v5, %v6421_v20  ;;  %v2290_v27 = vmax.f32 %v2289_v62, %v6423_v21  ;;  %v6427_v53 = vpop.f32.mrb[115].mxu0  ;;  %v6429_v12 = vpop.f32.mrb[115].mxu1 }
 0x36c   : > { %10192 = vst [vmem:[#allocation204_spill] sm:$0xff] %v6427_v53  ;;  %10193 = vst [vmem:[#allocation205_spill] sm:$0xff] %v6429_v12  ;;  %v2221_v13 = vmax.f32 %v2220_v50, %v6427_v53  ;;  %v2359_v34 = vmax.f32 %v2358_v0, %v6429_v12 }
 0x36e   : > { %v6433_v61 = vpop.f32.mrb[116].mxu0  ;;  %v6435_v26 = vpop.f32.mrb[116].mxu1 }
 0x36f   : > { %10194 = vst [vmem:[#allocation206_spill] sm:$0xff] %v6433_v61  ;;  %10195 = vst [vmem:[#allocation207_spill] sm:$0xff] %v6435_v26  ;;  %v2153_v22 = vmax.f32 %v2152_v58, %v6433_v61  ;;  %v2291_v37 = vmax.f32 %v2290_v27, %v6435_v26  ;;  %v6439_v29 = vpop.f32.mrb[117].mxu0  ;;  %v6441_v5 = vpop.f32.mrb[117].mxu1 }
 0x370   : > { %10196 = vst [vmem:[#allocation208_spill] sm:$0xff] %v6439_v29  ;;  %10197 = vst [vmem:[#allocation209_spill] sm:$0xff] %v6441_v5  ;;  %v2222_v62 = vmax.f32 %v2221_v13, %v6439_v29  ;;  %v2360_v21 = vmax.f32 %v2359_v34, %v6441_v5 }
 0x372   : > { %v6445_v20 = vpop.f32.mrb[118].mxu0  ;;  %v6447_v50 = vpop.f32.mrb[118].mxu1 }
 0x373   : > { %10198 = vst [vmem:[#allocation210_spill] sm:$0xff] %v6445_v20  ;;  %10199 = vst [vmem:[#allocation211_spill] sm:$0xff] %v6447_v50  ;;  %v2154_v0 = vmax.f32 %v2153_v22, %v6445_v20  ;;  %v2292_v12 = vmax.f32 %v2291_v37, %v6447_v50  ;;  %v6451_v53 = vpop.f32.mrb[119].mxu0  ;;  %v6453_v58 = vpop.f32.mrb[119].mxu1 }
 0x374   : > { %10200 = vst [vmem:[#allocation212_spill] sm:$0xff] %v6451_v53  ;;  %10201 = vst [vmem:[#allocation213_spill] sm:$0xff] %v6453_v58  ;;  %v2223_v27 = vmax.f32 %v2222_v62, %v6451_v53  ;;  %v2361_v26 = vmax.f32 %v2360_v21, %v6453_v58 }
 0x376   : > { %v6457_v61 = vpop.f32.mrb[120].mxu0  ;;  %v6459_v13 = vpop.f32.mrb[120].mxu1 }
 0x377   : > { %10202 = vst [vmem:[#allocation214_spill] sm:$0xff] %v6457_v61  ;;  %10203 = vst [vmem:[#allocation215_spill] sm:$0xff] %v6459_v13  ;;  %v2155_v34 = vmax.f32 %v2154_v0, %v6457_v61  ;;  %v2293_v5 = vmax.f32 %v2292_v12, %v6459_v13  ;;  %v6463_v29 = vpop.f32.mrb[121].mxu0  ;;  %v6465_v22 = vpop.f32.mrb[121].mxu1 }
 0x378   : > { %10204 = vst [vmem:[#allocation216_spill] sm:$0xff] %v6463_v29  ;;  %10205 = vst [vmem:[#allocation217_spill] sm:$0xff] %v6465_v22  ;;  %v2224_v37 = vmax.f32 %v2223_v27, %v6463_v29  ;;  %v2362_v50 = vmax.f32 %v2361_v26, %v6465_v22 }
 0x37a   : > { %v6469_v20 = vpop.f32.mrb[122].mxu0  ;;  %v6471_v62 = vpop.f32.mrb[122].mxu1 }
 0x37b   : > { %10206 = vst [vmem:[#allocation218_spill] sm:$0xff] %v6469_v20  ;;  %10207 = vst [vmem:[#allocation219_spill] sm:$0xff] %v6471_v62  ;;  %v2156_v21 = vmax.f32 %v2155_v34, %v6469_v20  ;;  %v2294_v58 = vmax.f32 %v2293_v5, %v6471_v62  ;;  %v6475_v53 = vpop.f32.mrb[123].mxu0  ;;  %v6477_v0 = vpop.f32.mrb[123].mxu1 }
 0x37c   : > { %10208 = vst [vmem:[#allocation220_spill] sm:$0xff] %v6475_v53  ;;  %10209 = vst [vmem:[#allocation221_spill] sm:$0xff] %v6477_v0  ;;  %v2225_v12 = vmax.f32 %v2224_v37, %v6475_v53  ;;  %v2363_v13 = vmax.f32 %v2362_v50, %v6477_v0 }
 0x37e   : > { %v6481_v61 = vpop.f32.mrb[124].mxu0  ;;  %v6483_v27 = vpop.f32.mrb[124].mxu1 }
 0x37f   : > { %10210 = vst [vmem:[#allocation222_spill] sm:$0xff] %v6481_v61  ;;  %10211 = vst [vmem:[#allocation223_spill] sm:$0xff] %v6483_v27  ;;  %v2157_v26 = vmax.f32 %v2156_v21, %v6481_v61  ;;  %v2295_v22 = vmax.f32 %v2294_v58, %v6483_v27  ;;  %v6487_v29 = vpop.f32.mrb[125].mxu0  ;;  %v6489_v34 = vpop.f32.mrb[125].mxu1 }
 0x380   : > { %10212 = vst [vmem:[#allocation224_spill] sm:$0xff] %v6487_v29  ;;  %10213 = vst [vmem:[#allocation225_spill] sm:$0xff] %v6489_v34  ;;  %v2226_v5 = vmax.f32 %v2225_v12, %v6487_v29  ;;  %v2364_v62 = vmax.f32 %v2363_v13, %v6489_v34 }
 0x382   : > { %v6493_v20 = vpop.f32.mrb[126].mxu0  ;;  %v6495_v37 = vpop.f32.mrb[126].mxu1 }
 0x383   : > { %10214 = vst [vmem:[#allocation226_spill] sm:$0xff] %v6493_v20  ;;  %10215 = vst [vmem:[#allocation227_spill] sm:$0xff] %v6495_v37  ;;  %v2158_v50 = vmax.f32 %v2157_v26, %v6493_v20  ;;  %v2296_v0 = vmax.f32 %v2295_v22, %v6495_v37  ;;  %v6499_v53 = vpop.f32.mrb[127].mxu0  ;;  %v6501_v21 = vpop.f32.mrb[127].mxu1 }
 0x384   : > { %10216 = vst [vmem:[#allocation228_spill] sm:$0xff] %v6499_v53  ;;  %10217 = vst [vmem:[#allocation229_spill] sm:$0xff] %v6501_v21  ;;  %v2227_v58 = vmax.f32 %v2226_v5, %v6499_v53  ;;  %v2365_v27 = vmax.f32 %v2364_v62, %v6501_v21 }
 0x386   : > { %v6505_v61 = vpop.f32.mrb[128].mxu0  ;;  %v6507_v12 = vpop.f32.mrb[128].mxu1 }
 0x387   : > { %10218 = vst [vmem:[#allocation230_spill] sm:$0xff] %v6505_v61  ;;  %10219 = vst [vmem:[#allocation231_spill] sm:$0xff] %v6507_v12  ;;  %v2159_v13 = vmax.f32 %v2158_v50, %v6505_v61  ;;  %v2297_v34 = vmax.f32 %v2296_v0, %v6507_v12  ;;  %v6511_v29 = vpop.f32.mrb[129].mxu0  ;;  %v6513_v26 = vpop.f32.mrb[129].mxu1 }
 0x388   : > { %10220 = vst [vmem:[#allocation232_spill] sm:$0xff] %v6511_v29  ;;  %10221 = vst [vmem:[#allocation233_spill] sm:$0xff] %v6513_v26  ;;  %v2228_v22 = vmax.f32 %v2227_v58, %v6511_v29  ;;  %v2366_v37 = vmax.f32 %v2365_v27, %v6513_v26 }
 0x38a   : > { %v6517_v20 = vpop.f32.mrb[130].mxu0  ;;  %v6519_v5 = vpop.f32.mrb[130].mxu1 }
 0x38b   : > { %10222 = vst [vmem:[#allocation234_spill] sm:$0xff] %v6517_v20  ;;  %10223 = vst [vmem:[#allocation235_spill] sm:$0xff] %v6519_v5  ;;  %v2160_v62 = vmax.f32 %v2159_v13, %v6517_v20  ;;  %v2298_v21 = vmax.f32 %v2297_v34, %v6519_v5  ;;  %v6523_v53 = vpop.f32.mrb[131].mxu0  ;;  %v6525_v50 = vpop.f32.mrb[131].mxu1 }
 0x38c   : > { %10224 = vst [vmem:[#allocation236_spill] sm:$0xff] %v6523_v53  ;;  %10225 = vst [vmem:[#allocation237_spill] sm:$0xff] %v6525_v50  ;;  %v2229_v0 = vmax.f32 %v2228_v22, %v6523_v53  ;;  %v2367_v12 = vmax.f32 %v2366_v37, %v6525_v50 }
 0x38e   : > { %v6529_v61 = vpop.f32.mrb[132].mxu0  ;;  %v6531_v58 = vpop.f32.mrb[132].mxu1 }
 0x38f   : > { %10226 = vst [vmem:[#allocation238_spill] sm:$0xff] %v6529_v61  ;;  %10227 = vst [vmem:[#allocation239_spill] sm:$0xff] %v6531_v58  ;;  %v2161_v27 = vmax.f32 %v2160_v62, %v6529_v61  ;;  %v2299_v26 = vmax.f32 %v2298_v21, %v6531_v58  ;;  %v6535_v29 = vpop.f32.mrb[133].mxu0  ;;  %v6537_v13 = vpop.f32.mrb[133].mxu1 }
 0x390   : > { %10228 = vst [vmem:[#allocation240_spill] sm:$0xff] %v6535_v29  ;;  %10229 = vst [vmem:[#allocation241_spill] sm:$0xff] %v6537_v13  ;;  %v2230_v34 = vmax.f32 %v2229_v0, %v6535_v29  ;;  %v2368_v5 = vmax.f32 %v2367_v12, %v6537_v13  ;;  %v2383_v0 = vunpack.c.0.s8 %v2382_v33  ;;  %v10230_v29 = vlaneseq }
 0x391   : > { %v2162_v20 = vrot.slane %v2161_v27, 4  ;;  %v2300_v22 = vrot.slane %v2299_v26, 4 }
 0x392   : > { %v2231_v53 = vrot.slane %v2230_v34, 4  ;;  %v2369_v37 = vrot.slane %v2368_v5, 4  ;;  %v2385_v12 = vshrl.u32 %v10230_v29, 7 }
 0x393   : > { %v2163_v50 = vmax.f32 %v2161_v27, %v2162_v20  ;;  %v2301_v4 = vmax.f32 %v2299_v26, %v2300_v22 }
 0x394   : > { %v2232_v23 = vmax.f32 %v2230_v34, %v2231_v53  ;;  %v2370_v62 = vmax.f32 %v2368_v5, %v2369_v37  ;;  %v6542_v49 = vsub.s32 %v2383_v0, %v2385_v12  ;;  %v6550_v29 = vsub.s32 1, %v2385_v12 }
 0x395   : > { %v2164_v61 = vrot.slane %v2163_v50, 2  ;;  %v2302_v21 = vrot.slane %v2301_v4, 2 }
 0x396   : > { %v2233_v58 = vrot.slane %v2232_v23, 2  ;;  %v2371_v44 = vrot.slane %v2370_v62, 2  ;;  %10231 = vst [vmem:[#allocation242_spill] sm:$0xff] %v6542_v49  ;;  %10234 = vst [vmem:[#allocation245_spill] sm:$0xff] %v6550_v29 }
 0x397   : > { %v2165_v30 = vmax.f32 %v2163_v50, %v2164_v61  ;;  %v2303_v17 = vmax.f32 %v2301_v4, %v2302_v21  ;;  %v6546_v4 = vld [vmem:[#allocation3] sm:$0xf]  ;;  %v6552_v50 = vsub.s32 2, %v2385_v12 }
 0x398   : > { %v2234_v9 = vmax.f32 %v2232_v23, %v2233_v58  ;;  %v2372_v13 = vmax.f32 %v2370_v62, %v2371_v44  ;;  %10232 = vst [vmem:[#allocation243_spill] sm:$0xff] %v6546_v4  ;;  %v6548_v44 = vsub.s32 0, %v2385_v12 }
 0x399   : > { %v2166_v16 = vrot.slane %v2165_v30, 1  ;;  %v2304_v8 = vrot.slane %v2303_v17, 1  ;;  %10235 = vst [vmem:[#allocation246_spill] sm:$0xff] %v6552_v50 }
 0x39a   : > { %v2235_v3 = vrot.slane %v2234_v9, 1  ;;  %v2373_v20 = vrot.slane %v2372_v13, 1  ;;  %10233 = vst [vmem:[#allocation244_spill] sm:$0xff] %v6548_v44 }
 0x39b   : > { %v2167_v26 = vmax.f32 %v2165_v30, %v2166_v16  ;;  %v2305_v53 = vmax.f32 %v2303_v17, %v2304_v8  ;;  %v6555_v8 = vsub.s32 3, %v2385_v12  ;;  %v10240_v16 = vld [vmem:[#allocation23_spill] sm:$0xff] }
 0x39c   : > { %v2236_v27 = vmax.f32 %v2234_v9, %v2235_v3  ;;  %v2374_v5 = vmax.f32 %v2372_v13, %v2373_v20 }
 0x39d   : > { %10236 = vst [vmem:[#allocation247_spill] sm:$0xff] %v6555_v8 }
 0x39e   : > { %v2379_v34 = vcombine.low %v2167_v26, %v2236_v27  ;;  %v2380_v22 = vcombine.low %v2305_v53, %v2374_v5  ;;  %v10245_v5 = vld [vmem:[#allocation26_spill] sm:$0xff]  ;;  %v10246_v27 = vld [vmem:[#allocation28_spill] sm:$0xff]  ;;  %v10247_v53 = vld [vmem:[#allocation29_spill] sm:$0xff] }
 0x39f   : > { %v10248_v26 = vld [vmem:[#allocation31_spill] sm:$0xff] }
 0x3a0   : > { %v2387_v61 = vrot.slane %v2379_v34, %v6542_v49  ;;  %v2394_v23 = vrot.slane %v2380_v22, %v6542_v49  ;;  %v10241_v34 = vld [vmem:[#allocation22_spill] sm:$0xff]  ;;  %v10242_v22 = vld [vmem:[#allocation24_spill] sm:$0xff] }
 0x3a2   : > { %v2395_v33 = vcombine.low %v2387_v61, %v2394_v23  ;;  %v10243_v61 = vld [vmem:[#allocation25_spill] sm:$0xff]  ;;  %v10244_v23 = vld [vmem:[#allocation27_spill] sm:$0xff] }
 0x3a4   : > { %v2402_v3 = vrot.slane %v2395_v33, %v6542_v49  ;;  %v10238_v33 = vld [vmem:[#allocation20_spill] sm:$0xff] }
 0x3a6   : > { %v6558_v9 = vmax.f32 %v6546_v4, %v2402_v3  ;;  %v10239_v3 = vld [vmem:[#allocation21_spill] sm:$0xff] }
 0x3a8   : > { %10237 = vst [vmem:[#allocation248_spill] sm:$0xff] %v6558_v9  ;;  %v6564_v17 = vrot.slane %v6558_v9, %v6548_v44  ;;  %v6568_v30 = vrot.slane %v6558_v9, %v6550_v29  ;;  %v6572_v58 = vrot.slane %v6558_v9, %v6552_v50  ;;  %3831 = vst.msk [vmem:[#allocation3] sm:$0xf] %vm6184_vm1, %v6558_v9  ;;  %v10453_v29 = vld [vmem:[#allocation235_spill] sm:$0xff]  ;;  %v10454_v44 = vld [vmem:[#allocation237_spill] sm:$0xff] }
 0x3a9   : > { %v6579_v13 = vrot.slane %v6558_v9, %v6555_v8 }
 0x3aa   : > { %v10459_v20 = vsub.f32 %v5717_v38, %v6564_v17  ;;  %v10460_v12 = vsub.f32 %v5721_v40, %v6568_v30  ;;  %v10461_v21 = vsub.f32 %v5719_v39, %v6572_v58  ;;  %v10463_v8 = vsub.f32 %v5729_v42, %v6564_v17 }
 0x3ab   : > { %v10462_v62 = vsub.f32 %v5724_v41, %v6579_v13  ;;  %v10464_v38 = vsub.f32 %v5737_v46, %v6568_v30  ;;  %v10465_v40 = vsub.f32 %v5731_v43, %v6572_v58  ;;  %v10466_v41 = vsub.f32 %v5740_v47, %v6579_v13 }
 0x3ac   : > { %v2685_v50 = vmul.f32 1.442695, %v10459_v20  ;;  %v2687_v0 = vmul.f32 1.442695, %v10460_v12  ;;  %v2689_v25 = vmul.f32 1.442695, %v10461_v21  ;;  %v10467_v42 = vsub.f32 %v5749_v51, %v6564_v17 }
 0x3ad   : > { %v2691_v49 = vmul.f32 1.442695, %v10462_v62  ;;  %v2693_v37 = vmul.f32 1.442695, %v10463_v8  ;;  %v2695_v20 = vmul.f32 1.442695, %v10464_v38  ;;  %v10468_v46 = vsub.f32 %v5755_v55, %v6568_v30 }
 0x3ae   : > { %4500 = vpow2.f32 %v2685_v50  ;;  %v2697_v39 = vmul.f32 1.442695, %v10465_v40  ;;  %v2699_v62 = vmul.f32 1.442695, %v10466_v41  ;;  %v2701_v50 = vmul.f32 1.442695, %v10467_v42 }
 0x3af   : > { %4502 = vpow2.f32 %v2687_v0  ;;  %v2703_v8 = vmul.f32 1.442695, %v10468_v46  ;;  %v10469_v43 = vsub.f32 %v5751_v52, %v6572_v58  ;;  %v10470_v47 = vsub.f32 %v5758_v56, %v6579_v13 }
 0x3b0   : > { %4504 = vpow2.f32 %v2689_v25  ;;  %v10471_v51 = vsub.f32 %v5765_v59, %v6564_v17  ;;  %v10472_v55 = vsub.f32 %v5771_v1, %v6568_v30  ;;  %v10473_v52 = vsub.f32 %v5767_v60, %v6572_v58 }
 0x3b1   : > { %4506 = vpow2.f32 %v2691_v49  ;;  %v2705_v25 = vmul.f32 1.442695, %v10469_v43  ;;  %v2707_v49 = vmul.f32 1.442695, %v10470_v47  ;;  %v10475_v56 = vsub.f32 %v5774_v2, %v6579_v13 }
 0x3b2   : > { %4508 = vpow2.f32 %v2693_v37  ;;  %v2709_v37 = vmul.f32 1.442695, %v10471_v51  ;;  %v2711_v21 = vmul.f32 1.442695, %v10472_v55  ;;  %v2713_v12 = vmul.f32 1.442695, %v10473_v52 }
 0x3b3   : > { %4510 = vpow2.f32 %v2695_v20  ;;  %v2715_v59 = vmul.f32 1.442695, %v10475_v56  ;;  %v10477_v1 = vsub.f32 %v5781_v6, %v6564_v17  ;;  %v10479_v60 = vsub.f32 %v5787_v10, %v6568_v30 }
 0x3b4   : > { %4512 = vpow2.f32 %v2697_v39  ;;  %v10480_v2 = vsub.f32 %v5783_v7, %v6572_v58  ;;  %v10482_v6 = vsub.f32 %v5790_v11, %v6579_v13  ;;  %v10484_v10 = vsub.f32 %v5797_v14, %v6564_v17 }
 0x3b5   : > { %4514 = vpow2.f32 %v2699_v62  ;;  %v2717_v40 = vmul.f32 1.442695, %v10477_v1  ;;  %v2719_v41 = vmul.f32 1.442695, %v10479_v60  ;;  %v10486_v7 = vsub.f32 %v5803_v18, %v6568_v30 }
 0x3b6   : > { %4516 = vpow2.f32 %v2701_v50  ;;  %v2721_v42 = vmul.f32 1.442695, %v10480_v2  ;;  %v2723_v46 = vmul.f32 1.442695, %v10482_v6  ;;  %v2725_v43 = vmul.f32 1.442695, %v10484_v10 }
 0x3b7   : > { %4518 = vpow2.f32 %v2703_v8  ;;  %v2727_v47 = vmul.f32 1.442695, %v10486_v7  ;;  %v10487_v11 = vsub.f32 %v5799_v15, %v6572_v58  ;;  %v10489_v14 = vsub.f32 %v5807_v19, %v6579_v13 }
 0x3b8   : > { %v7135_v0 = vpop.eup %4500  ;;  %4520 = vpow2.f32 %v2705_v25  ;;  %v10491_v18 = vsub.f32 %v5815_v24, %v6564_v17  ;;  %v10493_v15 = vsub.f32 %v5821_v31, %v6568_v30  ;;  %v10494_v19 = vsub.f32 %v5817_v28, %v6572_v58 }
 0x3b9   : > { %v7140_v38 = vpop.eup %4502  ;;  %4522 = vpow2.f32 %v2707_v49  ;;  %v2729_v51 = vmul.f32 1.442695, %v10487_v11  ;;  %v2731_v55 = vmul.f32 1.442695, %v10489_v14  ;;  %v10496_v24 = vsub.f32 %v5824_v32, %v6579_v13 }
 0x3ba   : > { %10474 = vst [vmem:[#allocation20_spill] sm:$0xff] %v7140_v38  ;;  %v7145_v20 = vpop.eup %4504  ;;  %4524 = vpow2.f32 %v2709_v37  ;;  %v2733_v52 = vmul.f32 1.442695, %v10491_v18  ;;  %v2735_v56 = vmul.f32 1.442695, %v10493_v15  ;;  %v10498_v31 = vsub.f32 %v5831_v35, %v6564_v17 }
 0x3bb   : > { %10476 = vst [vmem:[#allocation21_spill] sm:$0xff] %v7145_v20  ;;  %v7150_v39 = vpop.eup %4506  ;;  %4526 = vpow2.f32 %v2711_v21  ;;  %v2737_v1 = vmul.f32 1.442695, %v10494_v19  ;;  %v2739_v60 = vmul.f32 1.442695, %v10496_v24  ;;  %v10500_v28 = vsub.f32 %v5837_v45, %v6568_v30 }
 0x3bc   : > { %10478 = vst [vmem:[#allocation23_spill] sm:$0xff] %v7150_v39  ;;  %v7155_v62 = vpop.eup %4508  ;;  %4528 = vpow2.f32 %v2713_v12  ;;  %v2741_v2 = vmul.f32 1.442695, %v10498_v31  ;;  %v10501_v32 = vsub.f32 %v5833_v36, %v6572_v58  ;;  %v10503_v35 = vsub.f32 %v5840_v48, %v6579_v13 }
 0x3bd   : > { %v7160_v50 = vpop.eup %4510  ;;  %4530 = vpow2.f32 %v2715_v59  ;;  %v2743_v6 = vmul.f32 1.442695, %v10500_v28  ;;  %v10505_v45 = vsub.f32 %v5847_v54, %v6564_v17  ;;  %v10507_v36 = vsub.f32 %v5853_v63, %v6568_v30 }
 0x3be   : > { %10481 = vst [vmem:[#allocation22_spill] sm:$0xff] %v7160_v50  ;;  %v7165_v8 = vpop.eup %4512  ;;  %4532 = vpow2.f32 %v2717_v40  ;;  %v2745_v10 = vmul.f32 1.442695, %v10501_v32  ;;  %v2747_v7 = vmul.f32 1.442695, %v10503_v35  ;;  %v10508_v48 = vsub.f32 %v5849_v57, %v6572_v58 }
 0x3bf   : > { %10483 = vst [vmem:[#allocation24_spill] sm:$0xff] %v7165_v8  ;;  %v7170_v25 = vpop.eup %4514  ;;  %4534 = vpow2.f32 %v2719_v41  ;;  %v2749_v11 = vmul.f32 1.442695, %v10505_v45  ;;  %v2751_v14 = vmul.f32 1.442695, %v10507_v36  ;;  %v10510_v54 = vsub.f32 %v10238_v33, %v6579_v13 }
 0x3c0   : > { %10485 = vst [vmem:[#allocation25_spill] sm:$0xff] %v7170_v25  ;;  %v7175_v49 = vpop.eup %4516  ;;  %4536 = vpow2.f32 %v2721_v42  ;;  %v2753_v18 = vmul.f32 1.442695, %v10508_v48  ;;  %v10512_v63 = vsub.f32 %v10239_v3, %v6564_v17  ;;  %v10514_v57 = vsub.f32 %v10240_v16, %v6568_v30 }
 0x3c1   : > { %v7180_v37 = vpop.eup %4518  ;;  %4538 = vpow2.f32 %v2723_v46  ;;  %v2755_v15 = vmul.f32 1.442695, %v10510_v54  ;;  %v10516_v33 = vsub.f32 %v10241_v34, %v6572_v58  ;;  %v10518_v3 = vsub.f32 %v10242_v22, %v6579_v13 }
 0x3c2   : > { %10488 = vst [vmem:[#allocation27_spill] sm:$0xff] %v7180_v37  ;;  %v7185_v21 = vpop.eup %4520  ;;  %4540 = vpow2.f32 %v2725_v43  ;;  %v2757_v19 = vmul.f32 1.442695, %v10512_v63  ;;  %v2759_v24 = vmul.f32 1.442695, %v10514_v57  ;;  %v10520_v16 = vsub.f32 %v10243_v61, %v6564_v17  ;;  %v10532_v63 = vld [vmem:[#allocation30_spill] sm:$0xff] }
 0x3c3   : > { %10490 = vst [vmem:[#allocation26_spill] sm:$0xff] %v7185_v21  ;;  %v7190_v12 = vpop.eup %4522  ;;  %4542 = vpow2.f32 %v2727_v47  ;;  %v2761_v31 = vmul.f32 1.442695, %v10516_v33  ;;  %v2763_v28 = vmul.f32 1.442695, %v10518_v3  ;;  %v10522_v34 = vsub.f32 %v10244_v23, %v6568_v30  ;;  %v10538_v3 = vld [vmem:[#allocation33_spill] sm:$0xff] }
 0x3c4   : > { %10492 = vst [vmem:[#allocation28_spill] sm:$0xff] %v7190_v12  ;;  %v7195_v59 = vpop.eup %4524  ;;  %4544 = vpow2.f32 %v2729_v51  ;;  %v2765_v32 = vmul.f32 1.442695, %v10520_v16  ;;  %v10524_v22 = vsub.f32 %v10245_v5, %v6572_v58  ;;  %v10526_v61 = vsub.f32 %v10246_v27, %v6579_v13 }
 0x3c5   : > { %v7200_v40 = vpop.eup %4526  ;;  %4546 = vpow2.f32 %v2731_v55  ;;  %v2767_v35 = vmul.f32 1.442695, %v10522_v34  ;;  %v10528_v23 = vsub.f32 %v10247_v53, %v6564_v17  ;;  %v10530_v5 = vsub.f32 %v10248_v26, %v6568_v30 }
 0x3c6   : > { %10495 = vst [vmem:[#allocation29_spill] sm:$0xff] %v7200_v40  ;;  %v7205_v41 = vpop.eup %4528  ;;  %4548 = vpow2.f32 %v2733_v52  ;;  %v2769_v45 = vmul.f32 1.442695, %v10524_v22  ;;  %v2771_v36 = vmul.f32 1.442695, %v10526_v61  ;;  %v10533_v27 = vsub.f32 %v10532_v63, %v6572_v58 }
 0x3c7   : > { %10497 = vst [vmem:[#allocation31_spill] sm:$0xff] %v7205_v41  ;;  %v7210_v42 = vpop.eup %4530  ;;  %4550 = vpow2.f32 %v2735_v56  ;;  %v2773_v48 = vmul.f32 1.442695, %v10528_v23  ;;  %v2775_v54 = vmul.f32 1.442695, %v10530_v5  ;;  %v10539_v26 = vsub.f32 %v10538_v3, %v6564_v17 }
 0x3c8   : > { %10499 = vst [vmem:[#allocation235_spill] sm:$0xff] %v7210_v42  ;;  %v7215_v46 = vpop.eup %4532  ;;  %4552 = vpow2.f32 %v2737_v1 }
 0x3c9   : > { %v7220_v43 = vpop.eup %4534  ;;  %4554 = vpow2.f32 %v2739_v60 }
 0x3ca   : > { %10502 = vst [vmem:[#allocation237_spill] sm:$0xff] %v7220_v43  ;;  %v7225_v47 = vpop.eup %4536  ;;  %4556 = vpow2.f32 %v2741_v2 }
 0x3cb   : > { %10504 = vst [vmem:[#allocation249_spill] sm:$0xff] %v7225_v47  ;;  %v7230_v51 = vpop.eup %4538  ;;  %4558 = vpow2.f32 %v2743_v6 }
 0x3cc   : > { %10506 = vst [vmem:[#allocation250_spill] sm:$0xff] %v7230_v51  ;;  %v7235_v55 = vpop.eup %4540  ;;  %4560 = vpow2.f32 %v2745_v10 }
 0x3cd   : > { %v7240_v52 = vpop.eup %4542  ;;  %4562 = vpow2.f32 %v2747_v7 }
 0x3ce   : > { %10509 = vst [vmem:[#allocation251_spill] sm:$0xff] %v7240_v52  ;;  %v7245_v56 = vpop.eup %4544  ;;  %4564 = vpow2.f32 %v2749_v11 }
 0x3cf   : > { %10511 = vst [vmem:[#allocation252_spill] sm:$0xff] %v7245_v56  ;;  %v7250_v1 = vpop.eup %4546  ;;  %4566 = vpow2.f32 %v2751_v14 }
 0x3d0   : > { %10513 = vst [vmem:[#allocation253_spill] sm:$0xff] %v7250_v1  ;;  %v7255_v60 = vpop.eup %4548  ;;  %4568 = vpow2.f32 %v2753_v18 }
 0x3d1   : > { %10515 = vst [vmem:[#allocation254_spill] sm:$0xff] %v7255_v60  ;;  %v7260_v2 = vpop.eup %4550  ;;  %4570 = vpow2.f32 %v2755_v15 }
 0x3d2   : > { %10517 = vst [vmem:[#allocation255_spill] sm:$0xff] %v7260_v2  ;;  %v7265_v6 = vpop.eup %4552  ;;  %4572 = vpow2.f32 %v2757_v19  ;;  %v2777_v19 = vmul.f32 1.442695, %v10533_v27 }
 0x3d3   : > { %10519 = vst [vmem:[#allocation256_spill] sm:$0xff] %v7265_v6  ;;  %v7270_v10 = vpop.eup %4554  ;;  %4574 = vpow2.f32 %v2759_v24  ;;  %v10535_v24 = vld [vmem:[#allocation32_spill] sm:$0xff] }
 0x3d4   : > { %10521 = vst [vmem:[#allocation257_spill] sm:$0xff] %v7270_v10  ;;  %v7275_v7 = vpop.eup %4556  ;;  %4576 = vpow2.f32 %v2761_v31  ;;  %v10536_v53 = vsub.f32 %v10535_v24, %v6579_v13 }
 0x3d5   : > { %10523 = vst [vmem:[#allocation258_spill] sm:$0xff] %v7275_v7  ;;  %v7280_v11 = vpop.eup %4558  ;;  %4578 = vpow2.f32 %v2763_v28  ;;  %v2781_v28 = vmul.f32 1.442695, %v10539_v26 }
 0x3d6   : > { %10525 = vst [vmem:[#allocation259_spill] sm:$0xff] %v7280_v11  ;;  %v7285_v14 = vpop.eup %4560  ;;  %4580 = vpow2.f32 %v2765_v32  ;;  %v2779_v33 = vmul.f32 1.442695, %v10536_v53  ;;  %v10541_v32 = vld [vmem:[#allocation35_spill] sm:$0xff] }
 0x3d7   : > { %10527 = vst [vmem:[#allocation260_spill] sm:$0xff] %v7285_v14  ;;  %v7290_v18 = vpop.eup %4562  ;;  %4582 = vpow2.f32 %v2767_v35  ;;  %v10542_v34 = vsub.f32 %v10541_v32, %v6568_v30 }
 0x3d8   : > { %10529 = vst [vmem:[#allocation261_spill] sm:$0xff] %v7290_v18  ;;  %v7295_v15 = vpop.eup %4564  ;;  %4584 = vpow2.f32 %v2769_v45  ;;  %v10544_v45 = vld [vmem:[#allocation34_spill] sm:$0xff] }
 0x3d9   : > { %10531 = vst [vmem:[#allocation262_spill] sm:$0xff] %v7295_v15  ;;  %v7300_v57 = vpop.eup %4566  ;;  %4586 = vpow2.f32 %v2771_v36  ;;  %v2783_v35 = vmul.f32 1.442695, %v10542_v34  ;;  %v10545_v61 = vsub.f32 %v10544_v45, %v6572_v58 }
 0x3da   : > { %10534 = vst [vmem:[#allocation30_spill] sm:$0xff] %v7300_v57  ;;  %v7305_v31 = vpop.eup %4568  ;;  %4588 = vpow2.f32 %v2773_v48  ;;  %v10547_v48 = vld [vmem:[#allocation36_spill] sm:$0xff] }
 0x3db   : > { %10537 = vst [vmem:[#allocation32_spill] sm:$0xff] %v7305_v31  ;;  %v7310_v16 = vpop.eup %4570  ;;  %4590 = vpow2.f32 %v2775_v54  ;;  %v2785_v36 = vmul.f32 1.442695, %v10545_v61  ;;  %v10548_v5 = vsub.f32 %v10547_v48, %v6579_v13  ;;  %v10550_v54 = vld [vmem:[#allocation37_spill] sm:$0xff] }
 0x3dc   : > { %10540 = vst [vmem:[#allocation33_spill] sm:$0xff] %v7310_v16  ;;  %v7315_v22 = vpop.eup %4572  ;;  %4592 = vpow2.f32 %v2777_v19  ;;  %v10551_v24 = vsub.f32 %v10550_v54, %v6564_v17  ;;  %v10553_v19 = vld [vmem:[#allocation39_spill] sm:$0xff] }
 0x3dd   : > { %10543 = vst [vmem:[#allocation35_spill] sm:$0xff] %v7315_v22  ;;  %v7320_v23 = vpop.eup %4574  ;;  %4594 = vpow2.f32 %v2779_v33  ;;  %v2787_v63 = vmul.f32 1.442695, %v10548_v5  ;;  %v10554_v26 = vsub.f32 %v10553_v19, %v6568_v30  ;;  %v10556_v33 = vld [vmem:[#allocation38_spill] sm:$0xff] }
 0x3de   : > { %10546 = vst [vmem:[#allocation34_spill] sm:$0xff] %v7320_v23  ;;  %v7325_v27 = vpop.eup %4576  ;;  %4596 = vpow2.f32 %v2781_v28  ;;  %v2789_v53 = vmul.f32 1.442695, %v10551_v24  ;;  %v10557_v45 = vsub.f32 %v10556_v33, %v6572_v58  ;;  %v10559_v28 = vld [vmem:[#allocation40_spill] sm:$0xff] }
 0x3df   : > { %10549 = vst [vmem:[#allocation36_spill] sm:$0xff] %v7325_v27  ;;  %v7330_v3 = vpop.eup %4578  ;;  %4598 = vpow2.f32 %v2783_v35  ;;  %v2791_v32 = vmul.f32 1.442695, %v10554_v26  ;;  %v10560_v5 = vsub.f32 %v10559_v28, %v6579_v13  ;;  %v10562_v35 = vld [vmem:[#allocation41_spill] sm:$0xff] }
 0x3e0   : > { %10552 = vst [vmem:[#allocation37_spill] sm:$0xff] %v7330_v3  ;;  %v7335_v34 = vpop.eup %4580  ;;  %4600 = vpow2.f32 %v2785_v36  ;;  %v2793_v61 = vmul.f32 1.442695, %v10557_v45  ;;  %v10563_v19 = vsub.f32 %v10562_v35, %v6564_v17  ;;  %v10565_v36 = vld [vmem:[#allocation43_spill] sm:$0xff] }
 0x3e1   : > { %10555 = vst [vmem:[#allocation39_spill] sm:$0xff] %v7335_v34  ;;  %v7340_v48 = vpop.eup %4582  ;;  %4602 = vpow2.f32 %v2787_v63  ;;  %v2795_v54 = vmul.f32 1.442695, %v10560_v5  ;;  %v10566_v33 = vsub.f32 %v10565_v36, %v6568_v30  ;;  %v10568_v63 = vld [vmem:[#allocation42_spill] sm:$0xff] }
 0x3e2   : > { %10558 = vst [vmem:[#allocation38_spill] sm:$0xff] %v7340_v48  ;;  %v7345_v24 = vpop.eup %4584  ;;  %4604 = vpow2.f32 %v2789_v53  ;;  %v2797_v26 = vmul.f32 1.442695, %v10563_v19  ;;  %v10569_v28 = vsub.f32 %v10568_v63, %v6572_v58  ;;  %v10571_v53 = vld [vmem:[#allocation44_spill] sm:$0xff] }
 0x3e3   : > { %10561 = vst [vmem:[#allocation40_spill] sm:$0xff] %v7345_v24  ;;  %v7350_v3 = vpop.eup %4586  ;;  %4606 = vpow2.f32 %v2791_v32  ;;  %v2799_v45 = vmul.f32 1.442695, %v10566_v33  ;;  %v10572_v35 = vsub.f32 %v10571_v53, %v6579_v13  ;;  %v10574_v32 = vld [vmem:[#allocation45_spill] sm:$0xff] }
 0x3e4   : > { %10564 = vst [vmem:[#allocation41_spill] sm:$0xff] %v7350_v3  ;;  %v7355_v48 = vpop.eup %4588  ;;  %4608 = vpow2.f32 %v2793_v61  ;;  %v2801_v5 = vmul.f32 1.442695, %v10569_v28  ;;  %v10575_v36 = vsub.f32 %v10574_v32, %v6564_v17  ;;  %v10577_v61 = vld [vmem:[#allocation47_spill] sm:$0xff] }
 0x3e5   : > { %10567 = vst [vmem:[#allocation43_spill] sm:$0xff] %v7355_v48  ;;  %v7360_v24 = vpop.eup %4590  ;;  %4610 = vpow2.f32 %v2795_v54  ;;  %v2803_v19 = vmul.f32 1.442695, %v10572_v35  ;;  %v10578_v63 = vsub.f32 %v10577_v61, %v6568_v30  ;;  %v10580_v54 = vld [vmem:[#allocation46_spill] sm:$0xff] }
 0x3e6   : > { %10570 = vst [vmem:[#allocation42_spill] sm:$0xff] %v7360_v24  ;;  %v7365_v3 = vpop.eup %4592  ;;  %4612 = vpow2.f32 %v2797_v26  ;;  %v2805_v33 = vmul.f32 1.442695, %v10575_v36  ;;  %v10581_v53 = vsub.f32 %v10580_v54, %v6572_v58  ;;  %v10583_v26 = vld [vmem:[#allocation48_spill] sm:$0xff] }
 0x3e7   : > { %10573 = vst [vmem:[#allocation44_spill] sm:$0xff] %v7365_v3  ;;  %v7370_v27 = vpop.eup %4594  ;;  %4614 = vpow2.f32 %v2799_v45  ;;  %v2807_v28 = vmul.f32 1.442695, %v10578_v63  ;;  %v10584_v32 = vsub.f32 %v10583_v26, %v6579_v13  ;;  %v10586_v45 = vld [vmem:[#allocation49_spill] sm:$0xff] }
 0x3e8   : > { %10576 = vst [vmem:[#allocation45_spill] sm:$0xff] %v7370_v27  ;;  %v7375_v24 = vpop.eup %4596  ;;  %4616 = vpow2.f32 %v2801_v5  ;;  %v2809_v35 = vmul.f32 1.442695, %v10581_v53  ;;  %v10587_v61 = vsub.f32 %v10586_v45, %v6564_v17  ;;  %v10589_v5 = vld [vmem:[#allocation51_spill] sm:$0xff] }
 0x3e9   : > { %10579 = vst [vmem:[#allocation47_spill] sm:$0xff] %v7375_v24  ;;  %v7380_v3 = vpop.eup %4598  ;;  %4618 = vpow2.f32 %v2803_v19  ;;  %v2811_v36 = vmul.f32 1.442695, %v10584_v32  ;;  %v10590_v54 = vsub.f32 %v10589_v5, %v6568_v30  ;;  %v10592_v19 = vld [vmem:[#allocation50_spill] sm:$0xff] }
 0x3ea   : > { %10582 = vst [vmem:[#allocation46_spill] sm:$0xff] %v7380_v3  ;;  %v7385_v27 = vpop.eup %4600  ;;  %4620 = vpow2.f32 %v2805_v33  ;;  %v2813_v63 = vmul.f32 1.442695, %v10587_v61  ;;  %v10593_v26 = vsub.f32 %v10592_v19, %v6572_v58  ;;  %v10595_v33 = vld [vmem:[#allocation52_spill] sm:$0xff] }
 0x3eb   : > { %10585 = vst [vmem:[#allocation48_spill] sm:$0xff] %v7385_v27  ;;  %v7390_v23 = vpop.eup %4602  ;;  %4622 = vpow2.f32 %v2807_v28  ;;  %v2815_v53 = vmul.f32 1.442695, %v10590_v54  ;;  %v10596_v45 = vsub.f32 %v10595_v33, %v6579_v13  ;;  %v10598_v28 = vld [vmem:[#allocation53_spill] sm:$0xff] }
 0x3ec   : > { %10588 = vst [vmem:[#allocation49_spill] sm:$0xff] %v7390_v23  ;;  %v7395_v3 = vpop.eup %4604  ;;  %4624 = vpow2.f32 %v2809_v35  ;;  %v2817_v32 = vmul.f32 1.442695, %v10593_v26  ;;  %v10599_v5 = vsub.f32 %v10598_v28, %v6564_v17  ;;  %v10601_v35 = vld [vmem:[#allocation55_spill] sm:$0xff] }
 0x3ed   : > { %10591 = vst [vmem:[#allocation51_spill] sm:$0xff] %v7395_v3  ;;  %v7400_v27 = vpop.eup %4606  ;;  %4626 = vpow2.f32 %v2811_v36  ;;  %v2819_v61 = vmul.f32 1.442695, %v10596_v45  ;;  %v10602_v19 = vsub.f32 %v10601_v35, %v6568_v30  ;;  %v10604_v36 = vld [vmem:[#allocation54_spill] sm:$0xff] }
 0x3ee   : > { %10594 = vst [vmem:[#allocation50_spill] sm:$0xff] %v7400_v27  ;;  %v7405_v23 = vpop.eup %4608  ;;  %4628 = vpow2.f32 %v2813_v63  ;;  %v2821_v54 = vmul.f32 1.442695, %v10599_v5  ;;  %v10605_v33 = vsub.f32 %v10604_v36, %v6572_v58  ;;  %v10607_v63 = vld [vmem:[#allocation56_spill] sm:$0xff] }
 0x3ef   : > { %10597 = vst [vmem:[#allocation52_spill] sm:$0xff] %v7405_v23  ;;  %v7410_v16 = vpop.eup %4610  ;;  %4630 = vpow2.f32 %v2815_v53  ;;  %v2823_v26 = vmul.f32 1.442695, %v10602_v19  ;;  %v10608_v28 = vsub.f32 %v10607_v63, %v6579_v13  ;;  %v10610_v53 = vld [vmem:[#allocation57_spill] sm:$0xff] }
 0x3f0   : > { %10600 = vst [vmem:[#allocation53_spill] sm:$0xff] %v7410_v16  ;;  %v7415_v27 = vpop.eup %4612  ;;  %4632 = vpow2.f32 %v2817_v32  ;;  %v2825_v45 = vmul.f32 1.442695, %v10605_v33  ;;  %v10611_v35 = vsub.f32 %v10610_v53, %v6564_v17  ;;  %v10613_v32 = vld [vmem:[#allocation59_spill] sm:$0xff] }
 0x3f1   : > { %10603 = vst [vmem:[#allocation55_spill] sm:$0xff] %v7415_v27  ;;  %v7420_v23 = vpop.eup %4614  ;;  %4634 = vpow2.f32 %v2819_v61  ;;  %v2827_v5 = vmul.f32 1.442695, %v10608_v28  ;;  %v10614_v36 = vsub.f32 %v10613_v32, %v6568_v30  ;;  %v10616_v61 = vld [vmem:[#allocation58_spill] sm:$0xff] }
 0x3f2   : > { %10606 = vst [vmem:[#allocation54_spill] sm:$0xff] %v7420_v23  ;;  %v7425_v16 = vpop.eup %4616  ;;  %4636 = vpow2.f32 %v2821_v54  ;;  %v2829_v19 = vmul.f32 1.442695, %v10611_v35  ;;  %v10617_v63 = vsub.f32 %v10616_v61, %v6572_v58  ;;  %v10619_v54 = vld [vmem:[#allocation60_spill] sm:$0xff] }
 0x3f3   : > { %10609 = vst [vmem:[#allocation56_spill] sm:$0xff] %v7425_v16  ;;  %v7430_v27 = vpop.eup %4618  ;;  %4638 = vpow2.f32 %v2823_v26  ;;  %v2831_v33 = vmul.f32 1.442695, %v10614_v36  ;;  %v10620_v53 = vsub.f32 %v10619_v54, %v6579_v13  ;;  %v10622_v26 = vld [vmem:[#allocation61_spill] sm:$0xff] }
 0x3f4   : > { %10612 = vst [vmem:[#allocation57_spill] sm:$0xff] %v7430_v27  ;;  %v7435_v23 = vpop.eup %4620  ;;  %4640 = vpow2.f32 %v2825_v45  ;;  %v2833_v28 = vmul.f32 1.442695, %v10617_v63  ;;  %v10623_v32 = vsub.f32 %v10622_v26, %v6564_v17  ;;  %v10625_v45 = vld [vmem:[#allocation63_spill] sm:$0xff] }
 0x3f5   : > { %10615 = vst [vmem:[#allocation59_spill] sm:$0xff] %v7435_v23  ;;  %v7440_v16 = vpop.eup %4622  ;;  %4642 = vpow2.f32 %v2827_v5  ;;  %v2835_v35 = vmul.f32 1.442695, %v10620_v53  ;;  %v10626_v61 = vsub.f32 %v10625_v45, %v6568_v30  ;;  %v10628_v5 = vld [vmem:[#allocation62_spill] sm:$0xff] }
 0x3f6   : > { %10618 = vst [vmem:[#allocation58_spill] sm:$0xff] %v7440_v16  ;;  %v7445_v27 = vpop.eup %4624  ;;  %4644 = vpow2.f32 %v2829_v19  ;;  %v2837_v36 = vmul.f32 1.442695, %v10623_v32  ;;  %v10629_v54 = vsub.f32 %v10628_v5, %v6572_v58  ;;  %v10631_v19 = vld [vmem:[#allocation64_spill] sm:$0xff] }
 0x3f7   : > { %10621 = vst [vmem:[#allocation60_spill] sm:$0xff] %v7445_v27  ;;  %v7450_v23 = vpop.eup %4626  ;;  %4646 = vpow2.f32 %v2831_v33  ;;  %v2839_v63 = vmul.f32 1.442695, %v10626_v61  ;;  %v10632_v26 = vsub.f32 %v10631_v19, %v6579_v13  ;;  %v10634_v33 = vld [vmem:[#allocation65_spill] sm:$0xff] }
 0x3f8   : > { %10624 = vst [vmem:[#allocation61_spill] sm:$0xff] %v7450_v23  ;;  %v7455_v16 = vpop.eup %4628  ;;  %4648 = vpow2.f32 %v2833_v28  ;;  %v2841_v53 = vmul.f32 1.442695, %v10629_v54  ;;  %v10635_v45 = vsub.f32 %v10634_v33, %v6564_v17  ;;  %v10637_v28 = vld [vmem:[#allocation67_spill] sm:$0xff]  ;;  %v10644_v33 = vld [vmem:[#allocation69_spill] sm:$0xff] }
 0x3f9   : > { %10627 = vst [vmem:[#allocation63_spill] sm:$0xff] %v7455_v16  ;;  %v7460_v27 = vpop.eup %4630  ;;  %4650 = vpow2.f32 %v2835_v35  ;;  %v2843_v32 = vmul.f32 1.442695, %v10632_v26  ;;  %v10638_v5 = vsub.f32 %v10637_v28, %v6568_v30  ;;  %v10640_v35 = vld [vmem:[#allocation66_spill] sm:$0xff]  ;;  %v10647_v28 = vld [vmem:[#allocation71_spill] sm:$0xff] }
 0x3fa   : > { %10630 = vst [vmem:[#allocation62_spill] sm:$0xff] %v7460_v27  ;;  %v7465_v23 = vpop.eup %4632  ;;  %4652 = vpow2.f32 %v2837_v36  ;;  %v2845_v61 = vmul.f32 1.442695, %v10635_v45  ;;  %v10641_v19 = vsub.f32 %v10640_v35, %v6572_v58  ;;  %v10645_v45 = vsub.f32 %v10644_v33, %v6564_v17  ;;  %v10654_v33 = vld [vmem:[#allocation73_spill] sm:$0xff] }
 0x3fb   : > { %10633 = vst [vmem:[#allocation64_spill] sm:$0xff] %v7465_v23  ;;  %v7470_v16 = vpop.eup %4634  ;;  %4654 = vpow2.f32 %v2839_v63  ;;  %v2847_v54 = vmul.f32 1.442695, %v10638_v5  ;;  %v10642_v23 = vld [vmem:[#allocation68_spill] sm:$0xff]  ;;  %v10648_v5 = vsub.f32 %v10647_v28, %v6568_v30 }
 0x3fc   : > { %10636 = vst [vmem:[#allocation65_spill] sm:$0xff] %v7470_v16  ;;  %v7475_v27 = vpop.eup %4636  ;;  %4656 = vpow2.f32 %v2841_v53  ;;  %v2849_v26 = vmul.f32 1.442695, %v10641_v19  ;;  %v10643_v36 = vsub.f32 %v10642_v23, %v6579_v13  ;;  %v2853_v16 = vmul.f32 1.442695, %v10645_v45  ;;  %v10649_v53 = vld [vmem:[#allocation70_spill] sm:$0xff] }
 0x3fd   : > { %10639 = vst [vmem:[#allocation67_spill] sm:$0xff] %v7475_v27  ;;  %v7486_v63 = vpop.eup %4638  ;;  %4658 = vpow2.f32 %v2843_v32  ;;  %v2855_v27 = vmul.f32 1.442695, %v10648_v5  ;;  %v10650_v57 = vsub.f32 %v10649_v53, %v6572_v58  ;;  %v10651_v19 = vld [vmem:[#allocation72_spill] sm:$0xff]  ;;  %v10655_v45 = vsub.f32 %v10654_v33, %v6564_v17  ;;  %v10656_v32 = vld [vmem:[#allocation75_spill] sm:$0xff]  ;;  %v10658_v5 = vld [vmem:[#allocation74_spill] sm:$0xff] }
 0x3fe   : > { %v2851_v31 = vmul.f32 1.442695, %v10643_v36  ;;  %10646 = vst [vmem:[#allocation66_spill] sm:$0xff] %v7486_v63  ;;  %v10652_v3 = vsub.f32 %v10651_v19, %v6579_v13  ;;  %v7497_v36 = vpop.eup %4640  ;;  %4660 = vpow2.f32 %v2845_v61  ;;  %v10657_v18 = vsub.f32 %v10656_v32, %v6568_v30  ;;  %v10661_v19 = vld [vmem:[#allocation76_spill] sm:$0xff]  ;;  %v10663_v61 = vld [vmem:[#allocation77_spill] sm:$0xff] }
 0x3ff   : > { %v2857_v35 = vmul.f32 1.442695, %v10650_v57  ;;  %10653 = vst [vmem:[#allocation68_spill] sm:$0xff] %v7497_v36  ;;  %v2861_v63 = vmul.f32 1.442695, %v10655_v45  ;;  %v10659_v14 = vsub.f32 %v10658_v5, %v6572_v58  ;;  %v7508_v57 = vpop.eup %4642  ;;  %4662 = vpow2.f32 %v2847_v54  ;;  %v10665_v45 = vld [vmem:[#allocation79_spill] sm:$0xff] }
 0x400   : > { %v2859_v23 = vmul.f32 1.442695, %v10652_v3  ;;  %v2863_v28 = vmul.f32 1.442695, %v10657_v18  ;;  %10660 = vst [vmem:[#allocation69_spill] sm:$0xff] %v7508_v57  ;;  %v10662_v3 = vsub.f32 %v10661_v19, %v6579_v13  ;;  %v10664_v11 = vsub.f32 %v10663_v61, %v6564_v17  ;;  %v7519_v18 = vpop.eup %4644  ;;  %v10668_v5 = vld [vmem:[#allocation78_spill] sm:$0xff] }
 0x401   : > { %v2865_v53 = vmul.f32 1.442695, %v10659_v14  ;;  %v10666_v24 = vsub.f32 %v10665_v45, %v6568_v30  ;;  %10667 = vst [vmem:[#allocation71_spill] sm:$0xff] %v7519_v18  ;;  %4664 = vpow2.f32 %v2849_v26  ;;  %v10669_v14 = vsub.f32 %v10668_v5, %v6572_v58  ;;  %v10670_v54 = vld [vmem:[#allocation80_spill] sm:$0xff]  ;;  %v10677_v18 = vld [vmem:[#allocation82_spill] sm:$0xff] }
 0x402   : > { %v2867_v36 = vmul.f32 1.442695, %v10662_v3  ;;  %v2869_v33 = vmul.f32 1.442695, %v10664_v11  ;;  %v10671_v10 = vsub.f32 %v10670_v54, %v6579_v13  ;;  %v10672_v3 = vld [vmem:[#allocation81_spill] sm:$0xff]  ;;  %v7532_v11 = vpop.eup %4646  ;;  %4666 = vpow2.f32 %v2851_v31  ;;  %v10679_v54 = vld [vmem:[#allocation84_spill] sm:$0xff] }
 0x403   : > { %v2871_v32 = vmul.f32 1.442695, %v10666_v24  ;;  %v2873_v57 = vmul.f32 1.442695, %v10669_v14  ;;  %v10673_v6 = vsub.f32 %v10672_v3, %v6564_v17  ;;  %10674 = vst [vmem:[#allocation70_spill] sm:$0xff] %v7532_v11  ;;  %v10675_v24 = vld [vmem:[#allocation83_spill] sm:$0xff]  ;;  %v10678_v5 = vsub.f32 %v10677_v18, %v6572_v58 }
 0x404   : > { %v2875_v19 = vmul.f32 1.442695, %v10671_v10  ;;  %v10676_v45 = vsub.f32 %v10675_v24, %v6568_v30  ;;  %v10680_v10 = vsub.f32 %v10679_v54, %v6579_v13  ;;  %4668 = vpow2.f32 %v2853_v16  ;;  %v10682_v3 = vld [vmem:[#allocation85_spill] sm:$0xff]  ;;  %v10684_v24 = vld [vmem:[#allocation87_spill] sm:$0xff]  ;;  %v10686_v18 = vld [vmem:[#allocation86_spill] sm:$0xff] }
 0x405   : > { %v7530_v61 = vmul.f32 1.442695, %v10673_v6  ;;  %v7542_v14 = vmul.f32 1.442695, %v10678_v5  ;;  %v7549_v6 = vpop.eup %4648  ;;  %v10683_v31 = vsub.f32 %v10682_v3, %v6564_v17  ;;  %v10687_v5 = vsub.f32 %v10686_v18, %v6572_v58  ;;  %v10691_v3 = vld [vmem:[#allocation89_spill] sm:$0xff] }
 0x406   : > { %v7537_v26 = vmul.f32 1.442695, %v10676_v45  ;;  %v7547_v2 = vmul.f32 1.442695, %v10680_v10  ;;  %10681 = vst [vmem:[#allocation72_spill] sm:$0xff] %v7549_v6  ;;  %v10685_v45 = vsub.f32 %v10684_v24, %v6568_v30  ;;  %v7566_v54 = vpop.eup %4650  ;;  %4670 = vpow2.f32 %v2855_v27  ;;  %v10689_v10 = vld [vmem:[#allocation88_spill] sm:$0xff] }
 0x407   : > { %v7554_v11 = vmul.f32 1.442695, %v10683_v31  ;;  %v7564_v1 = vmul.f32 1.442695, %v10687_v5  ;;  %10688 = vst [vmem:[#allocation73_spill] sm:$0xff] %v7566_v54  ;;  %v10690_v16 = vsub.f32 %v10689_v10, %v6579_v13  ;;  %v10692_v31 = vsub.f32 %v10691_v3, %v6564_v17  ;;  %v10693_v24 = vld [vmem:[#allocation91_spill] sm:$0xff]  ;;  %v7583_v18 = vpop.eup %4652 }
 0x408   : > { %v7559_v48 = vmul.f32 1.442695, %v10685_v45  ;;  %v10694_v45 = vsub.f32 %v10693_v24, %v6568_v30  ;;  %10695 = vst [vmem:[#allocation75_spill] sm:$0xff] %v7583_v18  ;;  %4672 = vpow2.f32 %v2857_v35  ;;  %v10696_v5 = vld [vmem:[#allocation90_spill] sm:$0xff]  ;;  %v10698_v10 = vld [vmem:[#allocation92_spill] sm:$0xff]  ;;  %v10700_v3 = vld [vmem:[#allocation93_spill] sm:$0xff]  ;;  %v7600_v24 = vpop.eup %4654 }
 0x409   : > { %v7571_v6 = vmul.f32 1.442695, %v10690_v16  ;;  %v7576_v56 = vmul.f32 1.442695, %v10692_v31  ;;  %v10697_v27 = vsub.f32 %v10696_v5, %v6572_v58  ;;  %v10699_v16 = vsub.f32 %v10698_v10, %v6579_v13  ;;  %10702 = vst [vmem:[#allocation74_spill] sm:$0xff] %v7600_v24  ;;  %v10705_v5 = vld [vmem:[#allocation94_spill] sm:$0xff] }
 0x40a   : > { %v7581_v52 = vmul.f32 1.442695, %v10694_v45  ;;  %v10701_v31 = vsub.f32 %v10700_v3, %v6564_v17  ;;  %4674 = vpow2.f32 %v2859_v23  ;;  %v10703_v45 = vld [vmem:[#allocation95_spill] sm:$0xff]  ;;  %v10707_v10 = vld [vmem:[#allocation96_spill] sm:$0xff]  ;;  %v7617_v3 = vpop.eup %4656 }
 0x40b   : > { %v7588_v54 = vmul.f32 1.442695, %v10697_v27  ;;  %v7593_v34 = vmul.f32 1.442695, %v10699_v16  ;;  %v10704_v35 = vsub.f32 %v10703_v45, %v6568_v30  ;;  %v10706_v27 = vsub.f32 %v10705_v5, %v6572_v58  ;;  %10709 = vst [vmem:[#allocation76_spill] sm:$0xff] %v7617_v3  ;;  %v10712_v45 = vld [vmem:[#allocation99_spill] sm:$0xff] }
 0x40c   : > { %v7598_v51 = vmul.f32 1.442695, %v10701_v31  ;;  %v10708_v16 = vsub.f32 %v10707_v10, %v6579_v13  ;;  %4676 = vpow2.f32 %v2861_v63  ;;  %v10710_v31 = vld [vmem:[#allocation97_spill] sm:$0xff]  ;;  %v10714_v5 = vld [vmem:[#allocation98_spill] sm:$0xff]  ;;  %v7634_v10 = vpop.eup %4658 }
 0x40d   : > { %v7605_v18 = vmul.f32 1.442695, %v10704_v35  ;;  %v7610_v47 = vmul.f32 1.442695, %v10706_v27  ;;  %v10711_v23 = vsub.f32 %v10710_v31, %v6564_v17  ;;  %v10713_v35 = vsub.f32 %v10712_v45, %v6568_v30  ;;  %10716 = vst [vmem:[#allocation77_spill] sm:$0xff] %v7634_v10  ;;  %v10719_v31 = vld [vmem:[#allocation101_spill] sm:$0xff] }
 0x40e   : > { %v7615_v43 = vmul.f32 1.442695, %v10708_v16  ;;  %v10715_v27 = vsub.f32 %v10714_v5, %v6572_v58  ;;  %4678 = vpow2.f32 %v2863_v28  ;;  %v10717_v16 = vld [vmem:[#allocation100_spill] sm:$0xff]  ;;  %v10721_v45 = vld [vmem:[#allocation103_spill] sm:$0xff]  ;;  %v7651_v5 = vpop.eup %4660 }
 0x40f   : > { %v7622_v24 = vmul.f32 1.442695, %v10711_v23  ;;  %v7627_v22 = vmul.f32 1.442695, %v10713_v35  ;;  %v10718_v63 = vsub.f32 %v10717_v16, %v6579_v13  ;;  %v10720_v23 = vsub.f32 %v10719_v31, %v6564_v17  ;;  %10723 = vst [vmem:[#allocation79_spill] sm:$0xff] %v7651_v5  ;;  %v10726_v16 = vld [vmem:[#allocation104_spill] sm:$0xff] }
 0x410   : > { %v7632_v42 = vmul.f32 1.442695, %v10715_v27  ;;  %v10722_v35 = vsub.f32 %v10721_v45, %v6568_v30  ;;  %4680 = vpow2.f32 %v2865_v53  ;;  %v10724_v27 = vld [vmem:[#allocation102_spill] sm:$0xff]  ;;  %v10728_v31 = vld [vmem:[#allocation105_spill] sm:$0xff]  ;;  %v7668_v45 = vpop.eup %4662 }
 0x411   : > { %v7639_v3 = vmul.f32 1.442695, %v10718_v63  ;;  %v7644_v41 = vmul.f32 1.442695, %v10720_v23  ;;  %v10725_v28 = vsub.f32 %v10724_v27, %v6572_v58  ;;  %v10727_v63 = vsub.f32 %v10726_v16, %v6579_v13  ;;  %10730 = vst [vmem:[#allocation78_spill] sm:$0xff] %v7668_v45  ;;  %v10733_v27 = vld [vmem:[#allocation106_spill] sm:$0xff] }
 0x412   : > { %v7649_v40 = vmul.f32 1.442695, %v10722_v35  ;;  %v10729_v23 = vsub.f32 %v10728_v31, %v6564_v17  ;;  %4682 = vpow2.f32 %v2867_v36  ;;  %v10731_v35 = vld [vmem:[#allocation107_spill] sm:$0xff]  ;;  %v10735_v16 = vld [vmem:[#allocation108_spill] sm:$0xff]  ;;  %v7685_v31 = vpop.eup %4664 }
 0x413   : > { %v7656_v10 = vmul.f32 1.442695, %v10725_v28  ;;  %v7661_v15 = vmul.f32 1.442695, %v10727_v63  ;;  %v10732_v53 = vsub.f32 %v10731_v35, %v6568_v30  ;;  %v10734_v28 = vsub.f32 %v10733_v27, %v6572_v58  ;;  %10737 = vst [vmem:[#allocation80_spill] sm:$0xff] %v7685_v31  ;;  %v10740_v35 = vld [vmem:[#allocation111_spill] sm:$0xff] }
 0x414   : > { %v7666_v12 = vmul.f32 1.442695, %v10729_v23  ;;  %v10736_v63 = vsub.f32 %v10735_v16, %v6579_v13  ;;  %4684 = vpow2.f32 %v2869_v33  ;;  %v10738_v23 = vld [vmem:[#allocation109_spill] sm:$0xff]  ;;  %v10742_v27 = vld [vmem:[#allocation110_spill] sm:$0xff]  ;;  %v7702_v16 = vpop.eup %4666 }
 0x415   : > { %v7673_v5 = vmul.f32 1.442695, %v10732_v53  ;;  %v7678_v21 = vmul.f32 1.442695, %v10734_v28  ;;  %v10739_v36 = vsub.f32 %v10738_v23, %v6564_v17  ;;  %v10741_v53 = vsub.f32 %v10740_v35, %v6568_v30  ;;  %10744 = vst [vmem:[#allocation81_spill] sm:$0xff] %v7702_v16  ;;  %v10747_v23 = vld [vmem:[#allocation113_spill] sm:$0xff] }
 0x416   : > { %v7683_v37 = vmul.f32 1.442695, %v10736_v63  ;;  %v10743_v28 = vsub.f32 %v10742_v27, %v6572_v58  ;;  %4686 = vpow2.f32 %v2871_v32  ;;  %v10745_v63 = vld [vmem:[#allocation112_spill] sm:$0xff]  ;;  %v10749_v35 = vld [vmem:[#allocation115_spill] sm:$0xff]  ;;  %v7719_v27 = vpop.eup %4668 }
 0x417   : > { %v7690_v45 = vmul.f32 1.442695, %v10739_v36  ;;  %v7695_v7 = vmul.f32 1.442695, %v10741_v53  ;;  %v10746_v33 = vsub.f32 %v10745_v63, %v6579_v13  ;;  %v10748_v36 = vsub.f32 %v10747_v23, %v6564_v17  ;;  %10751 = vst [vmem:[#allocation83_spill] sm:$0xff] %v7719_v27  ;;  %v10754_v63 = vld [vmem:[#allocation116_spill] sm:$0xff] }
 0x418   : > { %v7700_v25 = vmul.f32 1.442695, %v10743_v28  ;;  %v10750_v53 = vsub.f32 %v10749_v35, %v6568_v30  ;;  %4688 = vpow2.f32 %v2873_v57  ;;  %v10752_v28 = vld [vmem:[#allocation114_spill] sm:$0xff]  ;;  %v10756_v23 = vld [vmem:[#allocation117_spill] sm:$0xff]  ;;  %v7736_v35 = vpop.eup %4670 }
 0x419   : > { %v7707_v31 = vmul.f32 1.442695, %v10746_v33  ;;  %v7712_v39 = vmul.f32 1.442695, %v10748_v36  ;;  %v10753_v32 = vsub.f32 %v10752_v28, %v6572_v58  ;;  %v10755_v33 = vsub.f32 %v10754_v63, %v6579_v13  ;;  %10758 = vst [vmem:[#allocation82_spill] sm:$0xff] %v7736_v35  ;;  %v10761_v28 = vld [vmem:[#allocation118_spill] sm:$0xff] }
 0x41a   : > { %v7717_v8 = vmul.f32 1.442695, %v10750_v53  ;;  %v10757_v36 = vsub.f32 %v10756_v23, %v6564_v17  ;;  %4690 = vpow2.f32 %v2875_v19  ;;  %v10759_v53 = vld [vmem:[#allocation119_spill] sm:$0xff]  ;;  %v10763_v63 = vld [vmem:[#allocation120_spill] sm:$0xff]  ;;  %v7753_v23 = vpop.eup %4672  ;;  %v10766_v19 = vld [vmem:[#allocation121_spill] sm:$0xff] }
 0x41b   : > { %v7724_v16 = vmul.f32 1.442695, %v10753_v32  ;;  %v7729_v20 = vmul.f32 1.442695, %v10755_v33  ;;  %v10760_v57 = vsub.f32 %v10759_v53, %v6568_v30  ;;  %v10762_v32 = vsub.f32 %v10761_v28, %v6572_v58  ;;  %10765 = vst [vmem:[#allocation84_spill] sm:$0xff] %v7753_v23 }
 0x41c   : > { %v7734_v50 = vmul.f32 1.442695, %v10757_v36  ;;  %v10764_v33 = vsub.f32 %v10763_v63, %v6579_v13  ;;  %4692 = vpow2.f32 %v7530_v61  ;;  %v10767_v36 = vsub.f32 %v10766_v19, %v6564_v17  ;;  %v10774_v61 = vld [vmem:[#allocation124_spill] sm:$0xff] }
 0x41d   : > { %v7741_v27 = vmul.f32 1.442695, %v10760_v57  ;;  %v7746_v38 = vmul.f32 1.442695, %v10762_v32  ;;  %v10768_v57 = vld [vmem:[#allocation123_spill] sm:$0xff]  ;;  %v10771_v32 = vld [vmem:[#allocation122_spill] sm:$0xff]  ;;  %4694 = vpow2.f32 %v7537_v26  ;;  %v10775_v23 = vsub.f32 %v10774_v61, %v6579_v13 }
 0x41e   : > { %v7751_v60 = vmul.f32 1.442695, %v10764_v33  ;;  %v7759_v53 = vmul.f32 1.442695, %v10767_v36  ;;  %v10769_v35 = vsub.f32 %v10768_v57, %v6568_v30  ;;  %v10772_v4 = vsub.f32 %v10771_v32, %v6572_v58  ;;  %v7771_v33 = vpop.eup %4674  ;;  %v10777_v36 = vld [vmem:[#allocation126_spill] sm:$0xff]  ;;  %v10783_v26 = vld [vmem:[#allocation127_spill] sm:$0xff] }
 0x41f   : > { %10773 = vst [vmem:[#allocation87_spill] sm:$0xff] %v7771_v33  ;;  %v7777_v19 = vmul.f32 1.442695, %v10775_v23  ;;  %v10778_v9 = vsub.f32 %v10777_v36, %v6564_v17  ;;  %4696 = vpow2.f32 %v7542_v14  ;;  %v10784_v33 = vsub.f32 %v10783_v26, %v6572_v58  ;;  %v10786_v23 = vld [vmem:[#allocation129_spill] sm:$0xff]  ;;  %v10792_v14 = vld [vmem:[#allocation132_spill] sm:$0xff] }
 0x420   : > { %v7764_v28 = vmul.f32 1.442695, %v10769_v35  ;;  %v7769_v63 = vmul.f32 1.442695, %v10772_v4  ;;  %v10780_v35 = vld [vmem:[#allocation128_spill] sm:$0xff]  ;;  %v7789_v4 = vpop.eup %4676  ;;  %4698 = vpow2.f32 %v7547_v2  ;;  %v10801_v2 = vld [vmem:[#allocation134_spill] sm:$0xff] }
 0x421   : > { %10776 = vst [vmem:[#allocation86_spill] sm:$0xff] %v7777_v19  ;;  %v7782_v57 = vmul.f32 1.442695, %v10778_v9  ;;  %10782 = vst [vmem:[#allocation89_spill] sm:$0xff] %v7789_v4  ;;  %v7795_v61 = vmul.f32 1.442695, %v10784_v33  ;;  %v10787_v19 = vsub.f32 %v10786_v23, %v6579_v13  ;;  %v10793_v4 = vsub.f32 %v10792_v14, %v6568_v30 }
 0x422   : > { %10770 = vst [vmem:[#allocation85_spill] sm:$0xff] %v7764_v28  ;;  %v10781_v28 = vsub.f32 %v10780_v35, %v6568_v30  ;;  %v10789_v9 = vld [vmem:[#allocation130_spill] sm:$0xff]  ;;  %v10795_v33 = vld [vmem:[#allocation131_spill] sm:$0xff]  ;;  %4700 = vpow2.f32 %v7554_v11  ;;  %v10810_v11 = vld [vmem:[#allocation137_spill] sm:$0xff] }
 0x423   : > { %10779 = vst [vmem:[#allocation88_spill] sm:$0xff] %v7782_v57  ;;  %10785 = vst [vmem:[#allocation91_spill] sm:$0xff] %v7795_v61  ;;  %v7800_v36 = vmul.f32 1.442695, %v10787_v19  ;;  %v10790_v57 = vsub.f32 %v10789_v9, %v6564_v17  ;;  %v7813_v26 = vmul.f32 1.442695, %v10793_v4  ;;  %v10796_v61 = vsub.f32 %v10795_v33, %v6572_v58 }
 0x424   : > { %v7787_v32 = vmul.f32 1.442695, %v10781_v28  ;;  %v7807_v28 = vpop.eup %4678  ;;  %v10798_v19 = vld [vmem:[#allocation133_spill] sm:$0xff]  ;;  %v10804_v4 = vld [vmem:[#allocation136_spill] sm:$0xff]  ;;  %4702 = vpow2.f32 %v7559_v48  ;;  %v10819_v48 = vld [vmem:[#allocation139_spill] sm:$0xff] }
 0x425   : > { %10788 = vst [vmem:[#allocation90_spill] sm:$0xff] %v7800_v36  ;;  %v7805_v35 = vmul.f32 1.442695, %v10790_v57  ;;  %10791 = vst [vmem:[#allocation92_spill] sm:$0xff] %v7807_v28  ;;  %v7818_v23 = vmul.f32 1.442695, %v10796_v61  ;;  %v10799_v36 = vsub.f32 %v10798_v19, %v6579_v13  ;;  %v7825_v57 = vpop.eup %4680  ;;  %v10802_v28 = vsub.f32 %v10801_v2, %v6564_v17 }
 0x426   : > { %10794 = vst [vmem:[#allocation93_spill] sm:$0xff] %v7813_v26  ;;  %10800 = vst [vmem:[#allocation94_spill] sm:$0xff] %v7825_v57  ;;  %v10805_v26 = vsub.f32 %v10804_v4, %v6568_v30  ;;  %v10807_v61 = vld [vmem:[#allocation135_spill] sm:$0xff]  ;;  %v10811_v57 = vsub.f32 %v10810_v11, %v6579_v13  ;;  %4704 = vpow2.f32 %v7564_v1  ;;  %v10828_v1 = vld [vmem:[#allocation144_spill] sm:$0xff] }
 0x427   : > { %10797 = vst [vmem:[#allocation95_spill] sm:$0xff] %v7818_v23  ;;  %v7823_v9 = vmul.f32 1.442695, %v10799_v36  ;;  %v7831_v14 = vmul.f32 1.442695, %v10802_v28  ;;  %v10808_v23 = vsub.f32 %v10807_v61, %v6572_v58  ;;  %v7843_v36 = vpop.eup %4682  ;;  %v10813_v28 = vld [vmem:[#allocation138_spill] sm:$0xff]  ;;  %4706 = vpow2.f32 %v7571_v6 }
 0x428   : > { %v7836_v33 = vmul.f32 1.442695, %v10805_v26  ;;  %10809 = vst [vmem:[#allocation99_spill] sm:$0xff] %v7843_v36  ;;  %v7849_v2 = vmul.f32 1.442695, %v10811_v57  ;;  %v10816_v26 = vld [vmem:[#allocation140_spill] sm:$0xff]  ;;  %v10820_v36 = vsub.f32 %v10819_v48, %v6572_v58  ;;  %4708 = vpow2.f32 %v7576_v56 }
 0x429   : > { %10803 = vst [vmem:[#allocation96_spill] sm:$0xff] %v7831_v14  ;;  %v7841_v19 = vmul.f32 1.442695, %v10808_v23  ;;  %v10814_v14 = vsub.f32 %v10813_v28, %v6564_v17  ;;  %v7861_v23 = vpop.eup %4684  ;;  %v10822_v57 = vld [vmem:[#allocation141_spill] sm:$0xff]  ;;  %v10837_v6 = vld [vmem:[#allocation146_spill] sm:$0xff]  ;;  %4710 = vpow2.f32 %v7581_v52  ;;  %v10855_v52 = vld [vmem:[#allocation151_spill] sm:$0xff] }
 0x42a   : > { %10806 = vst [vmem:[#allocation97_spill] sm:$0xff] %v7836_v33  ;;  %10812 = vst [vmem:[#allocation98_spill] sm:$0xff] %v7849_v2  ;;  %v10817_v33 = vsub.f32 %v10816_v26, %v6568_v30  ;;  %v7867_v11 = vmul.f32 1.442695, %v10820_v36  ;;  %v10823_v2 = vsub.f32 %v10822_v57, %v6579_v13  ;;  %v10831_v36 = vld [vmem:[#allocation143_spill] sm:$0xff]  ;;  %v10846_v56 = vld [vmem:[#allocation149_spill] sm:$0xff]  ;;  %4712 = vpow2.f32 %v7588_v54 }
 0x42b   : > { %v7854_v4 = vmul.f32 1.442695, %v10814_v14  ;;  %10818 = vst [vmem:[#allocation101_spill] sm:$0xff] %v7861_v23  ;;  %v10825_v14 = vld [vmem:[#allocation142_spill] sm:$0xff]  ;;  %v10829_v23 = vsub.f32 %v10828_v1, %v6568_v30  ;;  %4714 = vpow2.f32 %v7593_v34  ;;  %v10864_v54 = vld [vmem:[#allocation156_spill] sm:$0xff] }
 0x42c   : > { %v7859_v61 = vmul.f32 1.442695, %v10817_v33  ;;  %10821 = vst [vmem:[#allocation103_spill] sm:$0xff] %v7867_v11  ;;  %v7872_v28 = vmul.f32 1.442695, %v10823_v2  ;;  %v7879_v33 = vpop.eup %4686  ;;  %v10832_v11 = vsub.f32 %v10831_v36, %v6572_v58  ;;  %v10834_v2 = vld [vmem:[#allocation145_spill] sm:$0xff]  ;;  %4716 = vpow2.f32 %v7598_v51 }
 0x42d   : > { %10815 = vst [vmem:[#allocation100_spill] sm:$0xff] %v7854_v4  ;;  %v10826_v4 = vsub.f32 %v10825_v14, %v6564_v17  ;;  %10827 = vst [vmem:[#allocation104_spill] sm:$0xff] %v7879_v33  ;;  %v7885_v48 = vmul.f32 1.442695, %v10829_v23  ;;  %v10838_v33 = vsub.f32 %v10837_v6, %v6564_v17  ;;  %v10840_v23 = vld [vmem:[#allocation148_spill] sm:$0xff]  ;;  %v10873_v34 = vld [vmem:[#allocation158_spill] sm:$0xff]  ;;  %4718 = vpow2.f32 %v7605_v18 }
 0x42e   : > { %10824 = vst [vmem:[#allocation102_spill] sm:$0xff] %v7872_v28  ;;  %v7890_v57 = vmul.f32 1.442695, %v10832_v11  ;;  %v10835_v28 = vsub.f32 %v10834_v2, %v6579_v13  ;;  %v10843_v11 = vld [vmem:[#allocation147_spill] sm:$0xff]  ;;  %v10882_v51 = vld [vmem:[#allocation161_spill] sm:$0xff] }
 0x42f   : > { %v7877_v26 = vmul.f32 1.442695, %v10826_v4  ;;  %10830 = vst [vmem:[#allocation105_spill] sm:$0xff] %v7885_v48  ;;  %v7897_v4 = vpop.eup %4688  ;;  %v7903_v1 = vmul.f32 1.442695, %v10838_v33  ;;  %v10841_v48 = vsub.f32 %v10840_v23, %v6568_v30  ;;  %v10849_v33 = vld [vmem:[#allocation150_spill] sm:$0xff]  ;;  %4720 = vpow2.f32 %v7610_v47 }
 0x430   : > { %10833 = vst [vmem:[#allocation107_spill] sm:$0xff] %v7890_v57  ;;  %v7895_v14 = vmul.f32 1.442695, %v10835_v28  ;;  %10836 = vst [vmem:[#allocation106_spill] sm:$0xff] %v7897_v4  ;;  %v10844_v57 = vsub.f32 %v10843_v11, %v6572_v58  ;;  %v7915_v28 = vpop.eup %4690  ;;  %v10847_v4 = vsub.f32 %v10846_v56, %v6579_v13  ;;  %v10891_v18 = vld [vmem:[#allocation163_spill] sm:$0xff]  ;;  %4722 = vpow2.f32 %v7615_v43  ;;  %v10900_v47 = vld [vmem:[#allocation168_spill] sm:$0xff] }
 0x431   : > { %10839 = vst [vmem:[#allocation108_spill] sm:$0xff] %v7903_v1  ;;  %v7908_v36 = vmul.f32 1.442695, %v10841_v48  ;;  %10845 = vst [vmem:[#allocation111_spill] sm:$0xff] %v7915_v28  ;;  %v10850_v1 = vsub.f32 %v10849_v33, %v6564_v17  ;;  %v10852_v48 = vld [vmem:[#allocation152_spill] sm:$0xff]  ;;  %v10856_v28 = vsub.f32 %v10855_v52, %v6572_v58  ;;  %v10909_v43 = vld [vmem:[#allocation170_spill] sm:$0xff] }
 0x432   : > { %v7913_v2 = vmul.f32 1.442695, %v10844_v57  ;;  %v7921_v6 = vmul.f32 1.442695, %v10847_v4  ;;  %v7933_v57 = vpop.eup %4692  ;;  %v10858_v4 = vld [vmem:[#allocation153_spill] sm:$0xff]  ;;  %4724 = vpow2.f32 %v7622_v24 }
 0x433   : > { %10842 = vst [vmem:[#allocation109_spill] sm:$0xff] %v7908_v36  ;;  %v7926_v23 = vmul.f32 1.442695, %v10850_v1  ;;  %v10853_v36 = vsub.f32 %v10852_v48, %v6568_v30  ;;  %10854 = vst [vmem:[#allocation113_spill] sm:$0xff] %v7933_v57  ;;  %v7939_v56 = vmul.f32 1.442695, %v10856_v28  ;;  %v10865_v57 = vsub.f32 %v10864_v54, %v6568_v30 }
 0x434   : > { %10848 = vst [vmem:[#allocation110_spill] sm:$0xff] %v7921_v6  ;;  %v10859_v6 = vsub.f32 %v10858_v4, %v6579_v13  ;;  %v10861_v1 = vld [vmem:[#allocation154_spill] sm:$0xff]  ;;  %v10867_v28 = vld [vmem:[#allocation155_spill] sm:$0xff]  ;;  %v10918_v24 = vld [vmem:[#allocation173_spill] sm:$0xff] }
 0x435   : > { %10851 = vst [vmem:[#allocation112_spill] sm:$0xff] %v7926_v23  ;;  %v7931_v11 = vmul.f32 1.442695, %v10853_v36  ;;  %10857 = vst [vmem:[#allocation115_spill] sm:$0xff] %v7939_v56  ;;  %v10862_v23 = vsub.f32 %v10861_v1, %v6564_v17  ;;  %v7951_v36 = vpop.eup %4694  ;;  %v7957_v52 = vmul.f32 1.442695, %v10865_v57  ;;  %v10868_v56 = vsub.f32 %v10867_v28, %v6572_v58 }
 0x436   : > { %v7944_v33 = vmul.f32 1.442695, %v10859_v6  ;;  %10863 = vst [vmem:[#allocation116_spill] sm:$0xff] %v7951_v36  ;;  %v10870_v6 = vld [vmem:[#allocation157_spill] sm:$0xff]  ;;  %v10874_v36 = vsub.f32 %v10873_v34, %v6564_v17  ;;  %v10876_v57 = vld [vmem:[#allocation160_spill] sm:$0xff]  ;;  %4726 = vpow2.f32 %v7627_v22  ;;  %v10927_v22 = vld [vmem:[#allocation175_spill] sm:$0xff] }
 0x437   : > { %v7949_v48 = vmul.f32 1.442695, %v10862_v23  ;;  %10866 = vst [vmem:[#allocation117_spill] sm:$0xff] %v7957_v52  ;;  %v7962_v4 = vmul.f32 1.442695, %v10868_v56  ;;  %v7969_v23 = vpop.eup %4696  ;;  %v10877_v52 = vsub.f32 %v10876_v57, %v6568_v30  ;;  %v10879_v56 = vld [vmem:[#allocation159_spill] sm:$0xff]  ;;  %4728 = vpow2.f32 %v7632_v42 }
 0x438   : > { %10860 = vst [vmem:[#allocation114_spill] sm:$0xff] %v7944_v33  ;;  %v10871_v33 = vsub.f32 %v10870_v6, %v6579_v13  ;;  %10872 = vst [vmem:[#allocation118_spill] sm:$0xff] %v7969_v23  ;;  %v7975_v54 = vmul.f32 1.442695, %v10874_v36  ;;  %v10883_v23 = vsub.f32 %v10882_v51, %v6579_v13  ;;  %v10885_v36 = vld [vmem:[#allocation162_spill] sm:$0xff]  ;;  %v10936_v42 = vld [vmem:[#allocation180_spill] sm:$0xff] }
 0x439   : > { %10869 = vst [vmem:[#allocation119_spill] sm:$0xff] %v7962_v4  ;;  %v7980_v28 = vmul.f32 1.442695, %v10877_v52  ;;  %v10880_v4 = vsub.f32 %v10879_v56, %v6572_v58  ;;  %v10888_v52 = vld [vmem:[#allocation164_spill] sm:$0xff] }
 0x43a   : > { %v7967_v1 = vmul.f32 1.442695, %v10871_v33  ;;  %10875 = vst [vmem:[#allocation120_spill] sm:$0xff] %v7975_v54  ;;  %v7987_v33 = vpop.eup %4698  ;;  %v7993_v34 = vmul.f32 1.442695, %v10883_v23  ;;  %v10886_v54 = vsub.f32 %v10885_v36, %v6564_v17  ;;  %v10894_v23 = vld [vmem:[#allocation165_spill] sm:$0xff]  ;;  %4730 = vpow2.f32 %v7639_v3 }
 0x43b   : > { %10878 = vst [vmem:[#allocation121_spill] sm:$0xff] %v7980_v28  ;;  %v7985_v6 = vmul.f32 1.442695, %v10880_v4  ;;  %10881 = vst [vmem:[#allocation123_spill] sm:$0xff] %v7987_v33  ;;  %v10889_v28 = vsub.f32 %v10888_v52, %v6568_v30  ;;  %v8005_v4 = vpop.eup %4700  ;;  %v10892_v33 = vsub.f32 %v10891_v18, %v6572_v58  ;;  %4732 = vpow2.f32 %v7644_v41  ;;  %v10945_v3 = vld [vmem:[#allocation182_spill] sm:$0xff]  ;;  %v10954_v41 = vld [vmem:[#allocation185_spill] sm:$0xff] }
 0x43c   : > { %10884 = vst [vmem:[#allocation122_spill] sm:$0xff] %v7993_v34  ;;  %v7998_v57 = vmul.f32 1.442695, %v10886_v54  ;;  %v10895_v34 = vsub.f32 %v10894_v23, %v6579_v13  ;;  %v10897_v54 = vld [vmem:[#allocation166_spill] sm:$0xff] }
 0x43d   : > { %v8003_v56 = vmul.f32 1.442695, %v10889_v28  ;;  %v8011_v51 = vmul.f32 1.442695, %v10892_v33  ;;  %v8023_v28 = vpop.eup %4702  ;;  %v10903_v33 = vld [vmem:[#allocation167_spill] sm:$0xff]  ;;  %4734 = vpow2.f32 %v7649_v40 }
 0x43e   : > { %10887 = vst [vmem:[#allocation124_spill] sm:$0xff] %v7998_v57  ;;  %v8016_v36 = vmul.f32 1.442695, %v10895_v34  ;;  %v10898_v57 = vsub.f32 %v10897_v54, %v6564_v17  ;;  %10899 = vst [vmem:[#allocation129_spill] sm:$0xff] %v8023_v28  ;;  %v10906_v34 = vld [vmem:[#allocation169_spill] sm:$0xff]  ;;  %v10910_v28 = vsub.f32 %v10909_v43, %v6564_v17  ;;  %v10963_v40 = vld [vmem:[#allocation187_spill] sm:$0xff] }
 0x43f   : > { %10890 = vst [vmem:[#allocation126_spill] sm:$0xff] %v8003_v56  ;;  %10893 = vst [vmem:[#allocation128_spill] sm:$0xff] %v8011_v51  ;;  %v10901_v56 = vsub.f32 %v10900_v47, %v6568_v30  ;;  %v10904_v51 = vsub.f32 %v10903_v33, %v6572_v58 }
 0x440   : > { %10896 = vst [vmem:[#allocation127_spill] sm:$0xff] %v8016_v36  ;;  %v8021_v52 = vmul.f32 1.442695, %v10898_v57  ;;  %v10907_v36 = vsub.f32 %v10906_v34, %v6579_v13  ;;  %v8041_v57 = vpop.eup %4704  ;;  %v8047_v47 = vmul.f32 1.442695, %v10910_v28  ;;  %v10921_v28 = vld [vmem:[#allocation174_spill] sm:$0xff]  ;;  %4736 = vpow2.f32 %v7656_v10 }
 0x441   : > { %v8029_v18 = vmul.f32 1.442695, %v10901_v56  ;;  %v8034_v23 = vmul.f32 1.442695, %v10904_v51  ;;  %10908 = vst [vmem:[#allocation131_spill] sm:$0xff] %v8041_v57  ;;  %v10912_v56 = vld [vmem:[#allocation172_spill] sm:$0xff]  ;;  %v10919_v57 = vsub.f32 %v10918_v24, %v6579_v13 }
 0x442   : > { %v8039_v54 = vmul.f32 1.442695, %v10907_v36  ;;  %10911 = vst [vmem:[#allocation133_spill] sm:$0xff] %v8047_v47  ;;  %v10915_v51 = vld [vmem:[#allocation171_spill] sm:$0xff]  ;;  %v8059_v36 = vpop.eup %4706  ;;  %v10922_v47 = vsub.f32 %v10921_v28, %v6564_v17  ;;  %4738 = vpow2.f32 %v7661_v15  ;;  %v10972_v10 = vld [vmem:[#allocation192_spill] sm:$0xff]  ;;  %v10981_v15 = vld [vmem:[#allocation194_spill] sm:$0xff] }
 0x443   : > { %10902 = vst [vmem:[#allocation130_spill] sm:$0xff] %v8029_v18  ;;  %10905 = vst [vmem:[#allocation132_spill] sm:$0xff] %v8034_v23  ;;  %v10913_v18 = vsub.f32 %v10912_v56, %v6568_v30  ;;  %v10916_v23 = vsub.f32 %v10915_v51, %v6572_v58  ;;  %v8065_v43 = vmul.f32 1.442695, %v10919_v57  ;;  %v10930_v57 = vld [vmem:[#allocation177_spill] sm:$0xff] }
 0x444   : > { %10917 = vst [vmem:[#allocation136_spill] sm:$0xff] %v8059_v36  ;;  %v8070_v56 = vmul.f32 1.442695, %v10922_v47  ;;  %v10928_v36 = vsub.f32 %v10927_v22, %v6572_v58  ;;  %v10933_v47 = vld [vmem:[#allocation178_spill] sm:$0xff] }
 0x445   : > { %v8052_v33 = vmul.f32 1.442695, %v10913_v18  ;;  %v8057_v34 = vmul.f32 1.442695, %v10916_v23  ;;  %10920 = vst [vmem:[#allocation135_spill] sm:$0xff] %v8065_v43  ;;  %v10924_v18 = vld [vmem:[#allocation176_spill] sm:$0xff]  ;;  %v8077_v23 = vpop.eup %4708  ;;  %v10931_v43 = vsub.f32 %v10930_v57, %v6579_v13  ;;  %4740 = vpow2.f32 %v7666_v12 }
 0x446   : > { %10923 = vst [vmem:[#allocation137_spill] sm:$0xff] %v8070_v56  ;;  %v8083_v24 = vmul.f32 1.442695, %v10928_v36  ;;  %v10934_v56 = vsub.f32 %v10933_v47, %v6564_v17  ;;  %v10939_v36 = vld [vmem:[#allocation179_spill] sm:$0xff]  ;;  %v10990_v12 = vld [vmem:[#allocation197_spill] sm:$0xff] }
 0x447   : > { %10914 = vst [vmem:[#allocation134_spill] sm:$0xff] %v8052_v33  ;;  %v10925_v33 = vsub.f32 %v10924_v18, %v6568_v30  ;;  %v8088_v28 = vmul.f32 1.442695, %v10931_v43  ;;  %v10942_v43 = vld [vmem:[#allocation181_spill] sm:$0xff] }
 0x448   : > { %10929 = vst [vmem:[#allocation140_spill] sm:$0xff] %v8083_v24  ;;  %v8093_v18 = vmul.f32 1.442695, %v10934_v56  ;;  %v10940_v24 = vsub.f32 %v10939_v36, %v6572_v58 }
 0x449   : > { %v8075_v51 = vmul.f32 1.442695, %v10925_v33  ;;  %10932 = vst [vmem:[#allocation139_spill] sm:$0xff] %v8088_v28  ;;  %v8095_v33 = vpop.eup %4710  ;;  %v10943_v28 = vsub.f32 %v10942_v43, %v6579_v13  ;;  %4742 = vpow2.f32 %v7673_v5  ;;  %v10999_v5 = vld [vmem:[#allocation199_spill] sm:$0xff] }
 0x44a   : > { %10935 = vst [vmem:[#allocation141_spill] sm:$0xff] %v8093_v18  ;;  %v8106_v57 = vmul.f32 1.442695, %v10940_v24  ;;  %v8113_v56 = vpop.eup %4712  ;;  %v10946_v18 = vsub.f32 %v10945_v3, %v6564_v17  ;;  %v10951_v24 = vld [vmem:[#allocation183_spill] sm:$0xff]  ;;  %4744 = vpow2.f32 %v7678_v21  ;;  %v11008_v21 = vld [vmem:[#allocation204_spill] sm:$0xff] }
 0x44b   : > { %10926 = vst [vmem:[#allocation138_spill] sm:$0xff] %v8075_v51  ;;  %v10937_v51 = vsub.f32 %v10936_v42, %v6568_v30  ;;  %v8111_v47 = vmul.f32 1.442695, %v10943_v28  ;;  %v8131_v28 = vpop.eup %4714  ;;  %4746 = vpow2.f32 %v7683_v37  ;;  %v11017_v37 = vld [vmem:[#allocation206_spill] sm:$0xff] }
 0x44c   : > { %10941 = vst [vmem:[#allocation144_spill] sm:$0xff] %v8106_v57  ;;  %v8119_v42 = vmul.f32 1.442695, %v10946_v18  ;;  %v10952_v57 = vsub.f32 %v10951_v24, %v6572_v58  ;;  %v10957_v18 = vld [vmem:[#allocation186_spill] sm:$0xff] }
 0x44d   : > { %v8101_v22 = vmul.f32 1.442695, %v10937_v51  ;;  %10944 = vst [vmem:[#allocation143_spill] sm:$0xff] %v8111_v47  ;;  %v10948_v51 = vld [vmem:[#allocation184_spill] sm:$0xff]  ;;  %v10955_v47 = vsub.f32 %v10954_v41, %v6579_v13 }
 0x44e   : > { %10947 = vst [vmem:[#allocation145_spill] sm:$0xff] %v8119_v42  ;;  %v8129_v43 = vmul.f32 1.442695, %v10952_v57  ;;  %v10958_v42 = vsub.f32 %v10957_v18, %v6564_v17  ;;  %v8149_v57 = vpop.eup %4716  ;;  %4748 = vpow2.f32 %v7690_v45  ;;  %v11026_v45 = vld [vmem:[#allocation209_spill] sm:$0xff] }
 0x44f   : > { %10938 = vst [vmem:[#allocation142_spill] sm:$0xff] %v8101_v22  ;;  %v10949_v22 = vsub.f32 %v10948_v51, %v6568_v30  ;;  %v8137_v3 = vmul.f32 1.442695, %v10955_v47  ;;  %v10966_v47 = vld [vmem:[#allocation189_spill] sm:$0xff] }
 0x450   : > { %10953 = vst [vmem:[#allocation148_spill] sm:$0xff] %v8129_v43  ;;  %v8142_v51 = vmul.f32 1.442695, %v10958_v42  ;;  %v10964_v43 = vsub.f32 %v10963_v40, %v6572_v58  ;;  %v10969_v42 = vld [vmem:[#allocation190_spill] sm:$0xff] }
 0x451   : > { %v8124_v36 = vmul.f32 1.442695, %v10949_v22  ;;  %10956 = vst [vmem:[#allocation147_spill] sm:$0xff] %v8137_v3  ;;  %v10960_v22 = vld [vmem:[#allocation188_spill] sm:$0xff]  ;;  %v10967_v3 = vsub.f32 %v10966_v47, %v6579_v13 }
 0x452   : > { %10959 = vst [vmem:[#allocation149_spill] sm:$0xff] %v8142_v51  ;;  %v8155_v41 = vmul.f32 1.442695, %v10964_v43  ;;  %v10970_v51 = vsub.f32 %v10969_v42, %v6564_v17  ;;  %v10975_v43 = vld [vmem:[#allocation191_spill] sm:$0xff] }
 0x453   : > { %10950 = vst [vmem:[#allocation146_spill] sm:$0xff] %v8124_v36  ;;  %v10961_v36 = vsub.f32 %v10960_v22, %v6568_v30  ;;  %v8160_v18 = vmul.f32 1.442695, %v10967_v3  ;;  %v10978_v3 = vld [vmem:[#allocation193_spill] sm:$0xff] }
 0x454   : > { %10965 = vst [vmem:[#allocation152_spill] sm:$0xff] %v8155_v41  ;;  %v8165_v22 = vmul.f32 1.442695, %v10970_v51  ;;  %v10976_v41 = vsub.f32 %v10975_v43, %v6572_v58 }
 0x455   : > { %v8147_v24 = vmul.f32 1.442695, %v10961_v36  ;;  %10968 = vst [vmem:[#allocation151_spill] sm:$0xff] %v8160_v18  ;;  %v8167_v36 = vpop.eup %4718  ;;  %v10979_v18 = vsub.f32 %v10978_v3, %v6579_v13  ;;  %4750 = vpow2.f32 %v7695_v7  ;;  %v11035_v7 = vld [vmem:[#allocation211_spill] sm:$0xff] }
 0x456   : > { %10971 = vst [vmem:[#allocation153_spill] sm:$0xff] %v8165_v22  ;;  %v8178_v47 = vmul.f32 1.442695, %v10976_v41  ;;  %v8185_v51 = vpop.eup %4720  ;;  %v10982_v22 = vsub.f32 %v10981_v15, %v6564_v17  ;;  %v10987_v41 = vld [vmem:[#allocation195_spill] sm:$0xff]  ;;  %4752 = vpow2.f32 %v7700_v25  ;;  %v11044_v25 = vld [vmem:[#allocation216_spill] sm:$0xff] }
 0x457   : > { %10962 = vst [vmem:[#allocation150_spill] sm:$0xff] %v8147_v24  ;;  %v10973_v24 = vsub.f32 %v10972_v10, %v6568_v30  ;;  %v8183_v42 = vmul.f32 1.442695, %v10979_v18  ;;  %v8203_v18 = vpop.eup %4722  ;;  %4754 = vpow2.f32 %v7707_v31 }
 0x458   : > { %10977 = vst [vmem:[#allocation156_spill] sm:$0xff] %v8178_v47  ;;  %v8191_v10 = vmul.f32 1.442695, %v10982_v22  ;;  %v10988_v47 = vsub.f32 %v10987_v41, %v6572_v58  ;;  %v10993_v22 = vld [vmem:[#allocation198_spill] sm:$0xff] }
 0x459   : > { %v8173_v40 = vmul.f32 1.442695, %v10973_v24  ;;  %10980 = vst [vmem:[#allocation155_spill] sm:$0xff] %v8183_v42  ;;  %v10984_v24 = vld [vmem:[#allocation196_spill] sm:$0xff]  ;;  %v10991_v42 = vsub.f32 %v10990_v12, %v6579_v13 }
 0x45a   : > { %10983 = vst [vmem:[#allocation157_spill] sm:$0xff] %v8191_v10  ;;  %v8201_v3 = vmul.f32 1.442695, %v10988_v47  ;;  %v10994_v10 = vsub.f32 %v10993_v22, %v6564_v17  ;;  %v8221_v47 = vpop.eup %4724  ;;  %4756 = vpow2.f32 %v7712_v39  ;;  %v11061_v39 = vld [vmem:[#allocation219_spill] sm:$0xff] }
 0x45b   : > { %10974 = vst [vmem:[#allocation154_spill] sm:$0xff] %v8173_v40  ;;  %v10985_v40 = vsub.f32 %v10984_v24, %v6568_v30  ;;  %v8209_v15 = vmul.f32 1.442695, %v10991_v42  ;;  %v11002_v42 = vld [vmem:[#allocation201_spill] sm:$0xff] }
 0x45c   : > { %10989 = vst [vmem:[#allocation160_spill] sm:$0xff] %v8201_v3  ;;  %v8214_v24 = vmul.f32 1.442695, %v10994_v10  ;;  %v11000_v3 = vsub.f32 %v10999_v5, %v6572_v58  ;;  %v11005_v10 = vld [vmem:[#allocation202_spill] sm:$0xff] }
 0x45d   : > { %v8196_v43 = vmul.f32 1.442695, %v10985_v40  ;;  %10992 = vst [vmem:[#allocation159_spill] sm:$0xff] %v8209_v15  ;;  %v10996_v40 = vld [vmem:[#allocation200_spill] sm:$0xff]  ;;  %v11003_v15 = vsub.f32 %v11002_v42, %v6579_v13 }
 0x45e   : > { %10995 = vst [vmem:[#allocation161_spill] sm:$0xff] %v8214_v24  ;;  %v8227_v12 = vmul.f32 1.442695, %v11000_v3  ;;  %v11006_v24 = vsub.f32 %v11005_v10, %v6564_v17  ;;  %v11011_v3 = vld [vmem:[#allocation203_spill] sm:$0xff] }
 0x45f   : > { %10986 = vst [vmem:[#allocation158_spill] sm:$0xff] %v8196_v43  ;;  %v10997_v43 = vsub.f32 %v10996_v40, %v6568_v30  ;;  %v8232_v22 = vmul.f32 1.442695, %v11003_v15  ;;  %v11014_v15 = vld [vmem:[#allocation205_spill] sm:$0xff] }
 0x460   : > { %11001 = vst [vmem:[#allocation164_spill] sm:$0xff] %v8227_v12  ;;  %v8237_v40 = vmul.f32 1.442695, %v11006_v24  ;;  %v11012_v12 = vsub.f32 %v11011_v3, %v6572_v58 }
 0x461   : > { %v8219_v41 = vmul.f32 1.442695, %v10997_v43  ;;  %11004 = vst [vmem:[#allocation163_spill] sm:$0xff] %v8232_v22  ;;  %v8239_v43 = vpop.eup %4726  ;;  %v11015_v22 = vsub.f32 %v11014_v15, %v6579_v13  ;;  %4758 = vpow2.f32 %v7717_v8 }
 0x462   : > { %11007 = vst [vmem:[#allocation165_spill] sm:$0xff] %v8237_v40  ;;  %v8250_v42 = vmul.f32 1.442695, %v11012_v12  ;;  %v8257_v24 = vpop.eup %4728  ;;  %v11018_v40 = vsub.f32 %v11017_v37, %v6564_v17  ;;  %v11023_v12 = vld [vmem:[#allocation207_spill] sm:$0xff]  ;;  %4760 = vpow2.f32 %v7724_v16  ;;  %v11077_v16 = vld [vmem:[#allocation225_spill] sm:$0xff] }
 0x463   : > { %10998 = vst [vmem:[#allocation162_spill] sm:$0xff] %v8219_v41  ;;  %v11009_v41 = vsub.f32 %v11008_v21, %v6568_v30  ;;  %v8255_v10 = vmul.f32 1.442695, %v11015_v22  ;;  %v8275_v22 = vpop.eup %4730  ;;  %4762 = vpow2.f32 %v7729_v20 }
 0x464   : > { %11013 = vst [vmem:[#allocation168_spill] sm:$0xff] %v8250_v42  ;;  %v8263_v21 = vmul.f32 1.442695, %v11018_v40  ;;  %v11024_v42 = vsub.f32 %v11023_v12, %v6572_v58  ;;  %v11029_v40 = vld [vmem:[#allocation210_spill] sm:$0xff] }
 0x465   : > { %v8245_v5 = vmul.f32 1.442695, %v11009_v41  ;;  %11016 = vst [vmem:[#allocation167_spill] sm:$0xff] %v8255_v10  ;;  %v11020_v41 = vld [vmem:[#allocation208_spill] sm:$0xff]  ;;  %v11027_v10 = vsub.f32 %v11026_v45, %v6579_v13 }
 0x466   : > { %11019 = vst [vmem:[#allocation169_spill] sm:$0xff] %v8263_v21  ;;  %v8273_v15 = vmul.f32 1.442695, %v11024_v42  ;;  %v11030_v21 = vsub.f32 %v11029_v40, %v6564_v17  ;;  %v8293_v42 = vpop.eup %4732  ;;  %4764 = vpow2.f32 %v7734_v50  ;;  %v11094_v50 = vld [vmem:[#allocation230_spill] sm:$0xff] }
 0x467   : > { %11010 = vst [vmem:[#allocation166_spill] sm:$0xff] %v8245_v5  ;;  %v11021_v5 = vsub.f32 %v11020_v41, %v6568_v30  ;;  %v8281_v37 = vmul.f32 1.442695, %v11027_v10  ;;  %v11038_v10 = vld [vmem:[#allocation213_spill] sm:$0xff] }
 0x468   : > { %11025 = vst [vmem:[#allocation172_spill] sm:$0xff] %v8273_v15  ;;  %v8286_v41 = vmul.f32 1.442695, %v11030_v21  ;;  %v11036_v15 = vsub.f32 %v11035_v7, %v6572_v58  ;;  %v11041_v21 = vld [vmem:[#allocation214_spill] sm:$0xff] }
 0x469   : > { %v8268_v3 = vmul.f32 1.442695, %v11021_v5  ;;  %11028 = vst [vmem:[#allocation171_spill] sm:$0xff] %v8281_v37  ;;  %v11032_v5 = vld [vmem:[#allocation212_spill] sm:$0xff]  ;;  %v11039_v37 = vsub.f32 %v11038_v10, %v6579_v13 }
 0x46a   : > { %11031 = vst [vmem:[#allocation173_spill] sm:$0xff] %v8286_v41  ;;  %v8299_v45 = vmul.f32 1.442695, %v11036_v15  ;;  %v11042_v41 = vsub.f32 %v11041_v21, %v6564_v17  ;;  %v11047_v15 = vld [vmem:[#allocation215_spill] sm:$0xff] }
 0x46b   : > { %11022 = vst [vmem:[#allocation170_spill] sm:$0xff] %v8268_v3  ;;  %v11033_v3 = vsub.f32 %v11032_v5, %v6568_v30  ;;  %v8304_v40 = vmul.f32 1.442695, %v11039_v37  ;;  %v3199_v37 = vadd.f32 %v7155_v62, %v7135_v0 }
 0x46c   : > { %11037 = vst [vmem:[#allocation176_spill] sm:$0xff] %v8299_v45  ;;  %v8309_v5 = vmul.f32 1.442695, %v11042_v41  ;;  %v11048_v45 = vsub.f32 %v11047_v15, %v6572_v58  ;;  %v11051_v41 = vld [vmem:[#allocation217_spill] sm:$0xff]  ;;  %v11057_v15 = vld [vmem:[#allocation220_spill] sm:$0xff] }
 0x46d   : > { %v8291_v12 = vmul.f32 1.442695, %v11033_v3  ;;  %11040 = vst [vmem:[#allocation175_spill] sm:$0xff] %v8304_v40  ;;  %v8311_v3 = vpop.eup %4734  ;;  %v11052_v31 = vsub.f32 %v11051_v41, %v6579_v13  ;;  %4766 = vpow2.f32 %v7741_v27 }
 0x46e   : > { %11043 = vst [vmem:[#allocation177_spill] sm:$0xff] %v8309_v5  ;;  %v8322_v10 = vmul.f32 1.442695, %v11048_v45  ;;  %v8326_v21 = vpop.eup %4736  ;;  %v11058_v45 = vsub.f32 %v11057_v15, %v6568_v30  ;;  %v11067_v15 = vld [vmem:[#allocation222_spill] sm:$0xff]  ;;  %4768 = vpow2.f32 %v7746_v38  ;;  %v11110_v38 = vld [vmem:[#allocation236_spill] sm:$0xff] }
 0x46f   : > { %11034 = vst [vmem:[#allocation174_spill] sm:$0xff] %v8291_v12  ;;  %v11045_v12 = vsub.f32 %v11044_v25, %v6568_v30  ;;  %11050 = vst [vmem:[#allocation179_spill] sm:$0xff] %v8326_v21  ;;  %v8332_v5 = vmul.f32 1.442695, %v11052_v31  ;;  %v11054_v25 = vld [vmem:[#allocation218_spill] sm:$0xff]  ;;  %v8344_v40 = vpop.eup %4738  ;;  %v11062_v21 = vsub.f32 %v11061_v39, %v6572_v58  ;;  %v11064_v31 = vld [vmem:[#allocation221_spill] sm:$0xff]  ;;  %4770 = vpow2.f32 %v7751_v60 }
 0x470   : > { %11049 = vst [vmem:[#allocation180_spill] sm:$0xff] %v8322_v10  ;;  %v8342_v10 = vmul.f32 1.442695, %v11058_v45  ;;  %11060 = vst [vmem:[#allocation183_spill] sm:$0xff] %v8344_v40  ;;  %v11068_v45 = vsub.f32 %v11067_v15, %v6564_v17 }
 0x471   : > { %v8317_v7 = vmul.f32 1.442695, %v11045_v12  ;;  %11053 = vst [vmem:[#allocation181_spill] sm:$0xff] %v8332_v5  ;;  %v11055_v12 = vsub.f32 %v11054_v25, %v6564_v17  ;;  %v8350_v41 = vmul.f32 1.442695, %v11062_v21  ;;  %v11065_v5 = vsub.f32 %v11064_v31, %v6579_v13 }
 0x472   : > { %11059 = vst [vmem:[#allocation184_spill] sm:$0xff] %v8342_v10  ;;  %v8364_v8 = vmul.f32 1.442695, %v11068_v45  ;;  %v11070_v10 = vld [vmem:[#allocation224_spill] sm:$0xff]  ;;  %v11080_v45 = vld [vmem:[#allocation226_spill] sm:$0xff] }
 0x473   : > { %11046 = vst [vmem:[#allocation178_spill] sm:$0xff] %v8317_v7  ;;  %v8337_v7 = vmul.f32 1.442695, %v11055_v12  ;;  %11063 = vst [vmem:[#allocation185_spill] sm:$0xff] %v8350_v41  ;;  %v8355_v25 = vmul.f32 1.442695, %v11065_v5  ;;  %v3200_v12 = vadd.f32 %v7175_v49, %v3199_v37  ;;  %v11071_v21 = vsub.f32 %v11070_v10, %v6568_v30 }
 0x474   : > { %11069 = vst [vmem:[#allocation188_spill] sm:$0xff] %v8364_v8  ;;  %v11073_v41 = vld [vmem:[#allocation223_spill] sm:$0xff]  ;;  %v11081_v8 = vsub.f32 %v11080_v45, %v6564_v17 }
 0x475   : > { %11056 = vst [vmem:[#allocation182_spill] sm:$0xff] %v8337_v7  ;;  %11066 = vst [vmem:[#allocation186_spill] sm:$0xff] %v8355_v25  ;;  %v8358_v7 = vpop.eup %4740  ;;  %v8369_v39 = vmul.f32 1.442695, %v11071_v21  ;;  %v11074_v5 = vsub.f32 %v11073_v41, %v6572_v58  ;;  %v11078_v25 = vsub.f32 %v11077_v16, %v6579_v13  ;;  %v3201_v21 = vadd.f32 %v7195_v59, %v3200_v12  ;;  %v11084_v41 = vld [vmem:[#allocation228_spill] sm:$0xff] }
 0x476   : > { %v8376_v37 = vpop.eup %4742  ;;  %v8387_v10 = vmul.f32 1.442695, %v11081_v8  ;;  %4772 = vpow2.f32 %v7759_v53  ;;  %v11126_v53 = vld [vmem:[#allocation239_spill] sm:$0xff] }
 0x477   : > { %11072 = vst [vmem:[#allocation187_spill] sm:$0xff] %v8369_v39  ;;  %v8374_v31 = vmul.f32 1.442695, %v11074_v5  ;;  %11076 = vst [vmem:[#allocation190_spill] sm:$0xff] %v8376_v37  ;;  %v8382_v15 = vmul.f32 1.442695, %v11078_v25  ;;  %v8390_v39 = vpop.eup %4744  ;;  %v11085_v5 = vsub.f32 %v11084_v41, %v6568_v30 }
 0x478   : > { %11082 = vst [vmem:[#allocation191_spill] sm:$0xff] %v8387_v10  ;;  %11083 = vst [vmem:[#allocation193_spill] sm:$0xff] %v8390_v39  ;;  %v8408_v12 = vpop.eup %4746  ;;  %v11095_v10 = vsub.f32 %v11094_v50, %v6564_v17  ;;  %v11146_v37 = vld [vmem:[#allocation28_spill] sm:$0xff] }
 0x479   : > { %11075 = vst [vmem:[#allocation189_spill] sm:$0xff] %v8374_v31  ;;  %11079 = vst [vmem:[#allocation192_spill] sm:$0xff] %v8382_v15  ;;  %v8396_v20 = vmul.f32 1.442695, %v11085_v5  ;;  %v11087_v31 = vld [vmem:[#allocation227_spill] sm:$0xff]  ;;  %v11090_v15 = vld [vmem:[#allocation229_spill] sm:$0xff] }
 0x47a   : > { %v11088_v25 = vsub.f32 %v11087_v31, %v6572_v58  ;;  %v11091_v8 = vsub.f32 %v11090_v15, %v6579_v13  ;;  %11093 = vst [vmem:[#allocation197_spill] sm:$0xff] %v8408_v12  ;;  %v8414_v41 = vmul.f32 1.442695, %v11095_v10  ;;  %v11097_v5 = vld [vmem:[#allocation232_spill] sm:$0xff]  ;;  %v11100_v15 = vld [vmem:[#allocation231_spill] sm:$0xff]  ;;  %v11145_v12 = vld [vmem:[#allocation26_spill] sm:$0xff] }
 0x47b   : > { %11086 = vst [vmem:[#allocation194_spill] sm:$0xff] %v8396_v20  ;;  %v11098_v20 = vsub.f32 %v11097_v5, %v6568_v30 }
 0x47c   : > { %v8401_v16 = vmul.f32 1.442695, %v11088_v25  ;;  %v8406_v45 = vmul.f32 1.442695, %v11091_v8  ;;  %11096 = vst [vmem:[#allocation198_spill] sm:$0xff] %v8414_v41  ;;  %v3202_v25 = vadd.f32 %v7215_v46, %v3201_v21  ;;  %v11101_v8 = vsub.f32 %v11100_v15, %v6572_v58  ;;  %v11106_v41 = vld [vmem:[#allocation234_spill] sm:$0xff] }
 0x47d   : > { %v8419_v31 = vmul.f32 1.442695, %v11098_v20  ;;  %v11107_v20 = vsub.f32 %v11106_v41, %v6564_v17  ;;  %v11116_v41 = vsub.f32 %v10454_v44, %v6579_v13 }
 0x47e   : > { %11089 = vst [vmem:[#allocation196_spill] sm:$0xff] %v8401_v16  ;;  %11092 = vst [vmem:[#allocation195_spill] sm:$0xff] %v8406_v45  ;;  %v8422_v16 = vpop.eup %4748  ;;  %v8428_v27 = vmul.f32 1.442695, %v11101_v8  ;;  %v11103_v45 = vld [vmem:[#allocation233_spill] sm:$0xff]  ;;  %v11113_v8 = vsub.f32 %v10453_v29, %v6572_v58 }
 0x47f   : > { %11099 = vst [vmem:[#allocation200_spill] sm:$0xff] %v8419_v31  ;;  %v11104_v10 = vsub.f32 %v11103_v45, %v6579_v13  ;;  %v8438_v5 = vmul.f32 1.442695, %v11107_v20  ;;  %v8440_v21 = vpop.eup %4750  ;;  %v11111_v31 = vsub.f32 %v11110_v38, %v6568_v30  ;;  %v8460_v60 = vmul.f32 1.442695, %v11116_v41  ;;  %v11118_v20 = vld [vmem:[#allocation238_spill] sm:$0xff] }
 0x480   : > { %11102 = vst [vmem:[#allocation199_spill] sm:$0xff] %v8428_v27  ;;  %11109 = vst [vmem:[#allocation204_spill] sm:$0xff] %v8440_v21  ;;  %v8451_v45 = vmul.f32 1.442695, %v11113_v8  ;;  %v11129_v41 = vld [vmem:[#allocation241_spill] sm:$0xff] }
 0x481   : > { %v8433_v50 = vmul.f32 1.442695, %v11104_v10  ;;  %11108 = vst [vmem:[#allocation202_spill] sm:$0xff] %v8438_v5  ;;  %v8446_v15 = vmul.f32 1.442695, %v11111_v31  ;;  %v3203_v10 = vadd.f32 %v7235_v55, %v3202_v25  ;;  %11117 = vst [vmem:[#allocation208_spill] sm:$0xff] %v8460_v60  ;;  %v11119_v31 = vsub.f32 %v11118_v20, %v6564_v17 }
 0x482   : > { %11114 = vst [vmem:[#allocation205_spill] sm:$0xff] %v8451_v45  ;;  %v11125_v45 = vld [vmem:[#allocation85_spill] sm:$0xff]  ;;  %v11127_v5 = vsub.f32 %v11126_v53, %v6572_v58  ;;  %v11130_v60 = vsub.f32 %v11129_v41, %v6579_v13  ;;  %v11132_v20 = vld [vmem:[#allocation254_spill] sm:$0xff]  ;;  %v11137_v58 = vld [vmem:[#allocation23_spill] sm:$0xff] }
 0x483   : > { %11105 = vst [vmem:[#allocation201_spill] sm:$0xff] %v8433_v50  ;;  %11112 = vst [vmem:[#allocation203_spill] sm:$0xff] %v8446_v15  ;;  %v8454_v50 = vpop.eup %4752  ;;  %v8465_v38 = vmul.f32 1.442695, %v11119_v31  ;;  %v11121_v15 = vld [vmem:[#allocation240_spill] sm:$0xff]  ;;  %4774 = vpow2.f32 %v11125_v45  ;;  %v3204_v31 = vadd.f32 %v11132_v20, %v3203_v10  ;;  %v11135_v45 = vld [vmem:[#allocation21_spill] sm:$0xff] }
 0x484   : > { %11115 = vst [vmem:[#allocation206_spill] sm:$0xff] %v8454_v50  ;;  %v11122_v29 = vsub.f32 %v11121_v15, %v6568_v30  ;;  %v8472_v25 = vpop.eup %4754  ;;  %v8478_v44 = vmul.f32 1.442695, %v11127_v5  ;;  %v8483_v17 = vmul.f32 1.442695, %v11130_v60  ;;  %4776 = vpow2.f32 %v7769_v63  ;;  %v11133_v30 = vld [vmem:[#allocation20_spill] sm:$0xff] }
 0x485   : > { %11120 = vst [vmem:[#allocation207_spill] sm:$0xff] %v8465_v38  ;;  %11124 = vst [vmem:[#allocation210_spill] sm:$0xff] %v8472_v25  ;;  %v8486_v38 = vpop.eup %4756  ;;  %v11134_v15 = vld [vmem:[#allocation22_spill] sm:$0xff]  ;;  %v11138_v5 = vld [vmem:[#allocation25_spill] sm:$0xff] }
 0x486   : > { %v8470_v8 = vmul.f32 1.442695, %v11122_v29  ;;  %11128 = vst [vmem:[#allocation212_spill] sm:$0xff] %v8478_v44  ;;  %11131 = vst [vmem:[#allocation211_spill] sm:$0xff] %v8483_v17  ;;  %v3268_v29 = vadd.f32 %v11134_v15, %v11133_v30  ;;  %v3406_v53 = vadd.f32 %v11138_v5, %v11137_v58  ;;  %v8495_v44 = vpop.eup %4758  ;;  %v11140_v13 = vld [vmem:[#allocation86_spill] sm:$0xff]  ;;  %v4167_v10 = vpack.c.bf16 %v11134_v15, %v11133_v30  ;;  %v11143_v25 = vld [vmem:[#allocation88_spill] sm:$0xff] }
 0x487   : > { %11139 = vst [vmem:[#allocation213_spill] sm:$0xff] %v8495_v44  ;;  %4778 = vpow2.f32 %v11140_v13  ;;  %v11141_v60 = vld [vmem:[#allocation258_spill] sm:$0xff]  ;;  %v4295_v63 = vpack.c.bf16 %v11138_v5, %v11137_v58  ;;  %v8503_v17 = vpop.eup %4760  ;;  %v11144_v50 = vld [vmem:[#allocation27_spill] sm:$0xff]  ;;  %v4169_v30 = vpack.c.bf16 %v7155_v62, %v7135_v0 }
 0x488   : > { %11123 = vst [vmem:[#allocation209_spill] sm:$0xff] %v8470_v8  ;;  %v11136_v8 = vld [vmem:[#allocation24_spill] sm:$0xff]  ;;  %v3205_v41 = vadd.f32 %v11141_v60, %v3204_v31  ;;  %11142 = vst [vmem:[#allocation214_spill] sm:$0xff] %v8503_v17  ;;  %4780 = vpow2.f32 %v11143_v25  ;;  %v3269_v21 = vadd.f32 %v11144_v50, %v3268_v29  ;;  %v3407_v44 = vadd.f32 %v11146_v37, %v3406_v53  ;;  %v8509_v40 = vpop.eup %4762  ;;  %v11148_v31 = vld [vmem:[#allocation262_spill] sm:$0xff] }
 0x489   : > { %v3337_v27 = vadd.f32 %v11136_v8, %v11135_v45  ;;  %11147 = vst [vmem:[#allocation216_spill] sm:$0xff] %v8509_v40  ;;  %4782 = vpow2.f32 %v7787_v32  ;;  %4168 = vmatprep.subr.bf16.mxu0 %v4167_v10  ;;  %4296 = vmatprep.subr.bf16.mxu1 %v4295_v63  ;;  %v4297_v25 = vpack.c.bf16 %v11136_v8, %v11135_v45  ;;  %v8517_v15 = vpop.eup %4764  ;;  %v11149_v29 = vld [vmem:[#allocation91_spill] sm:$0xff] }
 0x48a   : > { %v3206_v13 = vadd.f32 %v11148_v31, %v3205_v41  ;;  %4784 = vpow2.f32 %v11149_v29  ;;  %v11151_v5 = vld [vmem:[#allocation31_spill] sm:$0xff]  ;;  %v8523_v17 = vpop.eup %4766  ;;  %v11154_v41 = vld [vmem:[#allocation90_spill] sm:$0xff]  ;;  %4170 = vmatpush1.bf16.msra.mxu0 %v4169_v30 }
 0x48b   : > { %v3338_v39 = vadd.f32 %v11145_v12, %v3337_v27  ;;  %v11150_v27 = vld [vmem:[#allocation29_spill] sm:$0xff]  ;;  %v11152_v40 = vld [vmem:[#allocation235_spill] sm:$0xff]  ;;  %11153 = vst [vmem:[#allocation215_spill] sm:$0xff] %v8523_v17  ;;  %4786 = vpow2.f32 %v11154_v41  ;;  %4298 = vmatpush1.bf16.msra.mxu1 %v4297_v25  ;;  %v8531_v8 = vpop.eup %4768  ;;  %v11159_v29 = vld [vmem:[#allocation250_spill] sm:$0xff] }
 0x48c   : > { %v3270_v58 = vadd.f32 %v11150_v27, %v3269_v21  ;;  %v3408_v32 = vadd.f32 %v11152_v40, %v3407_v44  ;;  %v11155_v10 = vld [vmem:[#allocation35_spill] sm:$0xff]  ;;  %v4171_v0 = vpack.c.bf16 %v11150_v27, %v11144_v50  ;;  %v4299_v62 = vpack.c.bf16 %v11152_v40, %v11146_v37  ;;  %11156 = vst [vmem:[#allocation217_spill] sm:$0xff] %v8531_v8  ;;  %v11158_v44 = vld [vmem:[#allocation249_spill] sm:$0xff]  ;;  %v8537_v17 = vpop.eup %4770 }
 0x48d   : > { %v3339_v53 = vadd.f32 %v11151_v5, %v3338_v39  ;;  %v3207_v63 = vadd.f32 %v11155_v10, %v3206_v13  ;;  %4788 = vpow2.f32 %v7805_v35  ;;  %v11157_v39 = vld [vmem:[#allocation237_spill] sm:$0xff]  ;;  %11160 = vst [vmem:[#allocation218_spill] sm:$0xff] %v8537_v17  ;;  %v11162_v30 = vld [vmem:[#allocation39_spill] sm:$0xff]  ;;  %v4173_v40 = vpack.c.bf16 %v7195_v59, %v7175_v49  ;;  %v8545_v37 = vpop.eup %4772 }
 0x48e   : > { %v3271_v21 = vadd.f32 %v11157_v39, %v3270_v58  ;;  %v3409_v41 = vadd.f32 %v11159_v29, %v3408_v32  ;;  %v11161_v13 = vld [vmem:[#allocation93_spill] sm:$0xff]  ;;  %4172 = vmatprep.subr.bf16.mxu0 %v4171_v0  ;;  %4300 = vmatprep.subr.bf16.mxu1 %v4299_v62  ;;  %v4301_v35 = vpack.c.bf16 %v11151_v5, %v11145_v12  ;;  %v11163_v50 = vld [vmem:[#allocation95_spill] sm:$0xff]  ;;  %v8551_v8 = vpop.eup %4774  ;;  %v11170_v5 = vld [vmem:[#allocation96_spill] sm:$0xff] }
 0x48f   : > { %v3340_v45 = vadd.f32 %v11158_v44, %v3339_v53  ;;  %4790 = vpow2.f32 %v11161_v13  ;;  %v3208_v25 = vadd.f32 %v11162_v30, %v3207_v63  ;;  %v11164_v27 = vld [vmem:[#allocation251_spill] sm:$0xff]  ;;  %v11165_v53 = vld [vmem:[#allocation252_spill] sm:$0xff]  ;;  %v11166_v17 = vld [vmem:[#allocation253_spill] sm:$0xff]  ;;  %11167 = vst [vmem:[#allocation220_spill] sm:$0xff] %v8551_v8  ;;  %4174 = vmatpush1.bf16.msra.mxu0 %v4173_v40  ;;  %v8559_v12 = vpop.eup %4776 }
 0x490   : > { %4792 = vpow2.f32 %v11163_v50  ;;  %v3272_v58 = vadd.f32 %v11164_v27, %v3271_v21  ;;  %v3410_v13 = vadd.f32 %v11166_v17, %v3409_v41  ;;  %v11168_v63 = vld [vmem:[#allocation43_spill] sm:$0xff]  ;;  %4302 = vmatpush1.bf16.msra.mxu1 %v4301_v35  ;;  %v4175_v49 = vpack.c.bf16 %v11164_v27, %v11157_v39  ;;  %11169 = vst [vmem:[#allocation219_spill] sm:$0xff] %v8559_v12  ;;  %v11173_v50 = vld [vmem:[#allocation257_spill] sm:$0xff] }
 0x491   : > { %v3341_v32 = vadd.f32 %v11165_v53, %v3340_v45  ;;  %4794 = vpow2.f32 %v7823_v9  ;;  %v3209_v0 = vadd.f32 %v11168_v63, %v3208_v25  ;;  %v4303_v59 = vpack.c.bf16 %v11166_v17, %v11159_v29  ;;  %v11171_v62 = vld [vmem:[#allocation255_spill] sm:$0xff]  ;;  %v11172_v45 = vld [vmem:[#allocation256_spill] sm:$0xff]  ;;  %v8565_v8 = vpop.eup %4778  ;;  %v11175_v25 = vld [vmem:[#allocation97_spill] sm:$0xff] }
 0x492   : > { %4796 = vpow2.f32 %v11170_v5  ;;  %v3273_v21 = vadd.f32 %v11171_v62, %v3272_v58  ;;  %v3411_v9 = vadd.f32 %v11173_v50, %v3410_v13  ;;  %11174 = vst [vmem:[#allocation221_spill] sm:$0xff] %v8565_v8  ;;  %v11176_v40 = vld [vmem:[#allocation47_spill] sm:$0xff]  ;;  %4176 = vmatprep.subr.bf16.mxu0 %v4175_v49  ;;  %v4177_v17 = vpack.c.bf16 %v7235_v55, %v7215_v46  ;;  %v8573_v29 = vpop.eup %4780  ;;  %v11179_v5 = vld [vmem:[#allocation261_spill] sm:$0xff] }
 0x493   : > { %v3342_v41 = vadd.f32 %v11172_v45, %v3341_v32  ;;  %4798 = vpow2.f32 %v11175_v25  ;;  %v3210_v35 = vadd.f32 %v11176_v40, %v3209_v0  ;;  %4304 = vmatprep.subr.bf16.mxu1 %v4303_v59  ;;  %v4305_v39 = vpack.c.bf16 %v11165_v53, %v11158_v44  ;;  %v11177_v27 = vld [vmem:[#allocation259_spill] sm:$0xff]  ;;  %v11178_v32 = vld [vmem:[#allocation260_spill] sm:$0xff]  ;;  %v8579_v8 = vpop.eup %4782  ;;  %v11181_v0 = vld [vmem:[#allocation98_spill] sm:$0xff] }
 0x494   : > { %4800 = vpow2.f32 %v7841_v19  ;;  %v3274_v58 = vadd.f32 %v11177_v27, %v3273_v21  ;;  %v3412_v25 = vadd.f32 %v11179_v5, %v3411_v9  ;;  %11180 = vst [vmem:[#allocation222_spill] sm:$0xff] %v8579_v8  ;;  %v11182_v49 = vld [vmem:[#allocation51_spill] sm:$0xff]  ;;  %4178 = vmatpush1.bf16.msra.mxu0 %v4177_v17  ;;  %v4179_v46 = vpack.c.bf16 %v11177_v27, %v11171_v62  ;;  %v8587_v19 = vpop.eup %4784  ;;  %v11183_v44 = vld [vmem:[#allocation100_spill] sm:$0xff]  ;;  %v11184_v53 = vld [vmem:[#allocation30_spill] sm:$0xff] }
 0x495   : > { %v3343_v13 = vadd.f32 %v11178_v32, %v3342_v41  ;;  %4802 = vpow2.f32 %v11181_v0  ;;  %v3211_v59 = vadd.f32 %v11182_v49, %v3210_v35  ;;  %4306 = vmatpush1.bf16.msra.mxu1 %v4305_v39  ;;  %v4307_v55 = vpack.c.bf16 %v11179_v5, %v11173_v50  ;;  %v11185_v41 = vld [vmem:[#allocation32_spill] sm:$0xff]  ;;  %v11186_v8 = vld [vmem:[#allocation33_spill] sm:$0xff]  ;;  %v8593_v12 = vpop.eup %4786  ;;  %v11188_v35 = vld [vmem:[#allocation55_spill] sm:$0xff] }
 0x496   : > { %4804 = vpow2.f32 %v11183_v44  ;;  %v3275_v21 = vadd.f32 %v11184_v53, %v3274_v58  ;;  %v3413_v0 = vadd.f32 %v11186_v8, %v3412_v25  ;;  %11187 = vst [vmem:[#allocation224_spill] sm:$0xff] %v8593_v12  ;;  %4180 = vmatprep.subr.bf16.mxu0 %v4179_v46  ;;  %v4181_v62 = vpack.c.bf16 %v11141_v60, %v11132_v20  ;;  %v11189_v27 = vld [vmem:[#allocation103_spill] sm:$0xff]  ;;  %v11190_v58 = vld [vmem:[#allocation34_spill] sm:$0xff]  ;;  %v11191_v5 = vld [vmem:[#allocation36_spill] sm:$0xff] }
 0x497   : > { %v3344_v9 = vadd.f32 %v11185_v41, %v3343_v13  ;;  %4806 = vpow2.f32 %v7859_v61  ;;  %v3212_v17 = vadd.f32 %v11188_v35, %v3211_v59  ;;  %4308 = vmatprep.subr.bf16.mxu1 %v4307_v55  ;;  %v4309_v50 = vpack.c.bf16 %v11178_v32, %v11172_v45  ;;  %v8601_v39 = vpop.eup %4788  ;;  %v11192_v44 = vld [vmem:[#allocation37_spill] sm:$0xff]  ;;  %v11194_v59 = vld [vmem:[#allocation102_spill] sm:$0xff]  ;;  %v11195_v46 = vld [vmem:[#allocation59_spill] sm:$0xff] }
 0x498   : > { %4808 = vpow2.f32 %v11189_v27  ;;  %v3276_v13 = vadd.f32 %v11190_v58, %v3275_v21  ;;  %v3414_v61 = vadd.f32 %v11192_v44, %v3413_v0  ;;  %4182 = vmatpush1.bf16.msra.mxu0 %v4181_v62  ;;  %v4183_v20 = vpack.c.bf16 %v11190_v58, %v11184_v53  ;;  %v11197_v32 = vld [vmem:[#allocation38_spill] sm:$0xff]  ;;  %v11199_v27 = vld [vmem:[#allocation41_spill] sm:$0xff]  ;;  %v11202_v62 = vld [vmem:[#allocation63_spill] sm:$0xff] }
 0x499   : > { %v3345_v25 = vadd.f32 %v11191_v5, %v3344_v9  ;;  %v8607_v12 = vpop.eup %4790  ;;  %4810 = vpow2.f32 %v11194_v59  ;;  %v3213_v55 = vadd.f32 %v11195_v46, %v3212_v17  ;;  %4310 = vmatpush1.bf16.msra.mxu1 %v4309_v50  ;;  %v4311_v60 = vpack.c.bf16 %v11192_v44, %v11186_v8  ;;  %v11198_v9 = vld [vmem:[#allocation40_spill] sm:$0xff]  ;;  %v11201_v17 = vld [vmem:[#allocation105_spill] sm:$0xff]  ;;  %v11203_v58 = vld [vmem:[#allocation107_spill] sm:$0xff] }
 0x49a   : > { %11193 = vst [vmem:[#allocation223_spill] sm:$0xff] %v8607_v12  ;;  %v8615_v45 = vpop.eup %4792  ;;  %4812 = vpow2.f32 %v7877_v26  ;;  %v3277_v21 = vadd.f32 %v11197_v32, %v3276_v13  ;;  %v3415_v59 = vadd.f32 %v11199_v27, %v3414_v61  ;;  %4184 = vmatprep.subr.bf16.mxu0 %v4183_v20  ;;  %v4185_v8 = vpack.c.bf16 %v11155_v10, %v11148_v31  ;;  %v11204_v13 = vld [vmem:[#allocation42_spill] sm:$0xff]  ;;  %v11205_v44 = vld [vmem:[#allocation44_spill] sm:$0xff] }
 0x49b   : > { %11196 = vst [vmem:[#allocation225_spill] sm:$0xff] %v8615_v45  ;;  %v3346_v0 = vadd.f32 %v11198_v9, %v3345_v25  ;;  %v8621_v12 = vpop.eup %4794  ;;  %4814 = vpow2.f32 %v11201_v17  ;;  %v3214_v50 = vadd.f32 %v11202_v62, %v3213_v55  ;;  %4312 = vmatprep.subr.bf16.mxu1 %v4311_v60  ;;  %v4313_v26 = vpack.c.bf16 %v11191_v5, %v11185_v41  ;;  %v11208_v55 = vld [vmem:[#allocation67_spill] sm:$0xff]  ;;  %v11210_v5 = vld [vmem:[#allocation108_spill] sm:$0xff]  ;;  %v11211_v60 = vld [vmem:[#allocation46_spill] sm:$0xff] }
 0x49c   : > { %11200 = vst [vmem:[#allocation226_spill] sm:$0xff] %v8621_v12  ;;  %v8629_v53 = vpop.eup %4796  ;;  %4816 = vpow2.f32 %v11203_v58  ;;  %v3278_v25 = vadd.f32 %v11204_v13, %v3277_v21  ;;  %v11206_v12 = vld [vmem:[#allocation45_spill] sm:$0xff]  ;;  %4186 = vmatpush1.bf16.msra.mxu0 %v4185_v8  ;;  %v4187_v31 = vpack.c.bf16 %v11204_v13, %v11197_v32  ;;  %v11216_v8 = vld [vmem:[#allocation71_spill] sm:$0xff]  ;;  %v4317_v32 = vpack.c.bf16 %v11205_v44, %v11198_v9  ;;  %v11217_v13 = vld [vmem:[#allocation50_spill] sm:$0xff] }
 0x49d   : > { %v3347_v61 = vadd.f32 %v11205_v44, %v3346_v0  ;;  %v3416_v17 = vadd.f32 %v11206_v12, %v3415_v59  ;;  %v8635_v45 = vpop.eup %4798  ;;  %4818 = vpow2.f32 %v7895_v14  ;;  %v3215_v20 = vadd.f32 %v11208_v55, %v3214_v50  ;;  %4314 = vmatpush1.bf16.msra.mxu1 %v4313_v26  ;;  %v11212_v0 = vld [vmem:[#allocation48_spill] sm:$0xff]  ;;  %v11213_v58 = vld [vmem:[#allocation49_spill] sm:$0xff]  ;;  %v11224_v44 = vld [vmem:[#allocation54_spill] sm:$0xff] }
 0x49e   : > { %11207 = vst [vmem:[#allocation228_spill] sm:$0xff] %v8635_v45  ;;  %v4315_v10 = vpack.c.bf16 %v11206_v12, %v11199_v27  ;;  %v8643_v41 = vpop.eup %4800  ;;  %4820 = vpow2.f32 %v11210_v5  ;;  %v3279_v21 = vadd.f32 %v11211_v60, %v3278_v25  ;;  %v11215_v50 = vld [vmem:[#allocation109_spill] sm:$0xff]  ;;  %4188 = vmatprep.subr.bf16.mxu0 %v4187_v31  ;;  %v4189_v12 = vpack.c.bf16 %v11168_v63, %v11162_v30  ;;  %v11222_v31 = vld [vmem:[#allocation75_spill] sm:$0xff]  ;;  %v11223_v9 = vld [vmem:[#allocation112_spill] sm:$0xff] }
 0x49f   : > { %11209 = vst [vmem:[#allocation227_spill] sm:$0xff] %v8643_v41  ;;  %v3348_v59 = vadd.f32 %v11212_v0, %v3347_v61  ;;  %v3417_v14 = vadd.f32 %v11213_v58, %v3416_v17  ;;  %v8649_v45 = vpop.eup %4802  ;;  %4822 = vpow2.f32 %v11215_v50  ;;  %v3216_v26 = vadd.f32 %v11216_v8, %v3215_v20  ;;  %v11218_v61 = vld [vmem:[#allocation52_spill] sm:$0xff]  ;;  %v11219_v5 = vld [vmem:[#allocation53_spill] sm:$0xff]  ;;  %v11221_v20 = vld [vmem:[#allocation110_spill] sm:$0xff] }
 0x4a0   : > { %11214 = vst [vmem:[#allocation229_spill] sm:$0xff] %v8649_v45  ;;  %4316 = vmatprep.subr.bf16.mxu1 %v4315_v10  ;;  %v8657_v27 = vpop.eup %4804  ;;  %4824 = vpow2.f32 %v7913_v2  ;;  %v3280_v25 = vadd.f32 %v11217_v13, %v3279_v21  ;;  %4190 = vmatpush1.bf16.msra.mxu0 %v4189_v12  ;;  %v4191_v30 = vpack.c.bf16 %v11217_v13, %v11211_v60  ;;  %v11229_v13 = vld [vmem:[#allocation115_spill] sm:$0xff] }
 0x4a1   : > { %v3349_v17 = vadd.f32 %v11218_v61, %v3348_v59  ;;  %v3418_v50 = vadd.f32 %v11219_v5, %v3417_v14  ;;  %v8663_v45 = vpop.eup %4806  ;;  %4826 = vpow2.f32 %v11221_v20  ;;  %v3217_v10 = vadd.f32 %v11222_v31, %v3216_v26  ;;  %4318 = vmatpush1.bf16.msra.mxu1 %v4317_v32  ;;  %v11225_v59 = vld [vmem:[#allocation56_spill] sm:$0xff]  ;;  %v11228_v26 = vld [vmem:[#allocation79_spill] sm:$0xff] }
 0x4a2   : > { %11220 = vst [vmem:[#allocation230_spill] sm:$0xff] %v8663_v45  ;;  %v4319_v2 = vpack.c.bf16 %v11219_v5, %v11213_v58  ;;  %v8671_v63 = vpop.eup %4808  ;;  %4828 = vpow2.f32 %v11223_v9  ;;  %v3281_v21 = vadd.f32 %v11224_v44, %v3280_v25  ;;  %v11226_v45 = vld [vmem:[#allocation57_spill] sm:$0xff]  ;;  %4192 = vmatprep.subr.bf16.mxu0 %v4191_v30  ;;  %v4193_v60 = vpack.c.bf16 %v11182_v49, %v11176_v40  ;;  %v11230_v25 = vld [vmem:[#allocation58_spill] sm:$0xff]  ;;  %v11231_v5 = vld [vmem:[#allocation60_spill] sm:$0xff] }
 0x4a3   : > { %v3350_v14 = vadd.f32 %v11225_v59, %v3349_v17  ;;  %v3419_v20 = vadd.f32 %v11226_v45, %v3418_v50  ;;  %v8677_v41 = vpop.eup %4810  ;;  %4830 = vpow2.f32 %v7931_v11  ;;  %v3218_v12 = vadd.f32 %v11228_v26, %v3217_v10  ;;  %v11232_v9 = vld [vmem:[#allocation61_spill] sm:$0xff]  ;;  %v11234_v10 = vld [vmem:[#allocation114_spill] sm:$0xff]  ;;  %v11235_v30 = vld [vmem:[#allocation83_spill] sm:$0xff] }
 0x4a4   : > { %11227 = vst [vmem:[#allocation232_spill] sm:$0xff] %v8677_v41  ;;  %4320 = vmatprep.subr.bf16.mxu1 %v4319_v2  ;;  %v4321_v58 = vpack.c.bf16 %v11218_v61, %v11212_v0  ;;  %v8685_v32 = vpop.eup %4812  ;;  %4832 = vpow2.f32 %v11229_v13  ;;  %v3282_v17 = vadd.f32 %v11230_v25, %v3281_v21  ;;  %4194 = vmatpush1.bf16.msra.mxu0 %v4193_v60  ;;  %v11237_v61 = vld [vmem:[#allocation62_spill] sm:$0xff]  ;;  %v11239_v13 = vld [vmem:[#allocation65_spill] sm:$0xff] }
 0x4a5   : > { %v3351_v50 = vadd.f32 %v11231_v5, %v3350_v14  ;;  %v3420_v11 = vadd.f32 %v11232_v9, %v3419_v20  ;;  %v8691_v41 = vpop.eup %4814  ;;  %4834 = vpow2.f32 %v11234_v10  ;;  %v3219_v2 = vadd.f32 %v11235_v30, %v3218_v12  ;;  %v11238_v14 = vld [vmem:[#allocation64_spill] sm:$0xff]  ;;  %v11241_v12 = vld [vmem:[#allocation117_spill] sm:$0xff] }
 0x4a6   : > { %11233 = vst [vmem:[#allocation231_spill] sm:$0xff] %v8691_v41  ;;  %4322 = vmatpush1.bf16.msra.mxu1 %v4321_v58  ;;  %v4195_v40 = vpack.c.bf16 %v11230_v25, %v11224_v44  ;;  %v4323_v49 = vpack.c.bf16 %v11232_v9, %v11226_v45  ;;  %v8699_v0 = vpop.eup %4816  ;;  %4836 = vpow2.f32 %v7949_v48  ;;  %v3283_v21 = vadd.f32 %v11237_v61, %v3282_v17  ;;  %v11242_v60 = vld [vmem:[#allocation89_spill] sm:$0xff]  ;;  %v11243_v25 = vld [vmem:[#allocation119_spill] sm:$0xff]  ;;  %v11244_v17 = vld [vmem:[#allocation66_spill] sm:$0xff] }
 0x4a7   : > { %11236 = vst [vmem:[#allocation233_spill] sm:$0xff] %v8699_v0  ;;  %v3352_v20 = vadd.f32 %v11238_v14, %v3351_v50  ;;  %v3421_v10 = vadd.f32 %v11239_v13, %v3420_v11  ;;  %v8705_v41 = vpop.eup %4818  ;;  %4838 = vpow2.f32 %v11241_v12  ;;  %v3220_v58 = vadd.f32 %v11242_v60, %v3219_v2  ;;  %v11245_v9 = vld [vmem:[#allocation68_spill] sm:$0xff]  ;;  %v11248_v2 = vld [vmem:[#allocation101_spill] sm:$0xff] }
 0x4a8   : > { %11240 = vst [vmem:[#allocation234_spill] sm:$0xff] %v8705_v41  ;;  %4196 = vmatprep.subr.bf16.mxu0 %v4195_v40  ;;  %4324 = vmatprep.subr.bf16.mxu1 %v4323_v49  ;;  %v4197_v45 = vpack.c.bf16 %v11195_v46, %v11188_v35  ;;  %v4325_v48 = vpack.c.bf16 %v11231_v5, %v11225_v59  ;;  %v8713_v44 = vpop.eup %4820  ;;  %4840 = vpow2.f32 %v11243_v25  ;;  %v11246_v41 = vld [vmem:[#allocation69_spill] sm:$0xff]  ;;  %v11249_v5 = vld [vmem:[#allocation120_spill] sm:$0xff]  ;;  %v11250_v49 = vld [vmem:[#allocation70_spill] sm:$0xff] }
 0x4a9   : > { %v3284_v50 = vadd.f32 %v11244_v17, %v3283_v21  ;;  %v3353_v11 = vadd.f32 %v11245_v9, %v3352_v20  ;;  %v3422_v12 = vadd.f32 %v11246_v41, %v3421_v10  ;;  %v8719_v0 = vpop.eup %4822  ;;  %4842 = vpow2.f32 %v7967_v1  ;;  %v11251_v20 = vld [vmem:[#allocation72_spill] sm:$0xff]  ;;  %v11252_v25 = vld [vmem:[#allocation73_spill] sm:$0xff] }
 0x4aa   : > { %11247 = vst [vmem:[#allocation236_spill] sm:$0xff] %v8719_v0  ;;  %v3221_v40 = vadd.f32 %v11248_v2, %v3220_v58  ;;  %4198 = vmatpush1.bf16.msra.mxu0 %v4197_v45  ;;  %4326 = vmatpush1.bf16.msra.mxu1 %v4325_v48  ;;  %v4199_v35 = vpack.c.bf16 %v11244_v17, %v11237_v61  ;;  %v8727_v59 = vpop.eup %4824  ;;  %4844 = vpow2.f32 %v11249_v5  ;;  %v11254_v58 = vld [vmem:[#allocation121_spill] sm:$0xff]  ;;  %v11256_v17 = vld [vmem:[#allocation74_spill] sm:$0xff] }
 0x4ab   : > { %v4327_v46 = vpack.c.bf16 %v11246_v41, %v11239_v13  ;;  %v3285_v21 = vadd.f32 %v11250_v49, %v3284_v50  ;;  %v3354_v10 = vadd.f32 %v11251_v20, %v3353_v11  ;;  %v3423_v1 = vadd.f32 %v11252_v25, %v3422_v12  ;;  %v8733_v0 = vpop.eup %4826  ;;  %v11255_v45 = vld [vmem:[#allocation113_spill] sm:$0xff]  ;;  %v11257_v11 = vld [vmem:[#allocation76_spill] sm:$0xff] }
 0x4ac   : > { %11253 = vst [vmem:[#allocation238_spill] sm:$0xff] %v8733_v0  ;;  %4846 = vpow2.f32 %v11254_v58  ;;  %v3222_v48 = vadd.f32 %v11255_v45, %v3221_v40  ;;  %4200 = vmatprep.subr.bf16.mxu0 %v4199_v35  ;;  %v4201_v41 = vpack.c.bf16 %v11208_v55, %v11202_v62  ;;  %v4329_v61 = vpack.c.bf16 %v11245_v9, %v11238_v14  ;;  %v8741_v13 = vpop.eup %4828  ;;  %v11258_v5 = vld [vmem:[#allocation77_spill] sm:$0xff]  ;;  %v11260_v40 = vld [vmem:[#allocation122_spill] sm:$0xff]  ;;  %v11261_v14 = vld [vmem:[#allocation124_spill] sm:$0xff] }
 0x4ad   : > { %4328 = vmatprep.subr.bf16.mxu1 %v4327_v46  ;;  %4848 = vpow2.f32 %v7985_v6  ;;  %v3286_v50 = vadd.f32 %v11256_v17, %v3285_v21  ;;  %v3355_v12 = vadd.f32 %v11257_v11, %v3354_v10  ;;  %v3424_v58 = vadd.f32 %v11258_v5, %v3423_v1  ;;  %v8747_v0 = vpop.eup %4830  ;;  %v11262_v9 = vld [vmem:[#allocation78_spill] sm:$0xff]  ;;  %v11263_v21 = vld [vmem:[#allocation80_spill] sm:$0xff]  ;;  %v11264_v1 = vld [vmem:[#allocation81_spill] sm:$0xff] }
 0x4ae   : > { %11259 = vst [vmem:[#allocation240_spill] sm:$0xff] %v8747_v0  ;;  %4850 = vpow2.f32 %v11260_v40  ;;  %v3223_v35 = vadd.f32 %v8005_v4, %v3222_v48  ;;  %4202 = vmatpush1.bf16.msra.mxu0 %v4201_v41  ;;  %4330 = vmatpush1.bf16.msra.mxu1 %v4329_v61  ;;  %v4203_v62 = vpack.c.bf16 %v11256_v17, %v11250_v49  ;;  %v8755_v55 = vpop.eup %4832  ;;  %v11266_v48 = vld [vmem:[#allocation126_spill] sm:$0xff]  ;;  %v11267_v17 = vld [vmem:[#allocation128_spill] sm:$0xff] }
 0x4af   : > { %v4331_v6 = vpack.c.bf16 %v11258_v5, %v11252_v25  ;;  %4852 = vpow2.f32 %v11261_v14  ;;  %v3287_v46 = vadd.f32 %v11262_v9, %v3286_v50  ;;  %v3356_v10 = vadd.f32 %v11263_v21, %v3355_v12  ;;  %v8761_v0 = vpop.eup %4834  ;;  %v11268_v50 = vld [vmem:[#allocation82_spill] sm:$0xff]  ;;  %v11269_v5 = vld [vmem:[#allocation84_spill] sm:$0xff]  ;;  %v11270_v14 = vld [vmem:[#allocation87_spill] sm:$0xff] }
 0x4b0   : > { %v3425_v40 = vadd.f32 %v11264_v1, %v3424_v58  ;;  %11265 = vst [vmem:[#allocation85_spill] sm:$0xff] %v8761_v0  ;;  %4854 = vpow2.f32 %v11266_v48  ;;  %v3224_v41 = vadd.f32 %v8077_v23, %v3223_v35  ;;  %4204 = vmatprep.subr.bf16.mxu0 %v4203_v62  ;;  %v4205_v49 = vpack.c.bf16 %v11222_v31, %v11216_v8  ;;  %v8769_v61 = vpop.eup %4836  ;;  %v11271_v35 = vld [vmem:[#allocation127_spill] sm:$0xff] }
 0x4b1   : > { %4332 = vmatprep.subr.bf16.mxu1 %v4331_v6  ;;  %v4333_v25 = vpack.c.bf16 %v11257_v11, %v11251_v20  ;;  %4856 = vpow2.f32 %v11267_v17  ;;  %v3288_v12 = vadd.f32 %v11268_v50, %v3287_v46  ;;  %v3357_v58 = vadd.f32 %v11269_v5, %v3356_v10  ;;  %v8775_v0 = vpop.eup %4838  ;;  %v11272_v11 = vld [vmem:[#allocation92_spill] sm:$0xff]  ;;  %v11273_v46 = vld [vmem:[#allocation94_spill] sm:$0xff] }
 0x4b2   : > { %v3426_v48 = vadd.f32 %v11270_v14, %v3425_v40  ;;  %4858 = vpow2.f32 %v11271_v35  ;;  %v3225_v62 = vadd.f32 %v8149_v57, %v3224_v41  ;;  %4206 = vmatpush1.bf16.msra.mxu0 %v4205_v49  ;;  %v4207_v8 = vpack.c.bf16 %v11268_v50, %v11262_v9  ;;  %v8783_v20 = vpop.eup %4840  ;;  %v11274_v40 = vld [vmem:[#allocation99_spill] sm:$0xff]  ;;  %v11276_v41 = vld [vmem:[#allocation130_spill] sm:$0xff]  ;;  %v11278_v50 = vld [vmem:[#allocation104_spill] sm:$0xff] }
 0x4b3   : > { %4334 = vmatpush1.bf16.msra.mxu1 %v4333_v25  ;;  %v4335_v31 = vpack.c.bf16 %v11270_v14, %v11264_v1  ;;  %4860 = vpow2.f32 %v8021_v52  ;;  %v3289_v6 = vadd.f32 %v11272_v11, %v3288_v12  ;;  %v3358_v10 = vadd.f32 %v11273_v46, %v3357_v58  ;;  %v8789_v35 = vpop.eup %4842  ;;  %v11277_v25 = vld [vmem:[#allocation132_spill] sm:$0xff]  ;;  %v11279_v58 = vld [vmem:[#allocation106_spill] sm:$0xff] }
 0x4b4   : > { %v3427_v17 = vadd.f32 %v11274_v40, %v3426_v48  ;;  %11275 = vst [vmem:[#allocation239_spill] sm:$0xff] %v8789_v35  ;;  %4862 = vpow2.f32 %v11276_v41  ;;  %v3226_v49 = vadd.f32 %v8221_v47, %v3225_v62  ;;  %4208 = vmatprep.subr.bf16.mxu0 %v4207_v8  ;;  %v4209_v9 = vpack.c.bf16 %v11235_v30, %v11228_v26  ;;  %v8797_v1 = vpop.eup %4844  ;;  %v11280_v48 = vld [vmem:[#allocation111_spill] sm:$0xff]  ;;  %v11282_v8 = vld [vmem:[#allocation116_spill] sm:$0xff] }
 0x4b5   : > { %4336 = vmatprep.subr.bf16.mxu1 %v4335_v31  ;;  %v4337_v52 = vpack.c.bf16 %v11269_v5, %v11263_v21  ;;  %4864 = vpow2.f32 %v11277_v25  ;;  %v3290_v12 = vadd.f32 %v11278_v50, %v3289_v6  ;;  %v3359_v14 = vadd.f32 %v11279_v58, %v3358_v10  ;;  %v11281_v5 = vld [vmem:[#allocation133_spill] sm:$0xff]  ;;  %v11283_v6 = vld [vmem:[#allocation118_spill] sm:$0xff] }
 0x4b6   : > { %v3428_v41 = vadd.f32 %v11280_v48, %v3427_v17  ;;  %v8803_v35 = vpop.eup %4846  ;;  %4866 = vpow2.f32 %v8039_v54  ;;  %v3227_v62 = vadd.f32 %v8293_v42, %v3226_v49  ;;  %4210 = vmatpush1.bf16.msra.mxu0 %v4209_v9  ;;  %v4211_v26 = vpack.c.bf16 %v11278_v50, %v11272_v11  ;;  %v11284_v17 = vld [vmem:[#allocation123_spill] sm:$0xff]  ;;  %v11285_v49 = vld [vmem:[#allocation134_spill] sm:$0xff]  ;;  %v11286_v50 = vld [vmem:[#allocation129_spill] sm:$0xff] }
 0x4b7   : > { %4338 = vmatpush1.bf16.msra.mxu1 %v4337_v52  ;;  %v4339_v30 = vpack.c.bf16 %v11280_v48, %v11274_v40  ;;  %v8811_v21 = vpop.eup %4848  ;;  %4868 = vpow2.f32 %v11281_v5  ;;  %v3291_v31 = vadd.f32 %v11282_v8, %v3290_v12  ;;  %v3360_v10 = vadd.f32 %v11283_v6, %v3359_v14  ;;  %v11287_v14 = vld [vmem:[#allocation131_spill] sm:$0xff] }
 0x4b8   : > { %v3429_v54 = vadd.f32 %v11284_v17, %v3428_v41  ;;  %v8817_v25 = vpop.eup %4850  ;;  %4870 = vpow2.f32 %v11285_v49  ;;  %v3228_v9 = vadd.f32 %v8358_v7, %v3227_v62  ;;  %4212 = vmatprep.subr.bf16.mxu0 %v4211_v26  ;;  %v4213_v11 = vpack.c.bf16 %v11248_v2, %v11242_v60  ;;  %v11288_v41 = vld [vmem:[#allocation136_spill] sm:$0xff]  ;;  %v11289_v62 = vld [vmem:[#allocation135_spill] sm:$0xff] }
 0x4b9   : > { %4340 = vmatprep.subr.bf16.mxu1 %v4339_v30  ;;  %v4341_v40 = vpack.c.bf16 %v11279_v58, %v11273_v46  ;;  %v8825_v52 = vpop.eup %4852  ;;  %4872 = vpow2.f32 %v8057_v34  ;;  %v3292_v12 = vadd.f32 %v11286_v50, %v3291_v31  ;;  %v3361_v48 = vadd.f32 %v11287_v14, %v3360_v10  ;;  %v11290_v46 = vld [vmem:[#allocation137_spill] sm:$0xff] }
 0x4ba   : > { %v3430_v5 = vadd.f32 %v11288_v41, %v3429_v54  ;;  %v8831_v49 = vpop.eup %4854  ;;  %4874 = vpow2.f32 %v11289_v62  ;;  %v3229_v26 = vadd.f32 %v8422_v16, %v3228_v9  ;;  %4214 = vmatpush1.bf16.msra.mxu0 %v4213_v11  ;;  %v4215_v60 = vpack.c.bf16 %v11286_v50, %v11282_v8  ;;  %v11291_v54 = vld [vmem:[#allocation138_spill] sm:$0xff] }
 0x4bb   : > { %4342 = vmatpush1.bf16.msra.mxu1 %v4341_v40  ;;  %v4343_v34 = vpack.c.bf16 %v11288_v41, %v11284_v17  ;;  %v8839_v2 = vpop.eup %4856  ;;  %4876 = vpow2.f32 %v11290_v46  ;;  %v3293_v58 = vadd.f32 %v8095_v33, %v3292_v12  ;;  %v3362_v30 = vadd.f32 %v8113_v56, %v3361_v48  ;;  %v11292_v40 = vld [vmem:[#allocation140_spill] sm:$0xff] }
 0x4bc   : > { %v3431_v31 = vadd.f32 %v8131_v28, %v3430_v5  ;;  %v8845_v10 = vpop.eup %4858  ;;  %4878 = vpow2.f32 %v11291_v54  ;;  %v3230_v9 = vadd.f32 %v8486_v38, %v3229_v26  ;;  %4216 = vmatprep.subr.bf16.mxu0 %v4215_v60  ;;  %v4217_v8 = vpack.c.bf16 %v8005_v4, %v11255_v45  ;;  %v11293_v5 = vld [vmem:[#allocation139_spill] sm:$0xff] }
 0x4bd   : > { %4344 = vmatprep.subr.bf16.mxu1 %v4343_v34  ;;  %v4345_v17 = vpack.c.bf16 %v11287_v14, %v11283_v6  ;;  %v8853_v11 = vpop.eup %4860  ;;  %4880 = vpow2.f32 %v11292_v40  ;;  %v3294_v50 = vadd.f32 %v8167_v36, %v3293_v58  ;;  %v3363_v12 = vadd.f32 %v8185_v51, %v3362_v30  ;;  %v11294_v14 = vld [vmem:[#allocation141_spill] sm:$0xff]  ;;  %v11295_v58 = vld [vmem:[#allocation142_spill] sm:$0xff]  ;;  %v11297_v54 = vld [vmem:[#allocation179_spill] sm:$0xff] }
 0x4be   : > { %v3432_v48 = vadd.f32 %v8203_v18, %v3431_v31  ;;  %v8859_v41 = vpop.eup %4862  ;;  %4882 = vpow2.f32 %v11293_v5  ;;  %v3231_v62 = vadd.f32 %v8517_v15, %v3230_v9  ;;  %4218 = vmatpush1.bf16.msra.mxu0 %v4217_v8  ;;  %v4219_v4 = vpack.c.bf16 %v8167_v36, %v8095_v33  ;;  %v11298_v8 = vld [vmem:[#allocation183_spill] sm:$0xff] }
 0x4bf   : > { %4346 = vmatpush1.bf16.msra.mxu1 %v4345_v17  ;;  %v4347_v45 = vpack.c.bf16 %v8203_v18, %v8131_v28  ;;  %v8867_v6 = vpop.eup %4864  ;;  %4884 = vpow2.f32 %v11294_v14  ;;  %v3295_v26 = vadd.f32 %v8239_v43, %v3294_v50  ;;  %v3364_v60 = vadd.f32 %v8257_v24, %v3363_v12  ;;  %v11296_v18 = vld [vmem:[#allocation144_spill] sm:$0xff]  ;;  %v11299_v50 = vld [vmem:[#allocation143_spill] sm:$0xff] }
 0x4c0   : > { %v3433_v34 = vadd.f32 %v8275_v22, %v3432_v48  ;;  %v8873_v46 = vpop.eup %4866  ;;  %4886 = vpow2.f32 %v11295_v58  ;;  %v3232_v30 = vadd.f32 %v8545_v37, %v3231_v62  ;;  %4220 = vmatprep.subr.bf16.mxu0 %v4219_v4  ;;  %v4221_v33 = vpack.c.bf16 %v8149_v57, %v8077_v23  ;;  %v11301_v48 = vld [vmem:[#allocation190_spill] sm:$0xff]  ;;  %v11302_v62 = vld [vmem:[#allocation193_spill] sm:$0xff]  ;;  %v11305_v58 = vld [vmem:[#allocation148_spill] sm:$0xff] }
 0x4c1   : > { %4348 = vmatprep.subr.bf16.mxu1 %v4347_v45  ;;  %v4349_v28 = vpack.c.bf16 %v8185_v51, %v8113_v56  ;;  %v8881_v36 = vpop.eup %4868  ;;  %4888 = vpow2.f32 %v11296_v18  ;;  %v3296_v31 = vadd.f32 %v8311_v3, %v3295_v26  ;;  %v3365_v9 = vadd.f32 %v11297_v54, %v3364_v60  ;;  %v11300_v51 = vld [vmem:[#allocation145_spill] sm:$0xff]  ;;  %v11304_v60 = vld [vmem:[#allocation146_spill] sm:$0xff] }
 0x4c2   : > { %v3434_v17 = vadd.f32 %v11298_v8, %v3433_v34  ;;  %v8887_v40 = vpop.eup %4870  ;;  %4890 = vpow2.f32 %v11299_v50  ;;  %v3233_v12 = vadd.f32 %v8573_v29, %v3232_v30  ;;  %4222 = vmatpush1.bf16.msra.mxu0 %v4221_v33  ;;  %v4223_v23 = vpack.c.bf16 %v8311_v3, %v8239_v43  ;;  %v11303_v45 = vld [vmem:[#allocation197_spill] sm:$0xff]  ;;  %v11306_v30 = vld [vmem:[#allocation204_spill] sm:$0xff] }
 0x4c3   : > { %4350 = vmatpush1.bf16.msra.mxu1 %v4349_v28  ;;  %v4351_v56 = vpack.c.bf16 %v11298_v8, %v8275_v22  ;;  %v8895_v57 = vpop.eup %4872  ;;  %4892 = vpow2.f32 %v11300_v51  ;;  %v3297_v5 = vadd.f32 %v11301_v48, %v3296_v31  ;;  %v3366_v4 = vadd.f32 %v11302_v62, %v3365_v9  ;;  %v11307_v28 = vld [vmem:[#allocation206_spill] sm:$0xff] }
 0x4c4   : > { %v3435_v14 = vadd.f32 %v11303_v45, %v3434_v17  ;;  %v8901_v26 = vpop.eup %4874  ;;  %4894 = vpow2.f32 %v11304_v60  ;;  %v3234_v34 = vadd.f32 %v8601_v39, %v3233_v12  ;;  %4224 = vmatprep.subr.bf16.mxu0 %v4223_v23  ;;  %v4225_v43 = vpack.c.bf16 %v8293_v42, %v8221_v47  ;;  %v11308_v31 = vld [vmem:[#allocation210_spill] sm:$0xff]  ;;  %v11309_v17 = vld [vmem:[#allocation147_spill] sm:$0xff]  ;;  %v11311_v12 = vld [vmem:[#allocation213_spill] sm:$0xff] }
 0x4c5   : > { %4352 = vmatprep.subr.bf16.mxu1 %v4351_v56  ;;  %v4353_v22 = vpack.c.bf16 %v11297_v54, %v8257_v24  ;;  %v8909_v3 = vpop.eup %4876  ;;  %4896 = vpow2.f32 %v11305_v58  ;;  %v3298_v33 = vadd.f32 %v11306_v30, %v3297_v5  ;;  %v3367_v18 = vadd.f32 %v11307_v28, %v3366_v4  ;;  %v11310_v54 = vld [vmem:[#allocation149_spill] sm:$0xff]  ;;  %v11312_v56 = vld [vmem:[#allocation214_spill] sm:$0xff]  ;;  %v11313_v5 = vld [vmem:[#allocation216_spill] sm:$0xff] }
 0x4c6   : > { %v3436_v9 = vadd.f32 %v11308_v31, %v3435_v14  ;;  %v8915_v8 = vpop.eup %4878  ;;  %4898 = vpow2.f32 %v11309_v17  ;;  %v3235_v50 = vadd.f32 %v8629_v53, %v3234_v34  ;;  %4226 = vmatpush1.bf16.msra.mxu0 %v4225_v43  ;;  %v4227_v47 = vpack.c.bf16 %v11306_v30, %v11301_v48  ;;  %v11314_v60 = vld [vmem:[#allocation150_spill] sm:$0xff]  ;;  %v11316_v58 = vld [vmem:[#allocation215_spill] sm:$0xff] }
 0x4c7   : > { %4354 = vmatpush1.bf16.msra.mxu1 %v4353_v22  ;;  %v4355_v24 = vpack.c.bf16 %v11308_v31, %v11303_v45  ;;  %v8923_v42 = vpop.eup %4880  ;;  %4900 = vpow2.f32 %v11310_v54  ;;  %v3299_v23 = vadd.f32 %v11311_v12, %v3298_v33  ;;  %v3368_v51 = vadd.f32 %v11312_v56, %v3367_v18  ;;  %v11315_v22 = vld [vmem:[#allocation152_spill] sm:$0xff]  ;;  %v11317_v33 = vld [vmem:[#allocation217_spill] sm:$0xff]  ;;  %v11318_v31 = vld [vmem:[#allocation218_spill] sm:$0xff] }
 0x4c8   : > { %v3437_v4 = vadd.f32 %v11313_v5, %v3436_v9  ;;  %v8929_v14 = vpop.eup %4882  ;;  %4902 = vpow2.f32 %v11314_v60  ;;  %v3236_v34 = vadd.f32 %v8657_v27, %v3235_v50  ;;  %4228 = vmatprep.subr.bf16.mxu0 %v4227_v47  ;;  %v4229_v48 = vpack.c.bf16 %v8422_v16, %v8358_v7  ;;  %v11319_v50 = vld [vmem:[#allocation151_spill] sm:$0xff] }
 0x4c9   : > { %4356 = vmatprep.subr.bf16.mxu1 %v4355_v24  ;;  %v4357_v45 = vpack.c.bf16 %v11307_v28, %v11302_v62  ;;  %v8937_v43 = vpop.eup %4884  ;;  %4904 = vpow2.f32 %v11315_v22  ;;  %v3300_v30 = vadd.f32 %v11316_v58, %v3299_v23  ;;  %v3369_v18 = vadd.f32 %v11317_v33, %v3368_v51  ;;  %v11320_v28 = vld [vmem:[#allocation153_spill] sm:$0xff]  ;;  %v11321_v24 = vld [vmem:[#allocation220_spill] sm:$0xff]  ;;  %v11322_v23 = vld [vmem:[#allocation219_spill] sm:$0xff] }
 0x4ca   : > { %v3438_v9 = vadd.f32 %v11318_v31, %v3437_v4  ;;  %v8943_v17 = vpop.eup %4886  ;;  %4906 = vpow2.f32 %v11319_v50  ;;  %v3237_v47 = vadd.f32 %v8685_v32, %v3236_v34  ;;  %4230 = vmatpush1.bf16.msra.mxu0 %v4229_v48  ;;  %v4231_v7 = vpack.c.bf16 %v11316_v58, %v11311_v12  ;;  %v11323_v4 = vld [vmem:[#allocation221_spill] sm:$0xff]  ;;  %v11324_v34 = vld [vmem:[#allocation154_spill] sm:$0xff]  ;;  %v11325_v58 = vld [vmem:[#allocation156_spill] sm:$0xff] }
 0x4cb   : > { %4358 = vmatpush1.bf16.msra.mxu1 %v4357_v45  ;;  %v4359_v16 = vpack.c.bf16 %v11318_v31, %v11313_v5  ;;  %v8951_v62 = vpop.eup %4888  ;;  %4908 = vpow2.f32 %v11320_v28  ;;  %v3301_v54 = vadd.f32 %v11321_v24, %v3300_v30  ;;  %v3370_v51 = vadd.f32 %v11322_v23, %v3369_v18  ;;  %v11326_v30 = vld [vmem:[#allocation222_spill] sm:$0xff]  ;;  %v11328_v28 = vld [vmem:[#allocation17_spill] sm:$0xff] }
 0x4cc   : > { %v3439_v60 = vadd.f32 %v11323_v4, %v3438_v9  ;;  %v8957_v22 = vpop.eup %4890  ;;  %4910 = vpow2.f32 %v11324_v34  ;;  %v3238_v48 = vadd.f32 %v8713_v44, %v3237_v47  ;;  %4232 = vmatprep.subr.bf16.mxu0 %v4231_v7  ;;  %v4233_v12 = vpack.c.bf16 %v8517_v15, %v8486_v38  ;;  %v11327_v9 = vld [vmem:[#allocation224_spill] sm:$0xff]  ;;  %v11329_v38 = vld [vmem:[#allocation155_spill] sm:$0xff]  ;;  %v11333_v34 = vld [vmem:[#allocation225_spill] sm:$0xff] }
 0x4cd   : > { %4360 = vmatprep.subr.bf16.mxu1 %v4359_v16  ;;  %v4361_v5 = vpack.c.bf16 %v11317_v33, %v11312_v56  ;;  %v8965_v45 = vpop.eup %4892  ;;  %4912 = vpow2.f32 %v11325_v58  ;;  %v3302_v18 = vadd.f32 %v11326_v30, %v3301_v54  ;;  %v3371_v31 = vadd.f32 %v8587_v19, %v3370_v51  ;;  %3604 = vmatmul.mubr.f32.vlgmr.msra.gmra.mrb[134].mxu0 %v11328_v28  ;;  %v11330_v56 = vld [vmem:[#allocation19_spill] sm:$0xff]  ;;  %v11331_v54 = vld [vmem:[#allocation157_spill] sm:$0xff] }
 0x4ce   : > { %v3440_v50 = vadd.f32 %v11327_v9, %v3439_v60  ;;  %3746 = vmatmul.mubr.f32.vlgmr.msra.gmra.mrb[134].mxu1 %v11328_v28  ;;  %v8973_v47 = vpop.eup %4894  ;;  %4914 = vpow2.f32 %v11329_v38  ;;  %v3239_v15 = vadd.f32 %v8741_v13, %v3238_v48  ;;  %4234 = vmatpush1.bf16.msra.mxu0 %v4233_v12  ;;  %v4235_v33 = vpack.c.bf16 %v11326_v30, %v11321_v24  ;;  %v11332_v51 = vld [vmem:[#allocation223_spill] sm:$0xff]  ;;  %v11334_v28 = vld [vmem:[#allocation226_spill] sm:$0xff] }
 0x4cf   : > { %3674 = vmatprep.mubr.f32.mxu0 %v11330_v56  ;;  %v4363_v7 = vpack.c.bf16 %v11327_v9, %v11323_v4  ;;  %v8982_v16 = vpop.eup %4896  ;;  %4916 = vpow2.f32 %v11331_v54  ;;  %v3303_v60 = vadd.f32 %v11332_v51, %v3302_v18  ;;  %v3372_v58 = vadd.f32 %v11333_v34, %v3371_v31  ;;  %4362 = vmatpush1.bf16.msra.mxu1 %v4361_v5  ;;  %v11336_v12 = vld [vmem:[#allocation158_spill] sm:$0xff]  ;;  %v11337_v31 = vld [vmem:[#allocation160_spill] sm:$0xff]  ;;  %v11340_v54 = vld [vmem:[#allocation229_spill] sm:$0xff] }
 0x4d0   : > { %v3441_v38 = vadd.f32 %v11334_v28, %v3440_v50  ;;  %3816 = vmatprep.mubr.f32.mxu1 %v11330_v56  ;;  %v8989_v48 = vpop.eup %4898  ;;  %4918 = vpow2.f32 %v11336_v12  ;;  %v3240_v24 = vadd.f32 %v8769_v61, %v3239_v15  ;;  %4236 = vmatprep.subr.bf16.mxu0 %v4235_v33  ;;  %v4237_v4 = vpack.c.bf16 %v8573_v29, %v8545_v37  ;;  %v11338_v5 = vld [vmem:[#allocation228_spill] sm:$0xff]  ;;  %v11339_v50 = vld [vmem:[#allocation227_spill] sm:$0xff] }
 0x4d1   : > { %11335 = vst [vmem:[#allocation241_spill] sm:$0xff] %v8989_v48  ;;  %4364 = vmatprep.subr.bf16.mxu1 %v4363_v7  ;;  %v4365_v30 = vpack.c.bf16 %v8587_v19, %v11322_v23  ;;  %v8997_v18 = vpop.eup %4900  ;;  %4920 = vpow2.f32 %v11337_v31  ;;  %v3304_v9 = vadd.f32 %v11338_v5, %v3303_v60  ;;  %v3373_v56 = vadd.f32 %v11339_v50, %v3372_v58  ;;  %v11341_v15 = vld [vmem:[#allocation159_spill] sm:$0xff]  ;;  %v11342_v23 = vld [vmem:[#allocation161_spill] sm:$0xff]  ;;  %v11343_v7 = vld [vmem:[#allocation230_spill] sm:$0xff] }
 0x4d2   : > { %v3442_v12 = vadd.f32 %v11340_v54, %v3441_v38  ;;  %v9003_v48 = vpop.eup %4902  ;;  %4922 = vpow2.f32 %v11341_v15  ;;  %v3241_v33 = vadd.f32 %v8797_v1, %v3240_v24  ;;  %4238 = vmatpush1.bf16.msra.mxu0 %v4237_v4  ;;  %v4239_v37 = vpack.c.bf16 %v11338_v5, %v11332_v51  ;;  %v11344_v38 = vld [vmem:[#allocation232_spill] sm:$0xff]  ;;  %v11346_v24 = vld [vmem:[#allocation162_spill] sm:$0xff] }
 0x4d3   : > { %v4367_v29 = vpack.c.bf16 %v11340_v54, %v11334_v28  ;;  %v9011_v19 = vpop.eup %4904  ;;  %4924 = vpow2.f32 %v11342_v23  ;;  %v3305_v60 = vadd.f32 %v11343_v7, %v3304_v9  ;;  %v3374_v58 = vadd.f32 %v8671_v63, %v3373_v56  ;;  %4366 = vmatpush1.bf16.msra.mxu1 %v4365_v30  ;;  %v11347_v9 = vld [vmem:[#allocation164_spill] sm:$0xff]  ;;  %v11348_v56 = vld [vmem:[#allocation231_spill] sm:$0xff]  ;;  %v11349_v54 = vld [vmem:[#allocation233_spill] sm:$0xff] }
 0x4d4   : > { %v3443_v31 = vadd.f32 %v11344_v38, %v3442_v12  ;;  %v9017_v15 = vpop.eup %4906  ;;  %4926 = vpow2.f32 %v11346_v24  ;;  %v3242_v51 = vadd.f32 %v8825_v52, %v3241_v33  ;;  %4240 = vmatprep.subr.bf16.mxu0 %v4239_v37  ;;  %v4241_v28 = vpack.c.bf16 %v8629_v53, %v8601_v39  ;;  %v11350_v23 = vld [vmem:[#allocation234_spill] sm:$0xff]  ;;  %v11351_v33 = vld [vmem:[#allocation163_spill] sm:$0xff] }
 0x4d5   : > { %11345 = vst [vmem:[#allocation254_spill] sm:$0xff] %v9017_v15  ;;  %4368 = vmatprep.subr.bf16.mxu1 %v4367_v29  ;;  %v4369_v4 = vpack.c.bf16 %v11339_v50, %v11333_v34  ;;  %v9025_v5 = vpop.eup %4908  ;;  %4928 = vpow2.f32 %v11347_v9  ;;  %v3306_v30 = vadd.f32 %v11348_v56, %v3305_v60  ;;  %v3375_v12 = vadd.f32 %v11349_v54, %v3374_v58  ;;  %v11352_v50 = vld [vmem:[#allocation165_spill] sm:$0xff]  ;;  %v11353_v29 = vld [vmem:[#allocation236_spill] sm:$0xff] }
 0x4d6   : > { %v3444_v24 = vadd.f32 %v11350_v23, %v3443_v31  ;;  %v9031_v15 = vpop.eup %4910  ;;  %4930 = vpow2.f32 %v11351_v33  ;;  %v3243_v37 = vadd.f32 %v8853_v11, %v3242_v51  ;;  %4242 = vmatpush1.bf16.msra.mxu0 %v4241_v28  ;;  %v4243_v39 = vpack.c.bf16 %v11348_v56, %v11343_v7  ;;  %v11354_v31 = vld [vmem:[#allocation238_spill] sm:$0xff] }
 0x4d7   : > { %v4371_v53 = vpack.c.bf16 %v11350_v23, %v11344_v38  ;;  %v9039_v34 = vpop.eup %4912  ;;  %4932 = vpow2.f32 %v11352_v50  ;;  %v3307_v60 = vadd.f32 %v11353_v29, %v3306_v30  ;;  %v3376_v58 = vadd.f32 %v8727_v59, %v3375_v12  ;;  %4370 = vmatpush1.bf16.msra.mxu1 %v4369_v4  ;;  %v11355_v51 = vld [vmem:[#allocation166_spill] sm:$0xff]  ;;  %v11356_v30 = vld [vmem:[#allocation168_spill] sm:$0xff] }
 0x4d8   : > { %v3445_v9 = vadd.f32 %v11354_v31, %v3444_v24  ;;  %v9045_v33 = vpop.eup %4914  ;;  %4934 = vpow2.f32 %v11355_v51  ;;  %v3244_v7 = vadd.f32 %v8881_v36, %v3243_v37  ;;  %4244 = vmatprep.subr.bf16.mxu0 %v4243_v39  ;;  %v4245_v38 = vpack.c.bf16 %v8685_v32, %v8657_v27  ;;  %v11357_v12 = vld [vmem:[#allocation240_spill] sm:$0xff]  ;;  %v11358_v24 = vld [vmem:[#allocation85_spill] sm:$0xff]  ;;  %v11359_v37 = vld [vmem:[#allocation167_spill] sm:$0xff] }
 0x4d9   : > { %4372 = vmatprep.subr.bf16.mxu1 %v4371_v53  ;;  %v4373_v28 = vpack.c.bf16 %v11349_v54, %v8671_v63  ;;  %v9053_v56 = vpop.eup %4916  ;;  %4936 = vpow2.f32 %v11356_v30  ;;  %v3308_v4 = vadd.f32 %v11357_v12, %v3307_v60  ;;  %v3377_v23 = vadd.f32 %v8755_v55, %v3376_v58  ;;  %v11360_v54 = vld [vmem:[#allocation169_spill] sm:$0xff]  ;;  %v11361_v58 = vld [vmem:[#allocation239_spill] sm:$0xff] }
 0x4da   : > { %v3446_v50 = vadd.f32 %v11358_v24, %v3445_v9  ;;  %v9059_v51 = vpop.eup %4918  ;;  %4938 = vpow2.f32 %v11359_v37  ;;  %v3245_v39 = vadd.f32 %v8909_v3, %v3244_v7  ;;  %4246 = vmatpush1.bf16.msra.mxu0 %v4245_v38  ;;  %v4247_v27 = vpack.c.bf16 %v11357_v12, %v11353_v29  ;;  %v11362_v7 = vld [vmem:[#allocation170_spill] sm:$0xff]  ;;  %v11364_v37 = vld [vmem:[#allocation171_spill] sm:$0xff] }
 0x4db   : > { %v4375_v63 = vpack.c.bf16 %v11358_v24, %v11354_v31  ;;  %v9067_v32 = vpop.eup %4920  ;;  %4940 = vpow2.f32 %v11360_v54  ;;  %v3309_v53 = vadd.f32 %v8775_v0, %v3308_v4  ;;  %v3378_v60 = vadd.f32 %v8783_v20, %v3377_v23  ;;  %4374 = vmatpush1.bf16.msra.mxu1 %v4373_v28  ;;  %v11363_v4 = vld [vmem:[#allocation172_spill] sm:$0xff] }
 0x4dc   : > { %v3447_v9 = vadd.f32 %v11361_v58, %v3446_v50  ;;  %v9073_v30 = vpop.eup %4922  ;;  %4942 = vpow2.f32 %v11362_v7  ;;  %v3246_v29 = vadd.f32 %v8937_v43, %v3245_v39  ;;  %4248 = vmatprep.subr.bf16.mxu0 %v4247_v27  ;;  %v4249_v31 = vpack.c.bf16 %v8741_v13, %v8713_v44 }
 0x4dd   : > { %4376 = vmatprep.subr.bf16.mxu1 %v4375_v63  ;;  %v4377_v38 = vpack.c.bf16 %v8755_v55, %v8727_v59  ;;  %v9081_v12 = vpop.eup %4924  ;;  %4944 = vpow2.f32 %v11363_v4  ;;  %v3310_v28 = vadd.f32 %v8803_v35, %v3309_v53  ;;  %v3379_v23 = vadd.f32 %v8811_v21, %v3378_v60  ;;  %v11365_v55 = vld [vmem:[#allocation173_spill] sm:$0xff]  ;;  %v11366_v60 = vld [vmem:[#allocation174_spill] sm:$0xff]  ;;  %v11368_v4 = vld [vmem:[#allocation175_spill] sm:$0xff] }
 0x4de   : > { %v3448_v24 = vadd.f32 %v8817_v25, %v3447_v9  ;;  %v9087_v50 = vpop.eup %4926  ;;  %4946 = vpow2.f32 %v11364_v37  ;;  %v3247_v39 = vadd.f32 %v8965_v45, %v3246_v29  ;;  %4250 = vmatpush1.bf16.msra.mxu0 %v4249_v31  ;;  %v4251_v44 = vpack.c.bf16 %v8803_v35, %v8775_v0  ;;  %v11367_v9 = vld [vmem:[#allocation176_spill] sm:$0xff] }
 0x4df   : > { %v4379_v59 = vpack.c.bf16 %v8817_v25, %v11361_v58  ;;  %v9095_v13 = vpop.eup %4928  ;;  %4948 = vpow2.f32 %v11365_v55  ;;  %v3311_v27 = vadd.f32 %v8831_v49, %v3310_v28  ;;  %v3380_v63 = vadd.f32 %v8839_v2, %v3379_v23  ;;  %4378 = vmatpush1.bf16.msra.mxu1 %v4377_v38 }
 0x4e0   : > { %v3449_v54 = vadd.f32 %v8845_v10, %v3448_v24  ;;  %v9101_v53 = vpop.eup %4930  ;;  %4950 = vpow2.f32 %v11366_v60  ;;  %v3248_v0 = vadd.f32 %v8997_v18, %v3247_v39  ;;  %4252 = vmatprep.subr.bf16.mxu0 %v4251_v44  ;;  %v4253_v35 = vpack.c.bf16 %v8797_v1, %v8769_v61  ;;  %v11370_v44 = vld [vmem:[#allocation178_spill] sm:$0xff]  ;;  %v11372_v60 = vld [vmem:[#allocation181_spill] sm:$0xff] }
 0x4e1   : > { %4380 = vmatprep.subr.bf16.mxu1 %v4379_v59  ;;  %v4381_v25 = vpack.c.bf16 %v8811_v21, %v8783_v20  ;;  %v9109_v58 = vpop.eup %4932  ;;  %4952 = vpow2.f32 %v11367_v9  ;;  %v3312_v7 = vadd.f32 %v8859_v41, %v3311_v27  ;;  %v3381_v29 = vadd.f32 %v8867_v6, %v3380_v63  ;;  %v11369_v21 = vld [vmem:[#allocation177_spill] sm:$0xff]  ;;  %v11371_v59 = vld [vmem:[#allocation180_spill] sm:$0xff] }
 0x4e2   : > { %v3450_v31 = vadd.f32 %v8873_v46, %v3449_v54  ;;  %v9115_v38 = vpop.eup %4934  ;;  %4954 = vpow2.f32 %v11368_v4  ;;  %v3249_v28 = vadd.f32 %v9025_v5, %v3248_v0  ;;  %4254 = vmatpush1.bf16.msra.mxu0 %v4253_v35  ;;  %v4255_v61 = vpack.c.bf16 %v8859_v41, %v8831_v49 }
 0x4e3   : > { %v4383_v20 = vpack.c.bf16 %v8873_v46, %v8845_v10  ;;  %v9123_v1 = vpop.eup %4936  ;;  %4956 = vpow2.f32 %v11369_v21  ;;  %v3313_v23 = vadd.f32 %v8887_v40, %v3312_v7  ;;  %v3382_v24 = vadd.f32 %v8895_v57, %v3381_v29  ;;  %4382 = vmatpush1.bf16.msra.mxu1 %v4381_v25  ;;  %v11374_v29 = vld [vmem:[#allocation184_spill] sm:$0xff] }
 0x4e4   : > { %v3451_v37 = vadd.f32 %v8901_v26, %v3450_v31  ;;  %v9129_v39 = vpop.eup %4938  ;;  %4958 = vpow2.f32 %v11370_v44  ;;  %v3250_v49 = vadd.f32 %v9053_v56, %v3249_v28  ;;  %4256 = vmatprep.subr.bf16.mxu0 %v4255_v61  ;;  %v4257_v10 = vpack.c.bf16 %v8853_v11, %v8825_v52  ;;  %v11375_v31 = vld [vmem:[#allocation185_spill] sm:$0xff] }
 0x4e5   : > { %4384 = vmatprep.subr.bf16.mxu1 %v4383_v20  ;;  %v4385_v41 = vpack.c.bf16 %v8867_v6, %v8839_v2  ;;  %v9137_v46 = vpop.eup %4940  ;;  %4960 = vpow2.f32 %v11371_v59  ;;  %v3314_v55 = vadd.f32 %v8915_v8, %v3313_v23  ;;  %v3383_v27 = vadd.f32 %v8923_v42, %v3382_v24  ;;  %v11373_v6 = vld [vmem:[#allocation182_spill] sm:$0xff]  ;;  %v11376_v61 = vld [vmem:[#allocation241_spill] sm:$0xff]  ;;  %v11380_v59 = vld [vmem:[#allocation187_spill] sm:$0xff] }
 0x4e6   : > { %v3452_v63 = vadd.f32 %v8929_v14, %v3451_v37  ;;  %v9143_v54 = vpop.eup %4942  ;;  %4962 = vpow2.f32 %v11372_v60  ;;  %v3251_v0 = vadd.f32 %v9081_v12, %v3250_v49  ;;  %4258 = vmatpush1.bf16.msra.mxu0 %v4257_v10  ;;  %v4259_v52 = vpack.c.bf16 %v8915_v8, %v8887_v40  ;;  %v11377_v23 = vld [vmem:[#allocation186_spill] sm:$0xff] }
 0x4e7   : > { %v4387_v2 = vpack.c.bf16 %v8929_v14, %v8901_v26  ;;  %v9151_v11 = vpop.eup %4944  ;;  %4964 = vpow2.f32 %v11373_v6  ;;  %v3315_v35 = vadd.f32 %v8943_v17, %v3314_v55  ;;  %v3384_v25 = vadd.f32 %v8951_v62, %v3383_v27  ;;  %4386 = vmatpush1.bf16.msra.mxu1 %v4385_v41  ;;  %v11379_v49 = vld [vmem:[#allocation254_spill] sm:$0xff]  ;;  %v11381_v27 = vld [vmem:[#allocation189_spill] sm:$0xff] }
 0x4e8   : > { %v3453_v9 = vadd.f32 %v8957_v22, %v3452_v63  ;;  %v9157_v7 = vpop.eup %4946  ;;  %4966 = vpow2.f32 %v11374_v29  ;;  %v3252_v40 = vadd.f32 %v9109_v58, %v3251_v0  ;;  %4260 = vmatprep.subr.bf16.mxu0 %v4259_v52  ;;  %v4261_v26 = vpack.c.bf16 %v8909_v3, %v8881_v36 }
 0x4e9   : > { %4388 = vmatprep.subr.bf16.mxu1 %v4387_v2  ;;  %v4389_v8 = vpack.c.bf16 %v8923_v42, %v8895_v57  ;;  %v9165_v14 = vpop.eup %4948  ;;  %4968 = vpow2.f32 %v11375_v31  ;;  %v3316_v4 = vadd.f32 %v8973_v47, %v3315_v35  ;;  %v3385_v28 = vadd.f32 %v8982_v16, %v3384_v25  ;;  %v11378_v42 = vld [vmem:[#allocation188_spill] sm:$0xff] }
 0x4ea   : > { %v3454_v20 = vadd.f32 %v11376_v61, %v3453_v9  ;;  %v9171_v21 = vpop.eup %4950  ;;  %4970 = vpow2.f32 %v11377_v23  ;;  %v3253_v24 = vadd.f32 %v9137_v46, %v3252_v40  ;;  %4262 = vmatpush1.bf16.msra.mxu0 %v4261_v26  ;;  %v4263_v36 = vpack.c.bf16 %v8973_v47, %v8943_v17  ;;  %v11382_v2 = vld [vmem:[#allocation192_spill] sm:$0xff]  ;;  %v11384_v40 = vld [vmem:[#allocation194_spill] sm:$0xff] }
 0x4eb   : > { %v4391_v57 = vpack.c.bf16 %v11376_v61, %v8957_v22  ;;  %v9179_v3 = vpop.eup %4952  ;;  %4972 = vpow2.f32 %v11378_v42  ;;  %v3317_v37 = vadd.f32 %v9003_v48, %v3316_v4  ;;  %v3386_v44 = vadd.f32 %v9011_v19, %v3385_v28  ;;  %4390 = vmatpush1.bf16.msra.mxu1 %v4389_v8  ;;  %v11385_v8 = vld [vmem:[#allocation196_spill] sm:$0xff]  ;;  %v11389_v42 = vld [vmem:[#allocation199_spill] sm:$0xff] }
 0x4ec   : > { %v3455_v10 = vadd.f32 %v11379_v49, %v3454_v20  ;;  %v9185_v41 = vpop.eup %4954  ;;  %4974 = vpow2.f32 %v11380_v59  ;;  %v3254_v17 = vadd.f32 %v9165_v14, %v3253_v24  ;;  %4264 = vmatprep.subr.bf16.mxu0 %v4263_v36  ;;  %v4265_v22 = vpack.c.bf16 %v8965_v45, %v8937_v43  ;;  %v11386_v20 = vld [vmem:[#allocation195_spill] sm:$0xff]  ;;  %v11390_v59 = vld [vmem:[#allocation201_spill] sm:$0xff] }
 0x4ed   : > { %4392 = vmatprep.subr.bf16.mxu1 %v4391_v57  ;;  %v4393_v47 = vpack.c.bf16 %v8982_v16, %v8951_v62  ;;  %v9193_v55 = vpop.eup %4956  ;;  %4976 = vpow2.f32 %v11381_v27  ;;  %v3318_v63 = vadd.f32 %v9031_v15, %v3317_v37  ;;  %v3387_v60 = vadd.f32 %v9039_v34, %v3386_v44  ;;  %v11383_v16 = vld [vmem:[#allocation191_spill] sm:$0xff]  ;;  %v11388_v57 = vld [vmem:[#allocation200_spill] sm:$0xff] }
 0x4ee   : > { %v3456_v0 = vadd.f32 %v9045_v33, %v3455_v10  ;;  %v9199_v52 = vpop.eup %4958  ;;  %4978 = vpow2.f32 %v11382_v2  ;;  %v3255_v6 = vadd.f32 %v9193_v55, %v3254_v17  ;;  %4266 = vmatpush1.bf16.msra.mxu0 %v4265_v22  ;;  %v4267_v43 = vpack.c.bf16 %v9031_v15, %v9003_v48  ;;  %v11391_v17 = vld [vmem:[#allocation202_spill] sm:$0xff]  ;;  %v11392_v27 = vld [vmem:[#allocation203_spill] sm:$0xff] }
 0x4ef   : > { %v4395_v62 = vpack.c.bf16 %v9045_v33, %v11379_v49  ;;  %v9207_v45 = vpop.eup %4960  ;;  %4980 = vpow2.f32 %v11383_v16  ;;  %v3319_v35 = vadd.f32 %v9059_v51, %v3318_v63  ;;  %v3388_v25 = vadd.f32 %v9067_v32, %v3387_v60  ;;  %4394 = vmatpush1.bf16.msra.mxu1 %v4393_v47  ;;  %v11393_v63 = vld [vmem:[#allocation205_spill] sm:$0xff] }
 0x4f0   : > { %v3457_v9 = vadd.f32 %v9073_v30, %v3456_v0  ;;  %v9213_v29 = vpop.eup %4962  ;;  %4982 = vpow2.f32 %v11384_v40  ;;  %4268 = vmatprep.subr.bf16.mxu0 %v4267_v43  ;;  %v4269_v48 = vpack.c.bf16 %v9025_v5, %v8997_v18  ;;  %v4397_v15 = vpack.c.bf16 %v9039_v34, %v9011_v19  ;;  %v11394_v43 = vld [vmem:[#allocation208_spill] sm:$0xff] }
 0x4f1   : > { %4396 = vmatprep.subr.bf16.mxu1 %v4395_v62  ;;  %v4271_v33 = vpack.c.bf16 %v9087_v50, %v9059_v51  ;;  %v9222_v26 = vpop.eup %4964  ;;  %4984 = vpow2.f32 %v11385_v8  ;;  %v3320_v31 = vadd.f32 %v9087_v50, %v3319_v35  ;;  %v3389_v4 = vadd.f32 %v9095_v13, %v3388_v25  ;;  %v11387_v51 = vld [vmem:[#allocation198_spill] sm:$0xff]  ;;  %v11395_v62 = vld [vmem:[#allocation207_spill] sm:$0xff] }
 0x4f2   : > { %v3458_v28 = vadd.f32 %v9101_v53, %v3457_v9  ;;  %v9228_v61 = vpop.eup %4966  ;;  %4986 = vpow2.f32 %v11386_v20  ;;  %v3256_v18 = vadd.f32 %v9222_v26, %v3255_v6  ;;  %4270 = vmatpush1.bf16.msra.mxu0 %v4269_v48  ;;  %v4399_v19 = vpack.c.bf16 %v9101_v53, %v9073_v30  ;;  %v11396_v9 = vld [vmem:[#allocation209_spill] sm:$0xff]  ;;  %v11397_v48 = vld [vmem:[#allocation212_spill] sm:$0xff] }
 0x4f3   : > { %v4273_v5 = vpack.c.bf16 %v9081_v12, %v9053_v56  ;;  %v9236_v34 = vpop.eup %4968  ;;  %4988 = vpow2.f32 %v11387_v51  ;;  %v3321_v50 = vadd.f32 %v9115_v38, %v3320_v31  ;;  %v3390_v23 = vadd.f32 %v9123_v1, %v3389_v4  ;;  %4398 = vmatpush1.bf16.msra.mxu1 %v4397_v15  ;;  %4272 = vmatprep.subr.bf16.mxu0 %v4271_v33  ;;  %v11398_v4 = vld [vmem:[#allocation211_spill] sm:$0xff] }
 0x4f4   : > { %v3459_v24 = vadd.f32 %v9129_v39, %v3458_v28  ;;  %v9242_v36 = vpop.eup %4970  ;;  %4990 = vpow2.f32 %v11388_v57  ;;  %4400 = vmatprep.subr.bf16.mxu1 %v4399_v19  ;;  %v4401_v56 = vpack.c.bf16 %v9095_v13, %v9067_v32  ;;  %v4275_v30 = vpack.c.bf16 %v9143_v54, %v9115_v38 }
 0x4f5   : > { %v4403_v12 = vpack.c.bf16 %v9157_v7, %v9129_v39  ;;  %v9251_v53 = vpop.eup %4972  ;;  %4992 = vpow2.f32 %v11389_v42  ;;  %v3322_v37 = vadd.f32 %v9143_v54, %v3321_v50  ;;  %v3391_v44 = vadd.f32 %v9151_v11, %v3390_v23 }
 0x4f6   : > { %v3460_v49 = vadd.f32 %v9157_v7, %v3459_v24  ;;  %v4975_v10 = vpop.eup %4974  ;;  %4994 = vpow2.f32 %v11390_v59  ;;  %v3257_v32 = vadd.f32 %v9251_v53, %v3256_v18  ;;  %4274 = vmatpush1.bf16.msra.mxu0 %v4273_v5  ;;  %v4277_v13 = vpack.c.bf16 %v9137_v46, %v9109_v58 }
 0x4f7   : > { %v4405_v38 = vpack.c.bf16 %v9151_v11, %v9123_v1  ;;  %v9263_v39 = vpop.eup %4976  ;;  %4996 = vpow2.f32 %v11391_v17  ;;  %v3323_v54 = vadd.f32 %v9171_v21, %v3322_v37  ;;  %v3392_v7 = vadd.f32 %v9179_v3, %v3391_v44  ;;  %4402 = vmatpush1.bf16.msra.mxu1 %v4401_v56  ;;  %4276 = vmatprep.subr.bf16.mxu0 %v4275_v30 }
 0x4f8   : > { %v3461_v22 = vadd.f32 %v9185_v41, %v3460_v49  ;;  %v4979_v47 = vpop.eup %4978  ;;  %4998 = vpow2.f32 %v11392_v27  ;;  %4404 = vmatprep.subr.bf16.mxu1 %v4403_v12  ;;  %v4279_v58 = vpack.c.bf16 %v9199_v52, %v9171_v21  ;;  %v4407_v1 = vpack.c.bf16 %v9213_v29, %v9185_v41 }
 0x4f9   : > { %v4281_v46 = vpack.c.bf16 %v9193_v55, %v9165_v14  ;;  %v9276_v11 = vpop.eup %4980  ;;  %5000 = vpow2.f32 %v11393_v63  ;;  %v3324_v60 = vadd.f32 %v9199_v52, %v3323_v54  ;;  %v3393_v0 = vadd.f32 %v9207_v45, %v3392_v7 }
 0x4fa   : > { %v3462_v2 = vadd.f32 %v9213_v29, %v3461_v22  ;;  %v4983_v6 = vpop.eup %4982  ;;  %5002 = vpow2.f32 %v11394_v43  ;;  %v3258_v21 = vadd.f32 %v9276_v11, %v3257_v32  ;;  %4278 = vmatpush1.bf16.msra.mxu0 %v4277_v13  ;;  %v4409_v41 = vpack.c.bf16 %v9207_v45, %v9179_v3 }
 0x4fb   : > { %v4283_v14 = vpack.c.bf16 %v4975_v10, %v9228_v61  ;;  %v4985_v55 = vpop.eup %4984  ;;  %5004 = vpow2.f32 %v11395_v62  ;;  %v3325_v52 = vadd.f32 %v9228_v61, %v3324_v60  ;;  %v3394_v16 = vadd.f32 %v9236_v34, %v3393_v0  ;;  %4406 = vmatpush1.bf16.msra.mxu1 %v4405_v38  ;;  %4280 = vmatprep.subr.bf16.mxu0 %v4279_v58  ;;  %v11399_v60 = vld [vmem:[#allocation243_spill] sm:$0xff]  ;;  %v11400_v0 = vld [vmem:[#allocation248_spill] sm:$0xff] }
 0x4fc   : > { %v3463_v35 = vadd.f32 %v9242_v36, %v3462_v2  ;;  %v4987_v25 = vpop.eup %4986  ;;  %5006 = vpow2.f32 %v11396_v9  ;;  %4408 = vmatprep.subr.bf16.mxu1 %v4407_v1  ;;  %v4411_v29 = vpack.c.bf16 %v4979_v47, %v9242_v36  ;;  %v4285_v3 = vpack.c.bf16 %v9251_v53, %v9222_v26 }
 0x4fd   : > { %v4413_v45 = vpack.c.bf16 %v9263_v39, %v9236_v34  ;;  %v4989_v40 = vpop.eup %4988  ;;  %5008 = vpow2.f32 %v11397_v48  ;;  %v3326_v15 = vadd.f32 %v4975_v10, %v3325_v52  ;;  %v3395_v33 = vadd.f32 %v9263_v39, %v3394_v16 }
 0x4fe   : > { %v3464_v8 = vadd.f32 %v4979_v47, %v3463_v35  ;;  %v4991_v31 = vpop.eup %4990  ;;  %5010 = vpow2.f32 %v11398_v4  ;;  %v3259_v28 = vadd.f32 %v4989_v40, %v3258_v21  ;;  %4282 = vmatpush1.bf16.msra.mxu0 %v4281_v46  ;;  %v4289_v61 = vpack.c.bf16 %v4989_v40, %v9276_v11 }
 0x4ff   : > { %v4993_v20 = vpop.eup %4992  ;;  %v3327_v18 = vadd.f32 %v4983_v6, %v3326_v15  ;;  %v3396_v26 = vadd.f32 %v4985_v55, %v3395_v33  ;;  %4410 = vmatpush1.bf16.msra.mxu1 %v4409_v41  ;;  %4284 = vmatprep.subr.bf16.mxu0 %v4283_v14  ;;  %v4287_v34 = vpack.c.bf16 %v4991_v31, %v4983_v6 }
 0x500   : > { %v3465_v19 = vadd.f32 %v4987_v25, %v3464_v8  ;;  %v4995_v5 = vpop.eup %4994  ;;  %4412 = vmatprep.subr.bf16.mxu1 %v4411_v29  ;;  %v4417_v51 = vpack.c.bf16 %v4993_v20, %v4985_v55  ;;  %v11401_v2 = vsub.f32 %v11399_v60, %v11400_v0  ;;  %v11402_v55 = vld [vmem:[#allocation18_spill] sm:$0xff]  ;;  %v3871_v0 = vld [vmem:[%s5383_s24 + $0x10] sm:$0xff] }
 0x501   : > { %v4997_v50 = vpop.eup %4996  ;;  %v3328_v23 = vadd.f32 %v4991_v31, %v3327_v18  ;;  %v3397_v24 = vadd.f32 %v4993_v20, %v3396_v26  ;;  %v4415_v57 = vpack.c.bf16 %v4995_v5, %v4987_v25  ;;  %v3197_v26 = vld [vmem:[#allocation4] sm:$0xf] }
 0x502   : > { %v3466_v36 = vadd.f32 %v4995_v5, %v3465_v19  ;;  %v4999_v56 = vpop.eup %4998  ;;  %v3260_v30 = vadd.f32 %v4997_v50, %v3259_v28  ;;  %4286 = vmatpush1.bf16.msra.mxu0 %v4285_v3  ;;  %v2406_v6 = vmul.f32 1.442695, %v11401_v2  ;;  %v11403_v28 = vld [vmem:[#allocation242_spill] sm:$0xff] }
 0x503   : > { %v5001_v12 = vpop.eup %5000  ;;  %v3329_v53 = vadd.f32 %v4999_v56, %v3328_v23  ;;  %4414 = vmatpush1.bf16.msra.mxu1 %v4413_v45  ;;  %4288 = vmatprep.subr.bf16.mxu0 %v4287_v34 }
 0x504   : > { %v5003_v42 = vpop.eup %5002  ;;  %v3398_v37 = vadd.f32 %v5001_v12, %v3397_v24  ;;  %4416 = vmatprep.subr.bf16.mxu1 %v4415_v57  ;;  %5012 = vpow2.f32 %v2406_v6  ;;  %v11405_v24 = vld [vmem:[#allocation244_spill] sm:$0xff]  ;;  %v11406_v57 = vld [vmem:[#allocation245_spill] sm:$0xff] }
 0x505   : > { %v5005_v44 = vpop.eup %5004  ;;  %v3467_v49 = vadd.f32 %v5003_v42, %v3466_v36 }
 0x506   : > { %v5007_v10 = vpop.eup %5006  ;;  %v3261_v59 = vadd.f32 %v5005_v44, %v3260_v30  ;;  %4290 = vmatpush1.bf16.msra.mxu0 %v4289_v61  ;;  %v4293_v32 = vpack.c.bf16 %v5005_v44, %v4997_v50  ;;  %v11407_v30 = vld [vmem:[#allocation246_spill] sm:$0xff] }
 0x507   : > { %v5009_v13 = vpop.eup %5008  ;;  %v3330_v38 = vadd.f32 %v5007_v10, %v3329_v53  ;;  %4418 = vmatpush1.bf16.msra.mxu1 %v4417_v51  ;;  %v4291_v39 = vpack.c.bf16 %v5007_v10, %v4999_v56  ;;  %v11408_v53 = vld [vmem:[#allocation247_spill] sm:$0xff] }
 0x508   : > { %v5011_v17 = vpop.eup %5010  ;;  %v3262_v54 = vrot.slane %v3261_v59, 4  ;;  %v3399_v7 = vadd.f32 %v5009_v13, %v3398_v37  ;;  %v4421_v22 = vpack.c.bf16 %v5009_v13, %v5001_v12 }
 0x509   : > { %v3331_v47 = vrot.slane %v3330_v38, 4  ;;  %v3468_v27 = vadd.f32 %v5011_v17, %v3467_v49  ;;  %4292 = vmatprep.subr.bf16.mxu0 %v4291_v39  ;;  %v4419_v58 = vpack.c.bf16 %v5011_v17, %v5003_v42 }
 0x50a   : > { %v3263_v1 = vadd.f32 %v3262_v54, %v3261_v59  ;;  %v3400_v46 = vrot.slane %v3399_v7, 4  ;;  %4294 = vmatpush1.bf16.msra.mxu0 %v4293_v32 }
 0x50b   : > { %v3332_v11 = vadd.f32 %v3331_v47, %v3330_v38  ;;  %v3469_v63 = vrot.slane %v3468_v27, 4  ;;  %4420 = vmatprep.subr.bf16.mxu1 %v4419_v58 }
 0x50c   : > { %v3264_v43 = vrot.slane %v3263_v1, 2  ;;  %v3401_v21 = vadd.f32 %v3400_v46, %v3399_v7  ;;  %4422 = vmatpush1.bf16.msra.mxu1 %v4421_v22  ;;  %v3869_v7 = vld [vmem:[%s5383_s24] sm:$0xff] }
 0x50d   : > { %v3333_v41 = vrot.slane %v3332_v11, 2  ;;  %v3470_v14 = vadd.f32 %v3469_v63, %v3468_v27  ;;  %3675 = vmatmul.mubr.f32.vlgmr.msra.gmra.mrb[134].mxu0 %v11402_v55 }
 0x50e   : > { %v3265_v62 = vadd.f32 %v3264_v43, %v3263_v1  ;;  %v3402_v52 = vrot.slane %v3401_v21, 2  ;;  %v5013_v18 = vpop.eup %5012 }
 0x50f   : > { %v3334_v16 = vadd.f32 %v3333_v41, %v3332_v11  ;;  %v3471_v35 = vrot.slane %v3470_v14, 2  ;;  %3817 = vmatmul.mubr.f32.vlgmr.msra.gmra.mrb[134].mxu1 %v11402_v55  ;;  %v3198_v5 = vmul.f32 %v5013_v18, %v3197_v26  ;;  %v3518_v37 = vrot.slane %v5013_v18, %v11405_v24  ;;  %v3870_v11 = vld [vmem:[%s5383_s24 + $0x8] sm:$0xff] }
 0x510   : > { %v3266_v25 = vrot.slane %v3265_v62, 1  ;;  %v3403_v9 = vadd.f32 %v3402_v52, %v3401_v21  ;;  %v3522_v44 = vrot.slane %v5013_v18, %v11406_v57  ;;  %v3526_v49 = vrot.slane %v5013_v18, %v11407_v30 }
 0x511   : > { %v3335_v29 = vrot.slane %v3334_v16, 1  ;;  %v3472_v3 = vadd.f32 %v3471_v35, %v3470_v14  ;;  %v3530_v10 = vrot.slane %v5013_v18, %v11408_v53  ;;  %v3535_v59 = vmul.f32 0.0, %v3518_v37  ;;  %v3872_v14 = vld [vmem:[%s5383_s24 + $0x18] sm:$0xff]  ;;  %s5176_s24 = smov [#allocation11]  }
 0x512   : > { %v3267_v45 = vadd.f32 %v3266_v25, %v3265_v62  ;;  %v3404_v40 = vrot.slane %v3403_v9, 1  ;;  %v3536_v13 = vmul.f32 0.0, %v3522_v44  ;;  %v3537_v39 = vmul.f32 0.0, %v3526_v49  ;;  %s5086_s11 = sshll.u32 %s5176_s24, 4  ;;  %s5087_s11 = int_to_ptr.vmem [resolvable:$false] %s5086_s11 }
 0x513   : > { %v3336_v48 = vadd.f32 %v3335_v29, %v3334_v16  ;;  %v3473_v15 = vrot.slane %v3472_v3, 1  ;;  %v3538_v27 = vmul.f32 0.0, %v3530_v10  ;;  %s5088_s9 = scalar_lea.vmem %s5087_s11, 1024  ;;  %p5089_p10 = scmp.lt.s32.totalorder %s9330_s25, %s5087_s11 }
 0x514   : > { %v3405_v33 = vadd.f32 %v3404_v40, %v3403_v9  ;;  %p5090_p12 = scmp.lt.s32.totalorder %s5088_s9, %s5082_s16 }
 0x515   : > { %v3474_v8 = vadd.f32 %v3473_v15, %v3472_v3  ;;  %v3479_v31 = vcombine.low %v3267_v45, %v3336_v48 }
 0x516   : > { %p5091_p1 = por %p5090_p12, %p5089_p10 }
 0x517   : > { %v3480_v4 = vcombine.low %v3405_v33, %v3474_v8  ;;  %v3487_v61 = vrot.slane %v3479_v31, %v11403_v28 }
 0x518   : > { %p5092_p2 = pnand %p5091_p1, %p5085_p4 }
 0x519   : > { %v3494_v20 = vrot.slane %v3480_v4, %v11403_v28 }
 0x51b   : > { %v3495_v19 = vcombine.low %v3487_v61, %v3494_v20 }
 0x51d   : > { %v3502_v34 = vrot.slane %v3495_v19, %v11403_v28 }
 0x51f   : > { %v3504_v51 = vadd.f32 %v3502_v34, %v3198_v5 }
 0x521   : > { %3509 = vst.msk [vmem:[#allocation4] sm:$0xf] %vm6184_vm1, %v3504_v51 }
 0x528   : > { %v3839_v23 = vld [vmem:[#allocation4] sm:$0xf] }
 0x529   : > { %v3844_v36 = vrot.slane %v3839_v23, %v11405_v24  ;;  %v3848_v56 = vrot.slane %v3839_v23, %v11406_v57  ;;  %v3852_v12 = vrot.slane %v3839_v23, %v11407_v30  ;;  %v3856_v42 = vrot.slane %v3839_v23, %v11408_v53 }
 0x52b   : > { %5014 = vrcp.f32 %v3844_v36 }
 0x52c   : > { %5016 = vrcp.f32 %v3848_v56 }
 0x52d   : > { %5018 = vrcp.f32 %v3852_v12 }
 0x52e   : > { %5020 = vrcp.f32 %v3856_v42 }
 0x535   : > { %v5015_v54 = vpop.eup %5014 }
 0x536   : > { %v5017_v58 = vpop.eup %5016 }
 0x537   : > { %v5019_v60 = vpop.eup %5018 }
 0x538   : > { %v5021_v43 = vpop.eup %5020 }
 0x5e0   : > { %v3676_v32 = vpop.f32.mrb[134].mxu0 }
 0x5e1   : > { %v3823_v38 = vadd.f32 %v3676_v32, %v3535_v59  ;;  %v3678_v17 = vpop.f32.mrb[135].mxu0 }
 0x5e2   : > { %v3818_v22 = vpop.f32.mrb[134].mxu1  ;;  %v3824_v47 = vadd.f32 %v3678_v17, %v3536_v13 }
 0x5e3   : > { %v3862_v1 = vmul.f32 %v5015_v54, %v3823_v38  ;;  %v3825_v46 = vadd.f32 %v3818_v22, %v3537_v39  ;;  %v3820_v63 = vpop.f32.mrb[135].mxu1 }
 0x5e4   : > { %v3864_v2 = vmul.f32 %v5017_v58, %v3824_v47  ;;  %v3826_v6 = vadd.f32 %v3820_v63, %v3538_v27 }
 0x5e5   : > { %v3873_v21 = vadd.f32 %v3869_v7, %v3862_v1  ;;  %v3866_v41 = vmul.f32 %v5019_v60, %v3825_v46 }
 0x5e6   : > { %v3874_v55 = vadd.f32 %v3870_v11, %v3864_v2  ;;  %v3868_v62 = vmul.f32 %v5021_v43, %v3826_v6 }
 0x5e7   : > { %3877 = vst [vmem:[%s388_s23] sm:$0xff] %v3873_v21  ;;  %v3875_v52 = vadd.f32 %v3871_v0, %v3866_v41 }
 0x5e8   : > { %3878 = vst [vmem:[%s388_s23 + $0x8] sm:$0xff] %v3874_v55  ;;  %v3876_v16 = vadd.f32 %v3872_v14, %v3868_v62 }
 0x5e9   : > { %3879 = vst [vmem:[%s388_s23 + $0x10] sm:$0xff] %v3875_v52 }
 0x5ea   : > { %3880 = vst [vmem:[%s388_s23 + $0x18] sm:$0xff] %v3876_v16 }
 0x5eb   : > { %5095 = shalt.err (!%p5092_p2)
}
 0x5ec   : > { %s5096_s12 = scalar_lea.hbm %s9328_s21, 512  ;;  %s5100_s0 = scalar_lea.hbm %s9385_s8, 1024 }
 0x5ed   : > { %p5097_p9 = scmp.ne.s32.totalorder %s9328_s21, %s5096_s12  ;;  %p5101_p6 = scmp.lt.u32.totalorder %s9328_s21, %s9385_s8 }
 0x5ee   : > { %p5102_p13 = scmp.lt.u32.totalorder %s5100_s0, %s5096_s12  ;;  %p5104_p0 = scmp.lt.u32.totalorder %s5096_s12, %s9328_s21 }
 0x5ef   : > { %p5098_p11 = pnand %p5097_p9, %p11409_p5 }
 0x5f0   : > { %p5103_p8 = por %p5102_p13, %p5101_p6 }
 0x5f1   : > { %p5099_p3 = pneg %p5098_p11 }
 0x5f2   : > { %p5105_p7 = por %p5104_p0, %p5103_p8 }
 0x5f4   : > { %p5106_p4 = pnand %p5105_p7, %p5099_p3 }
 0x5f6   : > { %5109 = shalt.err (!%p5106_p4)
}
 0x5f7   : > { %4431 = dma.vmem_to_hbm [thread:$0]  (%p11409_p5), %s9330_s25, 512, %s9328_s21, %s3882_s30  }
 0x5f8 PF: > { %s3910_s23 = sand.u32 1, %s5148_s27   ;;  %p11410_p10 = scmp.ne.s32.totalorder %s9992_s20, 0 }
 0x5f9   : > { %p11411_p12 = scmp.ge.s32.totalorder %s5168_s10, 2  ;;  %s3911_s26 = scalar_lea.sflag [#allocation8], %s3910_s23 }
 0x5fb   : > { %p4441_p1 = pnand %p11411_p12, %p11410_p10 }
 0x5fd   : > { %5143 = dma.done.wait (!%p4441_p1), %s3911_s26, 512  }
 0x5fe   : > { %5145 = vsyncadd (!%p4441_p1), %s3911_s26, 4294966784  ;;  %s27_s10 = sadd.s32 1, %s5168_s10   ;;  %s11412_s30 = sld [smem:[#allocation15_spill]] }
 0x5ff   : > { %p24_p2 = scmp.ge.s32.totalorder %s27_s10, 4   ;;  %s11413_s9 = sld [smem:[#allocation16_spill]] }
 0x600   : > { %s11414_s27 = smov %s5152_s28  ;;  %s11415_s28 = smov %s5156_s29 }
 0x601   : > { %s11416_s29 = smov %s5278_s19  ;;  %26 = sbr.rel (!%p24_p2) target bundleno = 10 (0xa), region = 118 }
 0x608   :  { %3916 = vsyncpa [#allocation7], 1 }
 0x609   :  { %3918 = vsyncpa [#allocation7 + $0x1], 1 }
 0x60a   :  { %3919 = vsyncpa [#allocation10], 1 }
 0x60b   :  { %3921 = vsyncpa [#allocation10 + $0x1], 1 }
 0x60c   :  { %3922 = vsyncpa [#allocation8], 1 }
 0x60d   :  { %3924 = vsyncpa [#allocation8 + $0x1], 1 }

</bundles_post_ra>
